<compile_context>
chip_gen: v6e
topology: v6e:2x2x1
jax: 0.10.0
libtpu: 0.0.40
codegen_flags: <defaults>
</compile_context>

<pallas_src>
import functools

import jax
import jax.numpy as jnp
from jax.experimental import pallas as pl
from jax.experimental.pallas import tpu as pltpu


# ---------------------------------------------------------------------------
# helpers
# ---------------------------------------------------------------------------

def _round_up(n, m):
    return ((n + m - 1) // m) * m


def _w9(w_oihw, dtype):
    """PyTorch (C_out, C_in, 3, 3) conv weight -> (9, C_out, C_in), tap-major."""
    c_out, c_in = w_oihw.shape[:2]
    return jnp.transpose(w_oihw, (2, 3, 0, 1)).reshape(9, c_out, c_in).astype(dtype)


def _plane_spec(c, p):
    return pl.BlockSpec((1, c, p), lambda b: (b, 0, 0))


def _conv_compiler_params():
    return pltpu.CompilerParams(dimension_semantics=("parallel",))


# ---------------------------------------------------------------------------
# in-kernel 3x3 "same" conv core (bias=False)
# ---------------------------------------------------------------------------

def _conv3x3_accumulate(plane, w9, scr_ref, width, lpad):
    """3x3 same-padding conv of one image plane.

    plane  : (C_in, P) value, P = H*W (row-major flattened spatial)
    w9     : (9, C_out, C_in) value (tap-major), MXU operand dtype
    scr_ref: VMEM scratch (C_in, P + 2*lpad), MXU operand dtype, lpad >= width + 1
    returns: (C_out, P) float32 accumulator
    """
    c_in, p = plane.shape
    c_out = w9.shape[1]

    # Stage the plane between two zero lane-margins: a +-1 row shift is then just
    # a lane offset of +-width, with out-of-image reads landing in the zeros.
    scr_ref[:, :lpad] = jnp.zeros((c_in, lpad), scr_ref.dtype)
    scr_ref[:, lpad + p:] = jnp.zeros((c_in, lpad), scr_ref.dtype)
    scr_ref[:, lpad:lpad + p] = plane.astype(scr_ref.dtype)

    # W-direction boundary masks (the flattened +-1 shift wraps across rows).
    col = jax.lax.broadcasted_iota(jnp.int32, (c_in, p), 1) % width
    not_first = col != 0            # output col 0 has no (w-1) neighbour
    not_last = col != (width - 1)   # output col W-1 has no (w+1) neighbour

    acc = jnp.zeros((c_out, p), jnp.float32)
    for kh in range(3):
        for kw in range(3):
            off = (kh - 1) * width + (kw - 1)
            tap = scr_ref[:, lpad + off:lpad + off + p]
            if kw == 0:
                tap = jnp.where(not_first, tap, jnp.zeros_like(tap))
            elif kw == 2:
                tap = jnp.where(not_last, tap, jnp.zeros_like(tap))
            # Wide-N (P >= 256 lanes) MXU matmul, f32 accumulation.
            acc = acc + jnp.dot(w9[kh * 3 + kw], tap,
                                preferred_element_type=jnp.float32)
    return acc


# ---------------------------------------------------------------------------
# kernel bodies
# ---------------------------------------------------------------------------

def _conv_prelu_kernel(width, lpad, x_ref, w_ref, a_ref, o_ref, scr):
    acc = _conv3x3_accumulate(x_ref[0], w_ref[...], scr, width, lpad)
    a = a_ref[...]                                    # (1, 1) PReLU slope
    o_ref[0] = jnp.where(acc > 0.0, acc, acc * a).astype(o_ref.dtype)


def _conv_chansum_kernel(width, lpad, x_ref, w_ref, o_ref, csum_ref, scr):
    acc = _conv3x3_accumulate(x_ref[0], w_ref[...], scr, width, lpad)
    o_ref[0] = acc.astype(o_ref.dtype)
    # CALayer pooling: per-channel sums taken straight off the f32 accumulator,
    # written once per image (no cross-step read-modify-write).
    csum_ref[0] = jnp.sum(acc, axis=-1, keepdims=True)


def _fused_scale_conv_prelu_kernel(width, lpad, res_ref, skip_ref, s_ref, w_ref,
                                   a_ref, y_ref, o_ref, scr):
    # Previous CAB's epilogue (CALayer scale + residual) fused into this conv.
    y = (res_ref[0].astype(jnp.float32) * s_ref[0]
         + skip_ref[0].astype(jnp.float32)).astype(y_ref.dtype)
    y_ref[0] = y                                      # still needed downstream
    acc = _conv3x3_accumulate(y, w_ref[...], scr, width, lpad)
    a = a_ref[...]
    o_ref[0] = jnp.where(acc > 0.0, acc, acc * a).astype(o_ref.dtype)


def _fused_scale_conv_skip_kernel(width, lpad, res_ref, skip_ref, s_ref,
                                  orbskip_ref, w_ref, o_ref, scr):
    # Last CAB's epilogue fused into the ORB tail conv; y never touches HBM.
    y = (res_ref[0].astype(jnp.float32) * s_ref[0]
         + skip_ref[0].astype(jnp.float32))
    acc = _conv3x3_accumulate(y, w_ref[...], scr, width, lpad)
    o_ref[0] = (acc + orbskip_ref[0].astype(jnp.float32)).astype(o_ref.dtype)


def _merge_kernel(orb_ref, enc_ref, dec_ref, we_ref, wd_ref, o_ref):
    cd = we_ref.dtype
    acc = jnp.dot(we_ref[...], enc_ref[0].astype(cd),
                  preferred_element_type=jnp.float32)
    acc = acc + jnp.dot(wd_ref[...], dec_ref[0].astype(cd),
                        preferred_element_type=jnp.float32)
    o_ref[0] = (acc + orb_ref[0].astype(jnp.float32)).astype(o_ref.dtype)


# ---------------------------------------------------------------------------
# pallas_call wrappers (grid=(B,), whole image plane per step, "parallel")
# ---------------------------------------------------------------------------

def conv3x3_prelu(x, w9, alpha, width):
    b, c_in, p = x.shape
    c_out = w9.shape[1]
    lpad = _round_up(width + 1, 128)
    return pl.pallas_call(
        functools.partial(_conv_prelu_kernel, width, lpad),
        grid=(b,),
        in_specs=[_plane_spec(c_in, p),
                  pl.BlockSpec((9, c_out, c_in), lambda b_: (0, 0, 0)),
                  pl.BlockSpec((1, 1), lambda b_: (0, 0))],
        out_specs=_plane_spec(c_out, p),
        out_shape=jax.ShapeDtypeStruct((b, c_out, p), x.dtype),
        scratch_shapes=[pltpu.VMEM((c_in, p + 2 * lpad), w9.dtype)],
        compiler_params=_conv_compiler_params(),
    )(x, w9, alpha)


def conv3x3_chansum(x, w9, width):
    b, c_in, p = x.shape
    c_out = w9.shape[1]
    lpad = _round_up(width + 1, 128)
    return pl.pallas_call(
        functools.partial(_conv_chansum_kernel, width, lpad),
        grid=(b,),
        in_specs=[_plane_spec(c_in, p),
                  pl.BlockSpec((9, c_out, c_in), lambda b_: (0, 0, 0))],
        out_specs=[_plane_spec(c_out, p),
                   pl.BlockSpec((1, c_out, 1), lambda b_: (b_, 0, 0))],
        out_shape=(jax.ShapeDtypeStruct((b, c_out, p), x.dtype),
                   jax.ShapeDtypeStruct((b, c_out, 1), jnp.float32)),
        scratch_shapes=[pltpu.VMEM((c_in, p + 2 * lpad), w9.dtype)],
        compiler_params=_conv_compiler_params(),
    )(x, w9)


def fused_scale_conv3x3_prelu(res, skip, s, w9, alpha, width):
    b, c_in, p = res.shape
    c_out = w9.shape[1]
    lpad = _round_up(width + 1, 128)
    return pl.pallas_call(
        functools.partial(_fused_scale_conv_prelu_kernel, width, lpad),
        grid=(b,),
        in_specs=[_plane_spec(c_in, p), _plane_spec(c_in, p),
                  pl.BlockSpec((1, c_in, 1), lambda b_: (b_, 0, 0)),
                  pl.BlockSpec((9, c_out, c_in), lambda b_: (0, 0, 0)),
                  pl.BlockSpec((1, 1), lambda b_: (0, 0))],
        out_specs=[_plane_spec(c_in, p), _plane_spec(c_out, p)],
        out_shape=(jax.ShapeDtypeStruct((b, c_in, p), res.dtype),
                   jax.ShapeDtypeStruct((b, c_out, p), res.dtype)),
        scratch_shapes=[pltpu.VMEM((c_in, p + 2 * lpad), w9.dtype)],
        compiler_params=_conv_compiler_params(),
    )(res, skip, s, w9, alpha)


def fused_scale_conv3x3_skip(res, skip, s, orb_skip, w9, width):
    b, c_in, p = res.shape
    c_out = w9.shape[1]
    lpad = _round_up(width + 1, 128)
    return pl.pallas_call(
        functools.partial(_fused_scale_conv_skip_kernel, width, lpad),
        grid=(b,),
        in_specs=[_plane_spec(c_in, p), _plane_spec(c_in, p),
                  pl.BlockSpec((1, c_in, 1), lambda b_: (b_, 0, 0)),
                  _plane_spec(c_out, p),
                  pl.BlockSpec((9, c_out, c_in), lambda b_: (0, 0, 0))],
        out_specs=_plane_spec(c_out, p),
        out_shape=jax.ShapeDtypeStruct((b, c_out, p), res.dtype),
        scratch_shapes=[pltpu.VMEM((c_in, p + 2 * lpad), w9.dtype)],
        compiler_params=_conv_compiler_params(),
    )(res, skip, s, orb_skip, w9)


def merge_1x1(orb, enc, dec, we, wd, out_dtype):
    b, c, p = orb.shape
    nf = enc.shape[1]
    return pl.pallas_call(
        _merge_kernel,
        grid=(b,),
        in_specs=[_plane_spec(c, p), _plane_spec(nf, p), _plane_spec(nf, p),
                  pl.BlockSpec((c, nf), lambda b_: (0, 0)),
                  pl.BlockSpec((c, nf), lambda b_: (0, 0))],
        out_specs=_plane_spec(c, p),
        out_shape=jax.ShapeDtypeStruct((b, c, p), out_dtype),
        compiler_params=_conv_compiler_params(),
    )(orb, enc, dec, we, wd)


# ---------------------------------------------------------------------------
# module assembly (NCHW at the boundary like PyTorch)
# ---------------------------------------------------------------------------

def _se_scales(chan_sums, hw, w1, w2):
    """CALayer squeeze-excite MLP, kept in plain XLA (two tiny matmuls + sigmoid
    are latency-only work).  chan_sums: (B, C, 1) f32 spatial sums."""
    y = chan_sums[:, :, 0] * (1.0 / hw)                  # (B, C) pooled mean
    h = jnp.maximum(y @ w1.T, 0.0)                       # 1x1 conv C -> C//r, ReLU
    return jax.nn.sigmoid(h @ w2.T)[:, :, None]          # 1x1 conv C//r -> C, Sigmoid


def orsnet_forward(x, encoder_outs, decoder_outs, params, *,
                   compute_dtype=jnp.bfloat16):
    """ORSNet.forward(x, encoder_outs, decoder_outs): NCHW in, NCHW out.

    compute_dtype controls only the MXU operand dtype (weights + staged conv
    operands); HBM activations and all accumulation stay float32.
    """
    b, c, h, w = x.shape
    p = h * w
    cd = compute_dtype
    orb_p = params["orb1"]

    xp = x.reshape(b, c, p)                              # free layout change

    prev_res, prev_skip, prev_s = None, xp, None
    for i, cab in enumerate(orb_p["cabs"]):
        w1_9 = _w9(cab["conv1_w"], cd)
        w2_9 = _w9(cab["conv2_w"], cd)
        alpha = jnp.asarray(cab["alpha"], jnp.float32).reshape(1, 1)
        if i == 0:
            cab_in = xp
            a1 = conv3x3_prelu(xp, w1_9, alpha, w)
        else:
            # Previous CAB's CALayer scale + residual fused into this conv.
            cab_in, a1 = fused_scale_conv3x3_prelu(prev_res, prev_skip, prev_s,
                                                   w1_9, alpha, w)
        res, csum = conv3x3_chansum(a1, w2_9, w)
        s = _se_scales(csum, float(h * w), cab["ca_w1"], cab["ca_w2"])
        prev_res, prev_skip, prev_s = res, cab_in, s

    orb_out = fused_scale_conv3x3_skip(prev_res, prev_skip, prev_s, xp,
                                       _w9(orb_p["tail_w"], cd), w)

    nf = encoder_outs.shape[1]
    out = merge_1x1(orb_out,
                    encoder_outs.reshape(b, nf, p),
                    decoder_outs.reshape(b, nf, p),
                    params["conv_enc1_w"].reshape(c, nf).astype(cd),
                    params["conv_dec1_w"].reshape(c, nf).astype(cd),
                    x.dtype)
    return out.reshape(b, c, h, w)


# ---------------------------------------------------------------------------
# pure-JAX reference (mirrors the PyTorch forward)
# ---------------------------------------------------------------------------

def _conv2d_ref(x, w):
    pad = w.shape[-1] // 2
    return jax.lax.conv_general_dilated(
        x, w, window_strides=(1, 1), padding=[(pad, pad), (pad, pad)],
        dimension_numbers=("NCHW", "OIHW", "NCHW"))


def _calayer_ref(x, w1, w2):
    y = jnp.mean(x, axis=(2, 3))
    hid = jnp.maximum(y @ w1.T, 0.0)
    s = jax.nn.sigmoid(hid @ w2.T)
    return x * s[:, :, None, None]


def _cab_ref(x, p):
    r = _conv2d_ref(x, p["conv1_w"])
    r = jnp.where(r > 0.0, r, p["alpha"] * r)
    r = _conv2d_ref(r, p["conv2_w"])
    r = _calayer_ref(r, p["ca_w1"], p["ca_w2"])
    return r + x


def _orb_ref(x, p):
    y = x
    for cp in p["cabs"]:
        y = _cab_ref(y, cp)
    return _conv2d_ref(y, p["tail_w"]) + x


def orsnet_ref(x, enc, dec, params):
    o = _orb_ref(x, params["orb1"])
    return (o + _conv2d_ref(enc, params["conv_enc1_w"])
              + _conv2d_ref(dec, params["conv_dec1_w"]))


# ---------------------------------------------------------------------------
# main
# ---------------------------------------------------------------------------

if __name__ == "__main__":
    # Small shapes consistent with the module:
    #   n_feat=8, scale_orsnetfeats=8 -> ORB channels C=16, reduction=4, num_cab=2.
    B, H, W = 2, 16, 16
    n_feat, scale_orsnetfeats = 8, 8
    C = n_feat + scale_orsnetfeats
    reduction = 4
    Cr = C // reduction
    num_cab = 2
    prelu_alpha = 0.25                 # act = nn.PReLU() (single shared parameter)

    keys = iter(jax.random.split(jax.random.PRNGKey(0), 32))

    def rnd(shape, scale=0.1):
        return scale * jax.random.normal(next(keys), shape, dtype=jnp.float32)

    cabs = [dict(conv1_w=rnd((C, C, 3, 3)),
                 conv2_w=rnd((C, C, 3, 3)),
                 alpha=prelu_alpha,
                 ca_w1=rnd((Cr, C)),          # CALayer 1x1 conv C -> C//r
                 ca_w2=rnd((C, Cr)))          # CALayer 1x1 conv C//r -> C
            for _ in range(num_cab)]
    params = dict(
        orb1=dict(cabs=cabs, tail_w=rnd((C, C, 3, 3))),
        conv_enc1_w=rnd((C, n_feat, 1, 1)),
        conv_dec1_w=rnd((C, n_feat, 1, 1)),
    )

    x = rnd((B, C, H, W), 1.0)
    enc = rnd((B, n_feat, H, W), 1.0)
    dec = rnd((B, n_feat, H, W), 1.0)

    ref = orsnet_ref(x, enc, dec, params)

    # Strict check: f32 MXU operands must match the XLA reference tightly.
    fwd32 = jax.jit(functools.partial(orsnet_forward, compute_dtype=jnp.float32))
    out32 = jax.block_until_ready(fwd32(x, enc, dec, params))
    assert out32.shape == (B, C, H, W)
    err32 = float(jnp.max(jnp.abs(out32 - ref)))
    assert err32 < 2e-4, f"f32 mismatch vs reference: max abs err {err32}"

    # Fast path: bf16 MXU operands with f32 accumulation / f32 storage.
    # Looser bound accounts for bf16 operand rounding stacked across 5 convs
    # (typically ~2e-2 max abs deviation at these magnitudes).
    fwd16 = jax.jit(functools.partial(orsnet_forward, compute_dtype=jnp.bfloat16))
    out16 = jax.block_until_ready(fwd16(x, enc, dec, params))
    err16 = float(jnp.max(jnp.abs(out16 - ref)))
    assert err16 < 1e-1, f"bf16 mismatch vs reference: max abs err {err16}"

    print("KERNEL_OK")
</pallas_src>

<mosaic_0001>
module attributes {stable_mosaic.version = 11 : i64} {
  func.func @_conv_prelu_kernel(%arg0: i32, %arg1: memref<1x16x256xf32, #tpu.memory_space<vmem>>, %arg2: memref<9x16x16xf32, #tpu.memory_space<vmem>>, %arg3: memref<1x1xf32, #tpu.memory_space<vmem>>, %arg4: memref<1x16x256xf32, #tpu.memory_space<vmem>>, %arg5: memref<16x512xf32, #tpu.memory_space<vmem>>) attributes {dimension_semantics = [#tpu.dimension_semantics<parallel>], iteration_bounds = array<i64: 2>, scalar_prefetch = 0 : i64, scratch_operands = 1 : i64, tpu.core_type = #tpu.core_type<tc>, window_params = [{transform_indices = @transform_0, window_bounds = array<i64: 1, 16, 256>}, {pipeline_mode = #tpu.pipeline_mode<synchronous>, transform_indices = @transform_1, window_bounds = array<i64: 9, 16, 16>}, {pipeline_mode = #tpu.pipeline_mode<synchronous>, transform_indices = @transform_2, window_bounds = array<i64: 1, 1>}, {transform_indices = @transform_3, window_bounds = array<i64: 1, 16, 256>}]} {
    %c0 = arith.constant 0 : index
    %c0_0 = arith.constant 0 : index
    %c0_1 = arith.constant 0 : index
    %0 = vector.load %arg1[%c0, %c0_0, %c0_1] : memref<1x16x256xf32, #tpu.memory_space<vmem>>, vector<1x16x256xf32>
    %1 = vector.shape_cast %0 : vector<1x16x256xf32> to vector<16x256xf32>
    %c0_2 = arith.constant 0 : index
    %c0_3 = arith.constant 0 : index
    %c0_4 = arith.constant 0 : index
    %2 = vector.load %arg2[%c0_2, %c0_3, %c0_4] : memref<9x16x16xf32, #tpu.memory_space<vmem>>, vector<9x16x16xf32>
    %cst = arith.constant 0.000000e+00 : f32
    %3 = vector.broadcast %cst : f32 to vector<16x128xf32>
    %c0_5 = arith.constant 0 : index
    %c0_6 = arith.constant 0 : index
    %4 = vector.load %arg5[%c0_5, %c0_6] : memref<16x512xf32, #tpu.memory_space<vmem>>, vector<16x128xf32>
    tpu.vector_store %arg5[%c0_5, %c0_6], %3 {strides = array<i32>} : memref<16x512xf32, #tpu.memory_space<vmem>>, vector<16x128xf32>,
    %cst_7 = arith.constant 0.000000e+00 : f32
    %5 = vector.broadcast %cst_7 : f32 to vector<16x128xf32>
    %c0_8 = arith.constant 0 : index
    %c384 = arith.constant 384 : index
    %6 = vector.load %arg5[%c0_8, %c384] : memref<16x512xf32, #tpu.memory_space<vmem>>, vector<16x128xf32>
    tpu.vector_store %arg5[%c0_8, %c384], %5 {strides = array<i32>} : memref<16x512xf32, #tpu.memory_space<vmem>>, vector<16x128xf32>,
    %c0_9 = arith.constant 0 : index
    %c128 = arith.constant 128 : index
    %7 = vector.load %arg5[%c0_9, %c128] : memref<16x512xf32, #tpu.memory_space<vmem>>, vector<16x256xf32>
    tpu.vector_store %arg5[%c0_9, %c128], %1 {strides = array<i32>} : memref<16x512xf32, #tpu.memory_space<vmem>>, vector<16x256xf32>,
    %8 = tpu.iota {dimensions = array<i32: 1>} : vector<16x256xi32>
    %c16_i32 = arith.constant 16 : i32
    %c0_i32 = arith.constant 0 : i32
    %9 = arith.cmpi eq, %c16_i32, %c0_i32 : i32
    %c1_i32 = arith.constant 1 : i32
    %10 = arith.select %9, %c1_i32, %c16_i32 : i32
    %11 = vector.broadcast %10 : i32 to vector<16x256xi32>
    %12 = arith.remsi %8, %11 : vector<16x256xi32>
    %c0_i32_10 = arith.constant 0 : i32
    %13 = vector.broadcast %c0_i32_10 : i32 to vector<16x256xi32>
    %14 = arith.cmpi ne, %12, %13 : vector<16x256xi32>
    %c0_i32_11 = arith.constant 0 : i32
    %15 = vector.broadcast %c0_i32_11 : i32 to vector<16x256xi32>
    %16 = arith.cmpi slt, %12, %15 : vector<16x256xi32>
    %c0_i32_12 = arith.constant 0 : i32
    %17 = arith.cmpi slt, %10, %c0_i32_12 : i32
    %18 = vector.broadcast %17 : i1 to vector<16x256xi1>
    %19 = vector.broadcast %18 : vector<16x256xi1> to vector<16x256xi1>
    %20 = arith.xori %16, %19 : vector<16x256xi1>
    %21 = arith.andi %20, %14 : vector<16x256xi1>
    %22 = vector.broadcast %10 : i32 to vector<16x256xi32>
    %23 = arith.addi %12, %22 : vector<16x256xi32>
    %24 = arith.select %21, %23, %12 : vector<16x256xi1>, vector<16x256xi32>
    %c0_i32_13 = arith.constant 0 : i32
    %25 = vector.broadcast %c0_i32_13 : i32 to vector<16x256xi32>
    %26 = arith.cmpi ne, %24, %25 : vector<16x256xi32>
    %c15_i32 = arith.constant 15 : i32
    %27 = vector.broadcast %c15_i32 : i32 to vector<16x256xi32>
    %28 = arith.cmpi ne, %24, %27 : vector<16x256xi32>
    %cst_14 = arith.constant 0.000000e+00 : f32
    %29 = vector.broadcast %cst_14 : f32 to vector<16x256xf32>
    %c0_15 = arith.constant 0 : index
    %c111 = arith.constant 111 : index
    %30 = vector.load %arg5[%c0_15, %c111] : memref<16x512xf32, #tpu.memory_space<vmem>>, vector<16x256xf32>
    %cst_16 = arith.constant 0.000000e+00 : f32
    %31 = vector.broadcast %cst_16 : f32 to vector<16x256xf32>
    %32 = arith.select %26, %30, %31 : vector<16x256xi1>, vector<16x256xf32>
    %33 = vector.extract_strided_slice %2 {offsets = [0, 0, 0], sizes = [1, 16, 16], strides = [1, 1, 1]} : vector<9x16x16xf32> to vector<1x16x16xf32>
    %34 = vector.shape_cast %33 : vector<1x16x16xf32> to vector<16x16xf32>
    %cst_17 = arith.constant dense<0.000000e+00> : vector<16x256xf32>
    %35 = tpu.matmul %34, %32, %cst_17 {dimension_numbers = #tpu.dot_dimension_numbers<[1], [0], [0], [1], [0, 0, 1, 1], [], []>} : vector<16x16xf32>, vector<16x256xf32>, vector<16x256xf32> -> vector<16x256xf32>
    %36 = arith.addf %29, %35 : vector<16x256xf32>
    %c0_18 = arith.constant 0 : index
    %c112 = arith.constant 112 : index
    %37 = vector.load %arg5[%c0_18, %c112] : memref<16x512xf32, #tpu.memory_space<vmem>>, vector<16x256xf32>
    %38 = vector.extract_strided_slice %2 {offsets = [1, 0, 0], sizes = [1, 16, 16], strides = [1, 1, 1]} : vector<9x16x16xf32> to vector<1x16x16xf32>
    %39 = vector.shape_cast %38 : vector<1x16x16xf32> to vector<16x16xf32>
    %cst_19 = arith.constant dense<0.000000e+00> : vector<16x256xf32>
    %40 = tpu.matmul %39, %37, %cst_19 {dimension_numbers = #tpu.dot_dimension_numbers<[1], [0], [0], [1], [0, 0, 1, 1], [], []>} : vector<16x16xf32>, vector<16x256xf32>, vector<16x256xf32> -> vector<16x256xf32>
    %41 = arith.addf %36, %40 : vector<16x256xf32>
    %c0_20 = arith.constant 0 : index
    %c113 = arith.constant 113 : index
    %42 = vector.load %arg5[%c0_20, %c113] : memref<16x512xf32, #tpu.memory_space<vmem>>, vector<16x256xf32>
    %cst_21 = arith.constant 0.000000e+00 : f32
    %43 = vector.broadcast %cst_21 : f32 to vector<16x256xf32>
    %44 = arith.select %28, %42, %43 : vector<16x256xi1>, vector<16x256xf32>
    %45 = vector.extract_strided_slice %2 {offsets = [2, 0, 0], sizes = [1, 16, 16], strides = [1, 1, 1]} : vector<9x16x16xf32> to vector<1x16x16xf32>
    %46 = vector.shape_cast %45 : vector<1x16x16xf32> to vector<16x16xf32>
    %cst_22 = arith.constant dense<0.000000e+00> : vector<16x256xf32>
    %47 = tpu.matmul %46, %44, %cst_22 {dimension_numbers = #tpu.dot_dimension_numbers<[1], [0], [0], [1], [0, 0, 1, 1], [], []>} : vector<16x16xf32>, vector<16x256xf32>, vector<16x256xf32> -> vector<16x256xf32>
    %48 = arith.addf %41, %47 : vector<16x256xf32>
    %c0_23 = arith.constant 0 : index
    %c127 = arith.constant 127 : index
    %49 = vector.load %arg5[%c0_23, %c127] : memref<16x512xf32, #tpu.memory_space<vmem>>, vector<16x256xf32>
    %cst_24 = arith.constant 0.000000e+00 : f32
    %50 = vector.broadcast %cst_24 : f32 to vector<16x256xf32>
    %51 = arith.select %26, %49, %50 : vector<16x256xi1>, vector<16x256xf32>
    %52 = vector.extract_strided_slice %2 {offsets = [3, 0, 0], sizes = [1, 16, 16], strides = [1, 1, 1]} : vector<9x16x16xf32> to vector<1x16x16xf32>
    %53 = vector.shape_cast %52 : vector<1x16x16xf32> to vector<16x16xf32>
    %cst_25 = arith.constant dense<0.000000e+00> : vector<16x256xf32>
    %54 = tpu.matmul %53, %51, %cst_25 {dimension_numbers = #tpu.dot_dimension_numbers<[1], [0], [0], [1], [0, 0, 1, 1], [], []>} : vector<16x16xf32>, vector<16x256xf32>, vector<16x256xf32> -> vector<16x256xf32>
    %55 = arith.addf %48, %54 : vector<16x256xf32>
    %c0_26 = arith.constant 0 : index
    %c128_27 = arith.constant 128 : index
    %56 = vector.load %arg5[%c0_26, %c128_27] : memref<16x512xf32, #tpu.memory_space<vmem>>, vector<16x256xf32>
    %57 = vector.extract_strided_slice %2 {offsets = [4, 0, 0], sizes = [1, 16, 16], strides = [1, 1, 1]} : vector<9x16x16xf32> to vector<1x16x16xf32>
    %58 = vector.shape_cast %57 : vector<1x16x16xf32> to vector<16x16xf32>
    %cst_28 = arith.constant dense<0.000000e+00> : vector<16x256xf32>
    %59 = tpu.matmul %58, %56, %cst_28 {dimension_numbers = #tpu.dot_dimension_numbers<[1], [0], [0], [1], [0, 0, 1, 1], [], []>} : vector<16x16xf32>, vector<16x256xf32>, vector<16x256xf32> -> vector<16x256xf32>
    %60 = arith.addf %55, %59 : vector<16x256xf32>
    %c0_29 = arith.constant 0 : index
    %c129 = arith.constant 129 : index
    %61 = vector.load %arg5[%c0_29, %c129] : memref<16x512xf32, #tpu.memory_space<vmem>>, vector<16x256xf32>
    %cst_30 = arith.constant 0.000000e+00 : f32
    %62 = vector.broadcast %cst_30 : f32 to vector<16x256xf32>
    %63 = arith.select %28, %61, %62 : vector<16x256xi1>, vector<16x256xf32>
    %64 = vector.extract_strided_slice %2 {offsets = [5, 0, 0], sizes = [1, 16, 16], strides = [1, 1, 1]} : vector<9x16x16xf32> to vector<1x16x16xf32>
    %65 = vector.shape_cast %64 : vector<1x16x16xf32> to vector<16x16xf32>
    %cst_31 = arith.constant dense<0.000000e+00> : vector<16x256xf32>
    %66 = tpu.matmul %65, %63, %cst_31 {dimension_numbers = #tpu.dot_dimension_numbers<[1], [0], [0], [1], [0, 0, 1, 1], [], []>} : vector<16x16xf32>, vector<16x256xf32>, vector<16x256xf32> -> vector<16x256xf32>
    %67 = arith.addf %60, %66 : vector<16x256xf32>
    %c0_32 = arith.constant 0 : index
    %c143 = arith.constant 143 : index
    %68 = vector.load %arg5[%c0_32, %c143] : memref<16x512xf32, #tpu.memory_space<vmem>>, vector<16x256xf32>
    %cst_33 = arith.constant 0.000000e+00 : f32
    %69 = vector.broadcast %cst_33 : f32 to vector<16x256xf32>
    %70 = arith.select %26, %68, %69 : vector<16x256xi1>, vector<16x256xf32>
    %71 = vector.extract_strided_slice %2 {offsets = [6, 0, 0], sizes = [1, 16, 16], strides = [1, 1, 1]} : vector<9x16x16xf32> to vector<1x16x16xf32>
    %72 = vector.shape_cast %71 : vector<1x16x16xf32> to vector<16x16xf32>
    %cst_34 = arith.constant dense<0.000000e+00> : vector<16x256xf32>
    %73 = tpu.matmul %72, %70, %cst_34 {dimension_numbers = #tpu.dot_dimension_numbers<[1], [0], [0], [1], [0, 0, 1, 1], [], []>} : vector<16x16xf32>, vector<16x256xf32>, vector<16x256xf32> -> vector<16x256xf32>
    %74 = arith.addf %67, %73 : vector<16x256xf32>
    %c0_35 = arith.constant 0 : index
    %c144 = arith.constant 144 : index
    %75 = vector.load %arg5[%c0_35, %c144] : memref<16x512xf32, #tpu.memory_space<vmem>>, vector<16x256xf32>
    %76 = vector.extract_strided_slice %2 {offsets = [7, 0, 0], sizes = [1, 16, 16], strides = [1, 1, 1]} : vector<9x16x16xf32> to vector<1x16x16xf32>
    %77 = vector.shape_cast %76 : vector<1x16x16xf32> to vector<16x16xf32>
    %cst_36 = arith.constant dense<0.000000e+00> : vector<16x256xf32>
    %78 = tpu.matmul %77, %75, %cst_36 {dimension_numbers = #tpu.dot_dimension_numbers<[1], [0], [0], [1], [0, 0, 1, 1], [], []>} : vector<16x16xf32>, vector<16x256xf32>, vector<16x256xf32> -> vector<16x256xf32>
    %79 = arith.addf %74, %78 : vector<16x256xf32>
    %c0_37 = arith.constant 0 : index
    %c145 = arith.constant 145 : index
    %80 = vector.load %arg5[%c0_37, %c145] : memref<16x512xf32, #tpu.memory_space<vmem>>, vector<16x256xf32>
    %cst_38 = arith.constant 0.000000e+00 : f32
    %81 = vector.broadcast %cst_38 : f32 to vector<16x256xf32>
    %82 = arith.select %28, %80, %81 : vector<16x256xi1>, vector<16x256xf32>
    %83 = vector.extract_strided_slice %2 {offsets = [8, 0, 0], sizes = [1, 16, 16], strides = [1, 1, 1]} : vector<9x16x16xf32> to vector<1x16x16xf32>
    %84 = vector.shape_cast %83 : vector<1x16x16xf32> to vector<16x16xf32>
    %cst_39 = arith.constant dense<0.000000e+00> : vector<16x256xf32>
    %85 = tpu.matmul %84, %82, %cst_39 {dimension_numbers = #tpu.dot_dimension_numbers<[1], [0], [0], [1], [0, 0, 1, 1], [], []>} : vector<16x16xf32>, vector<16x256xf32>, vector<16x256xf32> -> vector<16x256xf32>
    %86 = arith.addf %79, %85 : vector<16x256xf32>
    %c0_40 = arith.constant 0 : index
    %c0_41 = arith.constant 0 : index
    %87 = vector.load %arg3[%c0_40, %c0_41] : memref<1x1xf32, #tpu.memory_space<vmem>>, vector<1x1xf32>
    %cst_42 = arith.constant 0.000000e+00 : f32
    %88 = vector.broadcast %cst_42 : f32 to vector<16x256xf32>
    %89 = arith.cmpf ogt, %86, %88 : vector<16x256xf32>
    %90 = vector.broadcast %87 : vector<1x1xf32> to vector<16x256xf32>
    %91 = arith.mulf %86, %90 : vector<16x256xf32>
    %92 = arith.select %89, %86, %91 : vector<16x256xi1>, vector<16x256xf32>
    %c0_43 = arith.constant 0 : index
    %c0_44 = arith.constant 0 : index
    %c0_45 = arith.constant 0 : index
    %93 = vector.load %arg4[%c0_43, %c0_44, %c0_45] : memref<1x16x256xf32, #tpu.memory_space<vmem>>, vector<1x16x256xf32>
    %94 = vector.shape_cast %93 : vector<1x16x256xf32> to vector<16x256xf32>
    %95 = vector.shape_cast %92 : vector<16x256xf32> to vector<1x16x256xf32>
    tpu.vector_store %arg4[%c0_43, %c0_44, %c0_45], %95 {strides = array<i32>} : memref<1x16x256xf32, #tpu.memory_space<vmem>>, vector<1x16x256xf32>,
    return
  }
  func.func @transform_0(%arg0: i32) -> (i32, i32, i32) {
    %c0_i32 = arith.constant 0 : i32
    %c0_i32_0 = arith.constant 0 : i32
    %c0_i32_1 = arith.constant 0 : i32
    return %arg0, %c0_i32, %c0_i32_0 : i32, i32, i32
  }
  func.func @transform_1(%arg0: i32) -> (i32, i32, i32) {
    %c0_i32 = arith.constant 0 : i32
    %c0_i32_0 = arith.constant 0 : i32
    %c0_i32_1 = arith.constant 0 : i32
    %c0_i32_2 = arith.constant 0 : i32
    return %c0_i32, %c0_i32_0, %c0_i32_1 : i32, i32, i32
  }
  func.func @transform_2(%arg0: i32) -> (i32, i32) {
    %c0_i32 = arith.constant 0 : i32
    %c0_i32_0 = arith.constant 0 : i32
    %c0_i32_1 = arith.constant 0 : i32
    return %c0_i32, %c0_i32_0 : i32, i32
  }
  func.func @transform_3(%arg0: i32) -> (i32, i32, i32) {
    %c0_i32 = arith.constant 0 : i32
    %c0_i32_0 = arith.constant 0 : i32
    %c0_i32_1 = arith.constant 0 : i32
    return %arg0, %c0_i32, %c0_i32_0 : i32, i32, i32
  }
}

module attributes {stable_mosaic.version = 11 : i64} {
  func.func @_conv_chansum_kernel(%arg0: i32, %arg1: memref<1x16x256xf32, #tpu.memory_space<vmem>>, %arg2: memref<9x16x16xf32, #tpu.memory_space<vmem>>, %arg3: memref<1x16x256xf32, #tpu.memory_space<vmem>>, %arg4: memref<1x16x1xf32, #tpu.memory_space<vmem>>, %arg5: memref<16x512xf32, #tpu.memory_space<vmem>>) attributes {dimension_semantics = [#tpu.dimension_semantics<parallel>], iteration_bounds = array<i64: 2>, scalar_prefetch = 0 : i64, scratch_operands = 1 : i64, tpu.core_type = #tpu.core_type<tc>, window_params = [{transform_indices = @transform_0, window_bounds = array<i64: 1, 16, 256>}, {pipeline_mode = #tpu.pipeline_mode<synchronous>, transform_indices = @transform_1, window_bounds = array<i64: 9, 16, 16>}, {transform_indices = @transform_2, window_bounds = array<i64: 1, 16, 256>}, {transform_indices = @transform_3, window_bounds = array<i64: 1, 16, 1>}]} {
    %c0 = arith.constant 0 : index
    %c0_0 = arith.constant 0 : index
    %c0_1 = arith.constant 0 : index
    %0 = vector.load %arg1[%c0, %c0_0, %c0_1] : memref<1x16x256xf32, #tpu.memory_space<vmem>>, vector<1x16x256xf32>
    %1 = vector.shape_cast %0 : vector<1x16x256xf32> to vector<16x256xf32>
    %c0_2 = arith.constant 0 : index
    %c0_3 = arith.constant 0 : index
    %c0_4 = arith.constant 0 : index
    %2 = vector.load %arg2[%c0_2, %c0_3, %c0_4] : memref<9x16x16xf32, #tpu.memory_space<vmem>>, vector<9x16x16xf32>
    %cst = arith.constant 0.000000e+00 : f32
    %3 = vector.broadcast %cst : f32 to vector<16x128xf32>
    %c0_5 = arith.constant 0 : index
    %c0_6 = arith.constant 0 : index
    %4 = vector.load %arg5[%c0_5, %c0_6] : memref<16x512xf32, #tpu.memory_space<vmem>>, vector<16x128xf32>
    tpu.vector_store %arg5[%c0_5, %c0_6], %3 {strides = array<i32>} : memref<16x512xf32, #tpu.memory_space<vmem>>, vector<16x128xf32>,
    %cst_7 = arith.constant 0.000000e+00 : f32
    %5 = vector.broadcast %cst_7 : f32 to vector<16x128xf32>
    %c0_8 = arith.constant 0 : index
    %c384 = arith.constant 384 : index
    %6 = vector.load %arg5[%c0_8, %c384] : memref<16x512xf32, #tpu.memory_space<vmem>>, vector<16x128xf32>
    tpu.vector_store %arg5[%c0_8, %c384], %5 {strides = array<i32>} : memref<16x512xf32, #tpu.memory_space<vmem>>, vector<16x128xf32>,
    %c0_9 = arith.constant 0 : index
    %c128 = arith.constant 128 : index
    %7 = vector.load %arg5[%c0_9, %c128] : memref<16x512xf32, #tpu.memory_space<vmem>>, vector<16x256xf32>
    tpu.vector_store %arg5[%c0_9, %c128], %1 {strides = array<i32>} : memref<16x512xf32, #tpu.memory_space<vmem>>, vector<16x256xf32>,
    %8 = tpu.iota {dimensions = array<i32: 1>} : vector<16x256xi32>
    %c16_i32 = arith.constant 16 : i32
    %c0_i32 = arith.constant 0 : i32
    %9 = arith.cmpi eq, %c16_i32, %c0_i32 : i32
    %c1_i32 = arith.constant 1 : i32
    %10 = arith.select %9, %c1_i32, %c16_i32 : i32
    %11 = vector.broadcast %10 : i32 to vector<16x256xi32>
    %12 = arith.remsi %8, %11 : vector<16x256xi32>
    %c0_i32_10 = arith.constant 0 : i32
    %13 = vector.broadcast %c0_i32_10 : i32 to vector<16x256xi32>
    %14 = arith.cmpi ne, %12, %13 : vector<16x256xi32>
    %c0_i32_11 = arith.constant 0 : i32
    %15 = vector.broadcast %c0_i32_11 : i32 to vector<16x256xi32>
    %16 = arith.cmpi slt, %12, %15 : vector<16x256xi32>
    %c0_i32_12 = arith.constant 0 : i32
    %17 = arith.cmpi slt, %10, %c0_i32_12 : i32
    %18 = vector.broadcast %17 : i1 to vector<16x256xi1>
    %19 = vector.broadcast %18 : vector<16x256xi1> to vector<16x256xi1>
    %20 = arith.xori %16, %19 : vector<16x256xi1>
    %21 = arith.andi %20, %14 : vector<16x256xi1>
    %22 = vector.broadcast %10 : i32 to vector<16x256xi32>
    %23 = arith.addi %12, %22 : vector<16x256xi32>
    %24 = arith.select %21, %23, %12 : vector<16x256xi1>, vector<16x256xi32>
    %c0_i32_13 = arith.constant 0 : i32
    %25 = vector.broadcast %c0_i32_13 : i32 to vector<16x256xi32>
    %26 = arith.cmpi ne, %24, %25 : vector<16x256xi32>
    %c15_i32 = arith.constant 15 : i32
    %27 = vector.broadcast %c15_i32 : i32 to vector<16x256xi32>
    %28 = arith.cmpi ne, %24, %27 : vector<16x256xi32>
    %cst_14 = arith.constant 0.000000e+00 : f32
    %29 = vector.broadcast %cst_14 : f32 to vector<16x256xf32>
    %c0_15 = arith.constant 0 : index
    %c111 = arith.constant 111 : index
    %30 = vector.load %arg5[%c0_15, %c111] : memref<16x512xf32, #tpu.memory_space<vmem>>, vector<16x256xf32>
    %cst_16 = arith.constant 0.000000e+00 : f32
    %31 = vector.broadcast %cst_16 : f32 to vector<16x256xf32>
    %32 = arith.select %26, %30, %31 : vector<16x256xi1>, vector<16x256xf32>
    %33 = vector.extract_strided_slice %2 {offsets = [0, 0, 0], sizes = [1, 16, 16], strides = [1, 1, 1]} : vector<9x16x16xf32> to vector<1x16x16xf32>
    %34 = vector.shape_cast %33 : vector<1x16x16xf32> to vector<16x16xf32>
    %cst_17 = arith.constant dense<0.000000e+00> : vector<16x256xf32>
    %35 = tpu.matmul %34, %32, %cst_17 {dimension_numbers = #tpu.dot_dimension_numbers<[1], [0], [0], [1], [0, 0, 1, 1], [], []>} : vector<16x16xf32>, vector<16x256xf32>, vector<16x256xf32> -> vector<16x256xf32>
    %36 = arith.addf %29, %35 : vector<16x256xf32>
    %c0_18 = arith.constant 0 : index
    %c112 = arith.constant 112 : index
    %37 = vector.load %arg5[%c0_18, %c112] : memref<16x512xf32, #tpu.memory_space<vmem>>, vector<16x256xf32>
    %38 = vector.extract_strided_slice %2 {offsets = [1, 0, 0], sizes = [1, 16, 16], strides = [1, 1, 1]} : vector<9x16x16xf32> to vector<1x16x16xf32>
    %39 = vector.shape_cast %38 : vector<1x16x16xf32> to vector<16x16xf32>
    %cst_19 = arith.constant dense<0.000000e+00> : vector<16x256xf32>
    %40 = tpu.matmul %39, %37, %cst_19 {dimension_numbers = #tpu.dot_dimension_numbers<[1], [0], [0], [1], [0, 0, 1, 1], [], []>} : vector<16x16xf32>, vector<16x256xf32>, vector<16x256xf32> -> vector<16x256xf32>
    %41 = arith.addf %36, %40 : vector<16x256xf32>
    %c0_20 = arith.constant 0 : index
    %c113 = arith.constant 113 : index
    %42 = vector.load %arg5[%c0_20, %c113] : memref<16x512xf32, #tpu.memory_space<vmem>>, vector<16x256xf32>
    %cst_21 = arith.constant 0.000000e+00 : f32
    %43 = vector.broadcast %cst_21 : f32 to vector<16x256xf32>
    %44 = arith.select %28, %42, %43 : vector<16x256xi1>, vector<16x256xf32>
    %45 = vector.extract_strided_slice %2 {offsets = [2, 0, 0], sizes = [1, 16, 16], strides = [1, 1, 1]} : vector<9x16x16xf32> to vector<1x16x16xf32>
    %46 = vector.shape_cast %45 : vector<1x16x16xf32> to vector<16x16xf32>
    %cst_22 = arith.constant dense<0.000000e+00> : vector<16x256xf32>
    %47 = tpu.matmul %46, %44, %cst_22 {dimension_numbers = #tpu.dot_dimension_numbers<[1], [0], [0], [1], [0, 0, 1, 1], [], []>} : vector<16x16xf32>, vector<16x256xf32>, vector<16x256xf32> -> vector<16x256xf32>
    %48 = arith.addf %41, %47 : vector<16x256xf32>
    %c0_23 = arith.constant 0 : index
    %c127 = arith.constant 127 : index
    %49 = vector.load %arg5[%c0_23, %c127] : memref<16x512xf32, #tpu.memory_space<vmem>>, vector<16x256xf32>
    %cst_24 = arith.constant 0.000000e+00 : f32
    %50 = vector.broadcast %cst_24 : f32 to vector<16x256xf32>
    %51 = arith.select %26, %49, %50 : vector<16x256xi1>, vector<16x256xf32>
    %52 = vector.extract_strided_slice %2 {offsets = [3, 0, 0], sizes = [1, 16, 16], strides = [1, 1, 1]} : vector<9x16x16xf32> to vector<1x16x16xf32>
    %53 = vector.shape_cast %52 : vector<1x16x16xf32> to vector<16x16xf32>
    %cst_25 = arith.constant dense<0.000000e+00> : vector<16x256xf32>
    %54 = tpu.matmul %53, %51, %cst_25 {dimension_numbers = #tpu.dot_dimension_numbers<[1], [0], [0], [1], [0, 0, 1, 1], [], []>} : vector<16x16xf32>, vector<16x256xf32>, vector<16x256xf32> -> vector<16x256xf32>
    %55 = arith.addf %48, %54 : vector<16x256xf32>
    %c0_26 = arith.constant 0 : index
    %c128_27 = arith.constant 128 : index
    %56 = vector.load %arg5[%c0_26, %c128_27] : memref<16x512xf32, #tpu.memory_space<vmem>>, vector<16x256xf32>
    %57 = vector.extract_strided_slice %2 {offsets = [4, 0, 0], sizes = [1, 16, 16], strides = [1, 1, 1]} : vector<9x16x16xf32> to vector<1x16x16xf32>
    %58 = vector.shape_cast %57 : vector<1x16x16xf32> to vector<16x16xf32>
    %cst_28 = arith.constant dense<0.000000e+00> : vector<16x256xf32>
    %59 = tpu.matmul %58, %56, %cst_28 {dimension_numbers = #tpu.dot_dimension_numbers<[1], [0], [0], [1], [0, 0, 1, 1], [], []>} : vector<16x16xf32>, vector<16x256xf32>, vector<16x256xf32> -> vector<16x256xf32>
    %60 = arith.addf %55, %59 : vector<16x256xf32>
    %c0_29 = arith.constant 0 : index
    %c129 = arith.constant 129 : index
    %61 = vector.load %arg5[%c0_29, %c129] : memref<16x512xf32, #tpu.memory_space<vmem>>, vector<16x256xf32>
    %cst_30 = arith.constant 0.000000e+00 : f32
    %62 = vector.broadcast %cst_30 : f32 to vector<16x256xf32>
    %63 = arith.select %28, %61, %62 : vector<16x256xi1>, vector<16x256xf32>
    %64 = vector.extract_strided_slice %2 {offsets = [5, 0, 0], sizes = [1, 16, 16], strides = [1, 1, 1]} : vector<9x16x16xf32> to vector<1x16x16xf32>
    %65 = vector.shape_cast %64 : vector<1x16x16xf32> to vector<16x16xf32>
    %cst_31 = arith.constant dense<0.000000e+00> : vector<16x256xf32>
    %66 = tpu.matmul %65, %63, %cst_31 {dimension_numbers = #tpu.dot_dimension_numbers<[1], [0], [0], [1], [0, 0, 1, 1], [], []>} : vector<16x16xf32>, vector<16x256xf32>, vector<16x256xf32> -> vector<16x256xf32>
    %67 = arith.addf %60, %66 : vector<16x256xf32>
    %c0_32 = arith.constant 0 : index
    %c143 = arith.constant 143 : index
    %68 = vector.load %arg5[%c0_32, %c143] : memref<16x512xf32, #tpu.memory_space<vmem>>, vector<16x256xf32>
    %cst_33 = arith.constant 0.000000e+00 : f32
    %69 = vector.broadcast %cst_33 : f32 to vector<16x256xf32>
    %70 = arith.select %26, %68, %69 : vector<16x256xi1>, vector<16x256xf32>
    %71 = vector.extract_strided_slice %2 {offsets = [6, 0, 0], sizes = [1, 16, 16], strides = [1, 1, 1]} : vector<9x16x16xf32> to vector<1x16x16xf32>
    %72 = vector.shape_cast %71 : vector<1x16x16xf32> to vector<16x16xf32>
    %cst_34 = arith.constant dense<0.000000e+00> : vector<16x256xf32>
    %73 = tpu.matmul %72, %70, %cst_34 {dimension_numbers = #tpu.dot_dimension_numbers<[1], [0], [0], [1], [0, 0, 1, 1], [], []>} : vector<16x16xf32>, vector<16x256xf32>, vector<16x256xf32> -> vector<16x256xf32>
    %74 = arith.addf %67, %73 : vector<16x256xf32>
    %c0_35 = arith.constant 0 : index
    %c144 = arith.constant 144 : index
    %75 = vector.load %arg5[%c0_35, %c144] : memref<16x512xf32, #tpu.memory_space<vmem>>, vector<16x256xf32>
    %76 = vector.extract_strided_slice %2 {offsets = [7, 0, 0], sizes = [1, 16, 16], strides = [1, 1, 1]} : vector<9x16x16xf32> to vector<1x16x16xf32>
    %77 = vector.shape_cast %76 : vector<1x16x16xf32> to vector<16x16xf32>
    %cst_36 = arith.constant dense<0.000000e+00> : vector<16x256xf32>
    %78 = tpu.matmul %77, %75, %cst_36 {dimension_numbers = #tpu.dot_dimension_numbers<[1], [0], [0], [1], [0, 0, 1, 1], [], []>} : vector<16x16xf32>, vector<16x256xf32>, vector<16x256xf32> -> vector<16x256xf32>
    %79 = arith.addf %74, %78 : vector<16x256xf32>
    %c0_37 = arith.constant 0 : index
    %c145 = arith.constant 145 : index
    %80 = vector.load %arg5[%c0_37, %c145] : memref<16x512xf32, #tpu.memory_space<vmem>>, vector<16x256xf32>
    %cst_38 = arith.constant 0.000000e+00 : f32
    %81 = vector.broadcast %cst_38 : f32 to vector<16x256xf32>
    %82 = arith.select %28, %80, %81 : vector<16x256xi1>, vector<16x256xf32>
    %83 = vector.extract_strided_slice %2 {offsets = [8, 0, 0], sizes = [1, 16, 16], strides = [1, 1, 1]} : vector<9x16x16xf32> to vector<1x16x16xf32>
    %84 = vector.shape_cast %83 : vector<1x16x16xf32> to vector<16x16xf32>
    %cst_39 = arith.constant dense<0.000000e+00> : vector<16x256xf32>
    %85 = tpu.matmul %84, %82, %cst_39 {dimension_numbers = #tpu.dot_dimension_numbers<[1], [0], [0], [1], [0, 0, 1, 1], [], []>} : vector<16x16xf32>, vector<16x256xf32>, vector<16x256xf32> -> vector<16x256xf32>
    %86 = arith.addf %79, %85 : vector<16x256xf32>
    %c0_40 = arith.constant 0 : index
    %c0_41 = arith.constant 0 : index
    %c0_42 = arith.constant 0 : index
    %87 = vector.load %arg3[%c0_40, %c0_41, %c0_42] : memref<1x16x256xf32, #tpu.memory_space<vmem>>, vector<1x16x256xf32>
    %88 = vector.shape_cast %87 : vector<1x16x256xf32> to vector<16x256xf32>
    %89 = vector.shape_cast %86 : vector<16x256xf32> to vector<1x16x256xf32>
    tpu.vector_store %arg3[%c0_40, %c0_41, %c0_42], %89 {strides = array<i32>} : memref<1x16x256xf32, #tpu.memory_space<vmem>>, vector<1x16x256xf32>,
    %cst_43 = arith.constant dense<0.000000e+00> : vector<16xf32>
    %90 = vector.multi_reduction <add>, %86, %cst_43 [1] : vector<16x256xf32> to vector<16xf32>
    %91 = vector.shape_cast %90 : vector<16xf32> to vector<16x1xf32>
    %c0_44 = arith.constant 0 : index
    %c0_45 = arith.constant 0 : index
    %c0_46 = arith.constant 0 : index
    %92 = vector.load %arg4[%c0_44, %c0_45, %c0_46] : memref<1x16x1xf32, #tpu.memory_space<vmem>>, vector<1x16x1xf32>
    %93 = vector.shape_cast %92 : vector<1x16x1xf32> to vector<16x1xf32>
    %94 = vector.shape_cast %91 : vector<16x1xf32> to vector<1x16x1xf32>
    tpu.vector_store %arg4[%c0_44, %c0_45, %c0_46], %94 {strides = array<i32>} : memref<1x16x1xf32, #tpu.memory_space<vmem>>, vector<1x16x1xf32>,
    return
  }
  func.func @transform_0(%arg0: i32) -> (i32, i32, i32) {
    %c0_i32 = arith.constant 0 : i32
    %c0_i32_0 = arith.constant 0 : i32
    %c0_i32_1 = arith.constant 0 : i32
    return %arg0, %c0_i32, %c0_i32_0 : i32, i32, i32
  }
  func.func @transform_1(%arg0: i32) -> (i32, i32, i32) {
    %c0_i32 = arith.constant 0 : i32
    %c0_i32_0 = arith.constant 0 : i32
    %c0_i32_1 = arith.constant 0 : i32
    %c0_i32_2 = arith.constant 0 : i32
    return %c0_i32, %c0_i32_0, %c0_i32_1 : i32, i32, i32
  }
  func.func @transform_2(%arg0: i32) -> (i32, i32, i32) {
    %c0_i32 = arith.constant 0 : i32
    %c0_i32_0 = arith.constant 0 : i32
    %c0_i32_1 = arith.constant 0 : i32
    return %arg0, %c0_i32, %c0_i32_0 : i32, i32, i32
  }
  func.func @transform_3(%arg0: i32) -> (i32, i32, i32) {
    %c0_i32 = arith.constant 0 : i32
    %c0_i32_0 = arith.constant 0 : i32
    %c0_i32_1 = arith.constant 0 : i32
    return %arg0, %c0_i32, %c0_i32_0 : i32, i32, i32
  }
}

module attributes {stable_mosaic.version = 11 : i64} {
  func.func @_fused_scale_conv_prelu_kernel(%arg0: i32, %arg1: memref<1x16x256xf32, #tpu.memory_space<vmem>>, %arg2: memref<1x16x256xf32, #tpu.memory_space<vmem>>, %arg3: memref<1x16x1xf32, #tpu.memory_space<vmem>>, %arg4: memref<9x16x16xf32, #tpu.memory_space<vmem>>, %arg5: memref<1x1xf32, #tpu.memory_space<vmem>>, %arg6: memref<1x16x256xf32, #tpu.memory_space<vmem>>, %arg7: memref<1x16x256xf32, #tpu.memory_space<vmem>>, %arg8: memref<16x512xf32, #tpu.memory_space<vmem>>) attributes {dimension_semantics = [#tpu.dimension_semantics<parallel>], iteration_bounds = array<i64: 2>, scalar_prefetch = 0 : i64, scratch_operands = 1 : i64, tpu.core_type = #tpu.core_type<tc>, window_params = [{transform_indices = @transform_0, window_bounds = array<i64: 1, 16, 256>}, {transform_indices = @transform_1, window_bounds = array<i64: 1, 16, 256>}, {transform_indices = @transform_2, window_bounds = array<i64: 1, 16, 1>}, {pipeline_mode = #tpu.pipeline_mode<synchronous>, transform_indices = @transform_3, window_bounds = array<i64: 9, 16, 16>}, {pipeline_mode = #tpu.pipeline_mode<synchronous>, transform_indices = @transform_4, window_bounds = array<i64: 1, 1>}, {transform_indices = @transform_5, window_bounds = array<i64: 1, 16, 256>}, {transform_indices = @transform_6, window_bounds = array<i64: 1, 16, 256>}]} {
    %c0 = arith.constant 0 : index
    %c0_0 = arith.constant 0 : index
    %c0_1 = arith.constant 0 : index
    %0 = vector.load %arg1[%c0, %c0_0, %c0_1] : memref<1x16x256xf32, #tpu.memory_space<vmem>>, vector<1x16x256xf32>
    %1 = vector.shape_cast %0 : vector<1x16x256xf32> to vector<16x256xf32>
    %c0_2 = arith.constant 0 : index
    %c0_3 = arith.constant 0 : index
    %c0_4 = arith.constant 0 : index
    %2 = vector.load %arg3[%c0_2, %c0_3, %c0_4] : memref<1x16x1xf32, #tpu.memory_space<vmem>>, vector<1x16x1xf32>
    %3 = vector.shape_cast %2 : vector<1x16x1xf32> to vector<16x1xf32>
    %4 = vector.broadcast %3 : vector<16x1xf32> to vector<16x256xf32>
    %5 = arith.mulf %1, %4 : vector<16x256xf32>
    %c0_5 = arith.constant 0 : index
    %c0_6 = arith.constant 0 : index
    %c0_7 = arith.constant 0 : index
    %6 = vector.load %arg2[%c0_5, %c0_6, %c0_7] : memref<1x16x256xf32, #tpu.memory_space<vmem>>, vector<1x16x256xf32>
    %7 = vector.shape_cast %6 : vector<1x16x256xf32> to vector<16x256xf32>
    %8 = arith.addf %5, %7 : vector<16x256xf32>
    %c0_8 = arith.constant 0 : index
    %c0_9 = arith.constant 0 : index
    %c0_10 = arith.constant 0 : index
    %9 = vector.load %arg6[%c0_8, %c0_9, %c0_10] : memref<1x16x256xf32, #tpu.memory_space<vmem>>, vector<1x16x256xf32>
    %10 = vector.shape_cast %9 : vector<1x16x256xf32> to vector<16x256xf32>
    %11 = vector.shape_cast %8 : vector<16x256xf32> to vector<1x16x256xf32>
    tpu.vector_store %arg6[%c0_8, %c0_9, %c0_10], %11 {strides = array<i32>} : memref<1x16x256xf32, #tpu.memory_space<vmem>>, vector<1x16x256xf32>,
    %c0_11 = arith.constant 0 : index
    %c0_12 = arith.constant 0 : index
    %c0_13 = arith.constant 0 : index
    %12 = vector.load %arg4[%c0_11, %c0_12, %c0_13] : memref<9x16x16xf32, #tpu.memory_space<vmem>>, vector<9x16x16xf32>
    %cst = arith.constant 0.000000e+00 : f32
    %13 = vector.broadcast %cst : f32 to vector<16x128xf32>
    %c0_14 = arith.constant 0 : index
    %c0_15 = arith.constant 0 : index
    %14 = vector.load %arg8[%c0_14, %c0_15] : memref<16x512xf32, #tpu.memory_space<vmem>>, vector<16x128xf32>
    tpu.vector_store %arg8[%c0_14, %c0_15], %13 {strides = array<i32>} : memref<16x512xf32, #tpu.memory_space<vmem>>, vector<16x128xf32>,
    %cst_16 = arith.constant 0.000000e+00 : f32
    %15 = vector.broadcast %cst_16 : f32 to vector<16x128xf32>
    %c0_17 = arith.constant 0 : index
    %c384 = arith.constant 384 : index
    %16 = vector.load %arg8[%c0_17, %c384] : memref<16x512xf32, #tpu.memory_space<vmem>>, vector<16x128xf32>
    tpu.vector_store %arg8[%c0_17, %c384], %15 {strides = array<i32>} : memref<16x512xf32, #tpu.memory_space<vmem>>, vector<16x128xf32>,
    %c0_18 = arith.constant 0 : index
    %c128 = arith.constant 128 : index
    %17 = vector.load %arg8[%c0_18, %c128] : memref<16x512xf32, #tpu.memory_space<vmem>>, vector<16x256xf32>
    tpu.vector_store %arg8[%c0_18, %c128], %8 {strides = array<i32>} : memref<16x512xf32, #tpu.memory_space<vmem>>, vector<16x256xf32>,
    %18 = tpu.iota {dimensions = array<i32: 1>} : vector<16x256xi32>
    %c16_i32 = arith.constant 16 : i32
    %c0_i32 = arith.constant 0 : i32
    %19 = arith.cmpi eq, %c16_i32, %c0_i32 : i32
    %c1_i32 = arith.constant 1 : i32
    %20 = arith.select %19, %c1_i32, %c16_i32 : i32
    %21 = vector.broadcast %20 : i32 to vector<16x256xi32>
    %22 = arith.remsi %18, %21 : vector<16x256xi32>
    %c0_i32_19 = arith.constant 0 : i32
    %23 = vector.broadcast %c0_i32_19 : i32 to vector<16x256xi32>
    %24 = arith.cmpi ne, %22, %23 : vector<16x256xi32>
    %c0_i32_20 = arith.constant 0 : i32
    %25 = vector.broadcast %c0_i32_20 : i32 to vector<16x256xi32>
    %26 = arith.cmpi slt, %22, %25 : vector<16x256xi32>
    %c0_i32_21 = arith.constant 0 : i32
    %27 = arith.cmpi slt, %20, %c0_i32_21 : i32
    %28 = vector.broadcast %27 : i1 to vector<16x256xi1>
    %29 = vector.broadcast %28 : vector<16x256xi1> to vector<16x256xi1>
    %30 = arith.xori %26, %29 : vector<16x256xi1>
    %31 = arith.andi %30, %24 : vector<16x256xi1>
    %32 = vector.broadcast %20 : i32 to vector<16x256xi32>
    %33 = arith.addi %22, %32 : vector<16x256xi32>
    %34 = arith.select %31, %33, %22 : vector<16x256xi1>, vector<16x256xi32>
    %c0_i32_22 = arith.constant 0 : i32
    %35 = vector.broadcast %c0_i32_22 : i32 to vector<16x256xi32>
    %36 = arith.cmpi ne, %34, %35 : vector<16x256xi32>
    %c15_i32 = arith.constant 15 : i32
    %37 = vector.broadcast %c15_i32 : i32 to vector<16x256xi32>
    %38 = arith.cmpi ne, %34, %37 : vector<16x256xi32>
    %cst_23 = arith.constant 0.000000e+00 : f32
    %39 = vector.broadcast %cst_23 : f32 to vector<16x256xf32>
    %c0_24 = arith.constant 0 : index
    %c111 = arith.constant 111 : index
    %40 = vector.load %arg8[%c0_24, %c111] : memref<16x512xf32, #tpu.memory_space<vmem>>, vector<16x256xf32>
    %cst_25 = arith.constant 0.000000e+00 : f32
    %41 = vector.broadcast %cst_25 : f32 to vector<16x256xf32>
    %42 = arith.select %36, %40, %41 : vector<16x256xi1>, vector<16x256xf32>
    %43 = vector.extract_strided_slice %12 {offsets = [0, 0, 0], sizes = [1, 16, 16], strides = [1, 1, 1]} : vector<9x16x16xf32> to vector<1x16x16xf32>
    %44 = vector.shape_cast %43 : vector<1x16x16xf32> to vector<16x16xf32>
    %cst_26 = arith.constant dense<0.000000e+00> : vector<16x256xf32>
    %45 = tpu.matmul %44, %42, %cst_26 {dimension_numbers = #tpu.dot_dimension_numbers<[1], [0], [0], [1], [0, 0, 1, 1], [], []>} : vector<16x16xf32>, vector<16x256xf32>, vector<16x256xf32> -> vector<16x256xf32>
    %46 = arith.addf %39, %45 : vector<16x256xf32>
    %c0_27 = arith.constant 0 : index
    %c112 = arith.constant 112 : index
    %47 = vector.load %arg8[%c0_27, %c112] : memref<16x512xf32, #tpu.memory_space<vmem>>, vector<16x256xf32>
    %48 = vector.extract_strided_slice %12 {offsets = [1, 0, 0], sizes = [1, 16, 16], strides = [1, 1, 1]} : vector<9x16x16xf32> to vector<1x16x16xf32>
    %49 = vector.shape_cast %48 : vector<1x16x16xf32> to vector<16x16xf32>
    %cst_28 = arith.constant dense<0.000000e+00> : vector<16x256xf32>
    %50 = tpu.matmul %49, %47, %cst_28 {dimension_numbers = #tpu.dot_dimension_numbers<[1], [0], [0], [1], [0, 0, 1, 1], [], []>} : vector<16x16xf32>, vector<16x256xf32>, vector<16x256xf32> -> vector<16x256xf32>
    %51 = arith.addf %46, %50 : vector<16x256xf32>
    %c0_29 = arith.constant 0 : index
    %c113 = arith.constant 113 : index
    %52 = vector.load %arg8[%c0_29, %c113] : memref<16x512xf32, #tpu.memory_space<vmem>>, vector<16x256xf32>
    %cst_30 = arith.constant 0.000000e+00 : f32
    %53 = vector.broadcast %cst_30 : f32 to vector<16x256xf32>
    %54 = arith.select %38, %52, %53 : vector<16x256xi1>, vector<16x256xf32>
    %55 = vector.extract_strided_slice %12 {offsets = [2, 0, 0], sizes = [1, 16, 16], strides = [1, 1, 1]} : vector<9x16x16xf32> to vector<1x16x16xf32>
    %56 = vector.shape_cast %55 : vector<1x16x16xf32> to vector<16x16xf32>
    %cst_31 = arith.constant dense<0.000000e+00> : vector<16x256xf32>
    %57 = tpu.matmul %56, %54, %cst_31 {dimension_numbers = #tpu.dot_dimension_numbers<[1], [0], [0], [1], [0, 0, 1, 1], [], []>} : vector<16x16xf32>, vector<16x256xf32>, vector<16x256xf32> -> vector<16x256xf32>
    %58 = arith.addf %51, %57 : vector<16x256xf32>
    %c0_32 = arith.constant 0 : index
    %c127 = arith.constant 127 : index
    %59 = vector.load %arg8[%c0_32, %c127] : memref<16x512xf32, #tpu.memory_space<vmem>>, vector<16x256xf32>
    %cst_33 = arith.constant 0.000000e+00 : f32
    %60 = vector.broadcast %cst_33 : f32 to vector<16x256xf32>
    %61 = arith.select %36, %59, %60 : vector<16x256xi1>, vector<16x256xf32>
    %62 = vector.extract_strided_slice %12 {offsets = [3, 0, 0], sizes = [1, 16, 16], strides = [1, 1, 1]} : vector<9x16x16xf32> to vector<1x16x16xf32>
    %63 = vector.shape_cast %62 : vector<1x16x16xf32> to vector<16x16xf32>
    %cst_34 = arith.constant dense<0.000000e+00> : vector<16x256xf32>
    %64 = tpu.matmul %63, %61, %cst_34 {dimension_numbers = #tpu.dot_dimension_numbers<[1], [0], [0], [1], [0, 0, 1, 1], [], []>} : vector<16x16xf32>, vector<16x256xf32>, vector<16x256xf32> -> vector<16x256xf32>
    %65 = arith.addf %58, %64 : vector<16x256xf32>
    %c0_35 = arith.constant 0 : index
    %c128_36 = arith.constant 128 : index
    %66 = vector.load %arg8[%c0_35, %c128_36] : memref<16x512xf32, #tpu.memory_space<vmem>>, vector<16x256xf32>
    %67 = vector.extract_strided_slice %12 {offsets = [4, 0, 0], sizes = [1, 16, 16], strides = [1, 1, 1]} : vector<9x16x16xf32> to vector<1x16x16xf32>
    %68 = vector.shape_cast %67 : vector<1x16x16xf32> to vector<16x16xf32>
    %cst_37 = arith.constant dense<0.000000e+00> : vector<16x256xf32>
    %69 = tpu.matmul %68, %66, %cst_37 {dimension_numbers = #tpu.dot_dimension_numbers<[1], [0], [0], [1], [0, 0, 1, 1], [], []>} : vector<16x16xf32>, vector<16x256xf32>, vector<16x256xf32> -> vector<16x256xf32>
    %70 = arith.addf %65, %69 : vector<16x256xf32>
    %c0_38 = arith.constant 0 : index
    %c129 = arith.constant 129 : index
    %71 = vector.load %arg8[%c0_38, %c129] : memref<16x512xf32, #tpu.memory_space<vmem>>, vector<16x256xf32>
    %cst_39 = arith.constant 0.000000e+00 : f32
    %72 = vector.broadcast %cst_39 : f32 to vector<16x256xf32>
    %73 = arith.select %38, %71, %72 : vector<16x256xi1>, vector<16x256xf32>
    %74 = vector.extract_strided_slice %12 {offsets = [5, 0, 0], sizes = [1, 16, 16], strides = [1, 1, 1]} : vector<9x16x16xf32> to vector<1x16x16xf32>
    %75 = vector.shape_cast %74 : vector<1x16x16xf32> to vector<16x16xf32>
    %cst_40 = arith.constant dense<0.000000e+00> : vector<16x256xf32>
    %76 = tpu.matmul %75, %73, %cst_40 {dimension_numbers = #tpu.dot_dimension_numbers<[1], [0], [0], [1], [0, 0, 1, 1], [], []>} : vector<16x16xf32>, vector<16x256xf32>, vector<16x256xf32> -> vector<16x256xf32>
    %77 = arith.addf %70, %76 : vector<16x256xf32>
    %c0_41 = arith.constant 0 : index
    %c143 = arith.constant 143 : index
    %78 = vector.load %arg8[%c0_41, %c143] : memref<16x512xf32, #tpu.memory_space<vmem>>, vector<16x256xf32>
    %cst_42 = arith.constant 0.000000e+00 : f32
    %79 = vector.broadcast %cst_42 : f32 to vector<16x256xf32>
    %80 = arith.select %36, %78, %79 : vector<16x256xi1>, vector<16x256xf32>
    %81 = vector.extract_strided_slice %12 {offsets = [6, 0, 0], sizes = [1, 16, 16], strides = [1, 1, 1]} : vector<9x16x16xf32> to vector<1x16x16xf32>
    %82 = vector.shape_cast %81 : vector<1x16x16xf32> to vector<16x16xf32>
    %cst_43 = arith.constant dense<0.000000e+00> : vector<16x256xf32>
    %83 = tpu.matmul %82, %80, %cst_43 {dimension_numbers = #tpu.dot_dimension_numbers<[1], [0], [0], [1], [0, 0, 1, 1], [], []>} : vector<16x16xf32>, vector<16x256xf32>, vector<16x256xf32> -> vector<16x256xf32>
    %84 = arith.addf %77, %83 : vector<16x256xf32>
    %c0_44 = arith.constant 0 : index
    %c144 = arith.constant 144 : index
    %85 = vector.load %arg8[%c0_44, %c144] : memref<16x512xf32, #tpu.memory_space<vmem>>, vector<16x256xf32>
    %86 = vector.extract_strided_slice %12 {offsets = [7, 0, 0], sizes = [1, 16, 16], strides = [1, 1, 1]} : vector<9x16x16xf32> to vector<1x16x16xf32>
    %87 = vector.shape_cast %86 : vector<1x16x16xf32> to vector<16x16xf32>
    %cst_45 = arith.constant dense<0.000000e+00> : vector<16x256xf32>
    %88 = tpu.matmul %87, %85, %cst_45 {dimension_numbers = #tpu.dot_dimension_numbers<[1], [0], [0], [1], [0, 0, 1, 1], [], []>} : vector<16x16xf32>, vector<16x256xf32>, vector<16x256xf32> -> vector<16x256xf32>
    %89 = arith.addf %84, %88 : vector<16x256xf32>
    %c0_46 = arith.constant 0 : index
    %c145 = arith.constant 145 : index
    %90 = vector.load %arg8[%c0_46, %c145] : memref<16x512xf32, #tpu.memory_space<vmem>>, vector<16x256xf32>
    %cst_47 = arith.constant 0.000000e+00 : f32
    %91 = vector.broadcast %cst_47 : f32 to vector<16x256xf32>
    %92 = arith.select %38, %90, %91 : vector<16x256xi1>, vector<16x256xf32>
    %93 = vector.extract_strided_slice %12 {offsets = [8, 0, 0], sizes = [1, 16, 16], strides = [1, 1, 1]} : vector<9x16x16xf32> to vector<1x16x16xf32>
    %94 = vector.shape_cast %93 : vector<1x16x16xf32> to vector<16x16xf32>
    %cst_48 = arith.constant dense<0.000000e+00> : vector<16x256xf32>
    %95 = tpu.matmul %94, %92, %cst_48 {dimension_numbers = #tpu.dot_dimension_numbers<[1], [0], [0], [1], [0, 0, 1, 1], [], []>} : vector<16x16xf32>, vector<16x256xf32>, vector<16x256xf32> -> vector<16x256xf32>
    %96 = arith.addf %89, %95 : vector<16x256xf32>
    %c0_49 = arith.constant 0 : index
    %c0_50 = arith.constant 0 : index
    %97 = vector.load %arg5[%c0_49, %c0_50] : memref<1x1xf32, #tpu.memory_space<vmem>>, vector<1x1xf32>
    %cst_51 = arith.constant 0.000000e+00 : f32
    %98 = vector.broadcast %cst_51 : f32 to vector<16x256xf32>
    %99 = arith.cmpf ogt, %96, %98 : vector<16x256xf32>
    %100 = vector.broadcast %97 : vector<1x1xf32> to vector<16x256xf32>
    %101 = arith.mulf %96, %100 : vector<16x256xf32>
    %102 = arith.select %99, %96, %101 : vector<16x256xi1>, vector<16x256xf32>
    %c0_52 = arith.constant 0 : index
    %c0_53 = arith.constant 0 : index
    %c0_54 = arith.constant 0 : index
    %103 = vector.load %arg7[%c0_52, %c0_53, %c0_54] : memref<1x16x256xf32, #tpu.memory_space<vmem>>, vector<1x16x256xf32>
    %104 = vector.shape_cast %103 : vector<1x16x256xf32> to vector<16x256xf32>
    %105 = vector.shape_cast %102 : vector<16x256xf32> to vector<1x16x256xf32>
    tpu.vector_store %arg7[%c0_52, %c0_53, %c0_54], %105 {strides = array<i32>} : memref<1x16x256xf32, #tpu.memory_space<vmem>>, vector<1x16x256xf32>,
    return
  }
  func.func @transform_0(%arg0: i32) -> (i32, i32, i32) {
    %c0_i32 = arith.constant 0 : i32
    %c0_i32_0 = arith.constant 0 : i32
    %c0_i32_1 = arith.constant 0 : i32
    return %arg0, %c0_i32, %c0_i32_0 : i32, i32, i32
  }
  func.func @transform_1(%arg0: i32) -> (i32, i32, i32) {
    %c0_i32 = arith.constant 0 : i32
    %c0_i32_0 = arith.constant 0 : i32
    %c0_i32_1 = arith.constant 0 : i32
    return %arg0, %c0_i32, %c0_i32_0 : i32, i32, i32
  }
  func.func @transform_2(%arg0: i32) -> (i32, i32, i32) {
    %c0_i32 = arith.constant 0 : i32
    %c0_i32_0 = arith.constant 0 : i32
    %c0_i32_1 = arith.constant 0 : i32
    return %arg0, %c0_i32, %c0_i32_0 : i32, i32, i32
  }
  func.func @transform_3(%arg0: i32) -> (i32, i32, i32) {
    %c0_i32 = arith.constant 0 : i32
    %c0_i32_0 = arith.constant 0 : i32
    %c0_i32_1 = arith.constant 0 : i32
    %c0_i32_2 = arith.constant 0 : i32
    return %c0_i32, %c0_i32_0, %c0_i32_1 : i32, i32, i32
  }
  func.func @transform_4(%arg0: i32) -> (i32, i32) {
    %c0_i32 = arith.constant 0 : i32
    %c0_i32_0 = arith.constant 0 : i32
    %c0_i32_1 = arith.constant 0 : i32
    return %c0_i32, %c0_i32_0 : i32, i32
  }
  func.func @transform_5(%arg0: i32) -> (i32, i32, i32) {
    %c0_i32 = arith.constant 0 : i32
    %c0_i32_0 = arith.constant 0 : i32
    %c0_i32_1 = arith.constant 0 : i32
    return %arg0, %c0_i32, %c0_i32_0 : i32, i32, i32
  }
  func.func @transform_6(%arg0: i32) -> (i32, i32, i32) {
    %c0_i32 = arith.constant 0 : i32
    %c0_i32_0 = arith.constant 0 : i32
    %c0_i32_1 = arith.constant 0 : i32
    return %arg0, %c0_i32, %c0_i32_0 : i32, i32, i32
  }
}

module attributes {stable_mosaic.version = 11 : i64} {
  func.func @_fused_scale_conv_skip_kernel(%arg0: i32, %arg1: memref<1x16x256xf32, #tpu.memory_space<vmem>>, %arg2: memref<1x16x256xf32, #tpu.memory_space<vmem>>, %arg3: memref<1x16x1xf32, #tpu.memory_space<vmem>>, %arg4: memref<1x16x256xf32, #tpu.memory_space<vmem>>, %arg5: memref<9x16x16xf32, #tpu.memory_space<vmem>>, %arg6: memref<1x16x256xf32, #tpu.memory_space<vmem>>, %arg7: memref<16x512xf32, #tpu.memory_space<vmem>>) attributes {dimension_semantics = [#tpu.dimension_semantics<parallel>], iteration_bounds = array<i64: 2>, scalar_prefetch = 0 : i64, scratch_operands = 1 : i64, tpu.core_type = #tpu.core_type<tc>, window_params = [{transform_indices = @transform_0, window_bounds = array<i64: 1, 16, 256>}, {transform_indices = @transform_1, window_bounds = array<i64: 1, 16, 256>}, {transform_indices = @transform_2, window_bounds = array<i64: 1, 16, 1>}, {transform_indices = @transform_3, window_bounds = array<i64: 1, 16, 256>}, {pipeline_mode = #tpu.pipeline_mode<synchronous>, transform_indices = @transform_4, window_bounds = array<i64: 9, 16, 16>}, {transform_indices = @transform_5, window_bounds = array<i64: 1, 16, 256>}]} {
    %c0 = arith.constant 0 : index
    %c0_0 = arith.constant 0 : index
    %c0_1 = arith.constant 0 : index
    %0 = vector.load %arg1[%c0, %c0_0, %c0_1] : memref<1x16x256xf32, #tpu.memory_space<vmem>>, vector<1x16x256xf32>
    %1 = vector.shape_cast %0 : vector<1x16x256xf32> to vector<16x256xf32>
    %c0_2 = arith.constant 0 : index
    %c0_3 = arith.constant 0 : index
    %c0_4 = arith.constant 0 : index
    %2 = vector.load %arg3[%c0_2, %c0_3, %c0_4] : memref<1x16x1xf32, #tpu.memory_space<vmem>>, vector<1x16x1xf32>
    %3 = vector.shape_cast %2 : vector<1x16x1xf32> to vector<16x1xf32>
    %4 = vector.broadcast %3 : vector<16x1xf32> to vector<16x256xf32>
    %5 = arith.mulf %1, %4 : vector<16x256xf32>
    %c0_5 = arith.constant 0 : index
    %c0_6 = arith.constant 0 : index
    %c0_7 = arith.constant 0 : index
    %6 = vector.load %arg2[%c0_5, %c0_6, %c0_7] : memref<1x16x256xf32, #tpu.memory_space<vmem>>, vector<1x16x256xf32>
    %7 = vector.shape_cast %6 : vector<1x16x256xf32> to vector<16x256xf32>
    %8 = arith.addf %5, %7 : vector<16x256xf32>
    %c0_8 = arith.constant 0 : index
    %c0_9 = arith.constant 0 : index
    %c0_10 = arith.constant 0 : index
    %9 = vector.load %arg5[%c0_8, %c0_9, %c0_10] : memref<9x16x16xf32, #tpu.memory_space<vmem>>, vector<9x16x16xf32>
    %cst = arith.constant 0.000000e+00 : f32
    %10 = vector.broadcast %cst : f32 to vector<16x128xf32>
    %c0_11 = arith.constant 0 : index
    %c0_12 = arith.constant 0 : index
    %11 = vector.load %arg7[%c0_11, %c0_12] : memref<16x512xf32, #tpu.memory_space<vmem>>, vector<16x128xf32>
    tpu.vector_store %arg7[%c0_11, %c0_12], %10 {strides = array<i32>} : memref<16x512xf32, #tpu.memory_space<vmem>>, vector<16x128xf32>,
    %cst_13 = arith.constant 0.000000e+00 : f32
    %12 = vector.broadcast %cst_13 : f32 to vector<16x128xf32>
    %c0_14 = arith.constant 0 : index
    %c384 = arith.constant 384 : index
    %13 = vector.load %arg7[%c0_14, %c384] : memref<16x512xf32, #tpu.memory_space<vmem>>, vector<16x128xf32>
    tpu.vector_store %arg7[%c0_14, %c384], %12 {strides = array<i32>} : memref<16x512xf32, #tpu.memory_space<vmem>>, vector<16x128xf32>,
    %c0_15 = arith.constant 0 : index
    %c128 = arith.constant 128 : index
    %14 = vector.load %arg7[%c0_15, %c128] : memref<16x512xf32, #tpu.memory_space<vmem>>, vector<16x256xf32>
    tpu.vector_store %arg7[%c0_15, %c128], %8 {strides = array<i32>} : memref<16x512xf32, #tpu.memory_space<vmem>>, vector<16x256xf32>,
    %15 = tpu.iota {dimensions = array<i32: 1>} : vector<16x256xi32>
    %c16_i32 = arith.constant 16 : i32
    %c0_i32 = arith.constant 0 : i32
    %16 = arith.cmpi eq, %c16_i32, %c0_i32 : i32
    %c1_i32 = arith.constant 1 : i32
    %17 = arith.select %16, %c1_i32, %c16_i32 : i32
    %18 = vector.broadcast %17 : i32 to vector<16x256xi32>
    %19 = arith.remsi %15, %18 : vector<16x256xi32>
    %c0_i32_16 = arith.constant 0 : i32
    %20 = vector.broadcast %c0_i32_16 : i32 to vector<16x256xi32>
    %21 = arith.cmpi ne, %19, %20 : vector<16x256xi32>
    %c0_i32_17 = arith.constant 0 : i32
    %22 = vector.broadcast %c0_i32_17 : i32 to vector<16x256xi32>
    %23 = arith.cmpi slt, %19, %22 : vector<16x256xi32>
    %c0_i32_18 = arith.constant 0 : i32
    %24 = arith.cmpi slt, %17, %c0_i32_18 : i32
    %25 = vector.broadcast %24 : i1 to vector<16x256xi1>
    %26 = vector.broadcast %25 : vector<16x256xi1> to vector<16x256xi1>
    %27 = arith.xori %23, %26 : vector<16x256xi1>
    %28 = arith.andi %27, %21 : vector<16x256xi1>
    %29 = vector.broadcast %17 : i32 to vector<16x256xi32>
    %30 = arith.addi %19, %29 : vector<16x256xi32>
    %31 = arith.select %28, %30, %19 : vector<16x256xi1>, vector<16x256xi32>
    %c0_i32_19 = arith.constant 0 : i32
    %32 = vector.broadcast %c0_i32_19 : i32 to vector<16x256xi32>
    %33 = arith.cmpi ne, %31, %32 : vector<16x256xi32>
    %c15_i32 = arith.constant 15 : i32
    %34 = vector.broadcast %c15_i32 : i32 to vector<16x256xi32>
    %35 = arith.cmpi ne, %31, %34 : vector<16x256xi32>
    %cst_20 = arith.constant 0.000000e+00 : f32
    %36 = vector.broadcast %cst_20 : f32 to vector<16x256xf32>
    %c0_21 = arith.constant 0 : index
    %c111 = arith.constant 111 : index
    %37 = vector.load %arg7[%c0_21, %c111] : memref<16x512xf32, #tpu.memory_space<vmem>>, vector<16x256xf32>
    %cst_22 = arith.constant 0.000000e+00 : f32
    %38 = vector.broadcast %cst_22 : f32 to vector<16x256xf32>
    %39 = arith.select %33, %37, %38 : vector<16x256xi1>, vector<16x256xf32>
    %40 = vector.extract_strided_slice %9 {offsets = [0, 0, 0], sizes = [1, 16, 16], strides = [1, 1, 1]} : vector<9x16x16xf32> to vector<1x16x16xf32>
    %41 = vector.shape_cast %40 : vector<1x16x16xf32> to vector<16x16xf32>
    %cst_23 = arith.constant dense<0.000000e+00> : vector<16x256xf32>
    %42 = tpu.matmul %41, %39, %cst_23 {dimension_numbers = #tpu.dot_dimension_numbers<[1], [0], [0], [1], [0, 0, 1, 1], [], []>} : vector<16x16xf32>, vector<16x256xf32>, vector<16x256xf32> -> vector<16x256xf32>
    %43 = arith.addf %36, %42 : vector<16x256xf32>
    %c0_24 = arith.constant 0 : index
    %c112 = arith.constant 112 : index
    %44 = vector.load %arg7[%c0_24, %c112] : memref<16x512xf32, #tpu.memory_space<vmem>>, vector<16x256xf32>
    %45 = vector.extract_strided_slice %9 {offsets = [1, 0, 0], sizes = [1, 16, 16], strides = [1, 1, 1]} : vector<9x16x16xf32> to vector<1x16x16xf32>
    %46 = vector.shape_cast %45 : vector<1x16x16xf32> to vector<16x16xf32>
    %cst_25 = arith.constant dense<0.000000e+00> : vector<16x256xf32>
    %47 = tpu.matmul %46, %44, %cst_25 {dimension_numbers = #tpu.dot_dimension_numbers<[1], [0], [0], [1], [0, 0, 1, 1], [], []>} : vector<16x16xf32>, vector<16x256xf32>, vector<16x256xf32> -> vector<16x256xf32>
    %48 = arith.addf %43, %47 : vector<16x256xf32>
    %c0_26 = arith.constant 0 : index
    %c113 = arith.constant 113 : index
    %49 = vector.load %arg7[%c0_26, %c113] : memref<16x512xf32, #tpu.memory_space<vmem>>, vector<16x256xf32>
    %cst_27 = arith.constant 0.000000e+00 : f32
    %50 = vector.broadcast %cst_27 : f32 to vector<16x256xf32>
    %51 = arith.select %35, %49, %50 : vector<16x256xi1>, vector<16x256xf32>
    %52 = vector.extract_strided_slice %9 {offsets = [2, 0, 0], sizes = [1, 16, 16], strides = [1, 1, 1]} : vector<9x16x16xf32> to vector<1x16x16xf32>
    %53 = vector.shape_cast %52 : vector<1x16x16xf32> to vector<16x16xf32>
    %cst_28 = arith.constant dense<0.000000e+00> : vector<16x256xf32>
    %54 = tpu.matmul %53, %51, %cst_28 {dimension_numbers = #tpu.dot_dimension_numbers<[1], [0], [0], [1], [0, 0, 1, 1], [], []>} : vector<16x16xf32>, vector<16x256xf32>, vector<16x256xf32> -> vector<16x256xf32>
    %55 = arith.addf %48, %54 : vector<16x256xf32>
    %c0_29 = arith.constant 0 : index
    %c127 = arith.constant 127 : index
    %56 = vector.load %arg7[%c0_29, %c127] : memref<16x512xf32, #tpu.memory_space<vmem>>, vector<16x256xf32>
    %cst_30 = arith.constant 0.000000e+00 : f32
    %57 = vector.broadcast %cst_30 : f32 to vector<16x256xf32>
    %58 = arith.select %33, %56, %57 : vector<16x256xi1>, vector<16x256xf32>
    %59 = vector.extract_strided_slice %9 {offsets = [3, 0, 0], sizes = [1, 16, 16], strides = [1, 1, 1]} : vector<9x16x16xf32> to vector<1x16x16xf32>
    %60 = vector.shape_cast %59 : vector<1x16x16xf32> to vector<16x16xf32>
    %cst_31 = arith.constant dense<0.000000e+00> : vector<16x256xf32>
    %61 = tpu.matmul %60, %58, %cst_31 {dimension_numbers = #tpu.dot_dimension_numbers<[1], [0], [0], [1], [0, 0, 1, 1], [], []>} : vector<16x16xf32>, vector<16x256xf32>, vector<16x256xf32> -> vector<16x256xf32>
    %62 = arith.addf %55, %61 : vector<16x256xf32>
    %c0_32 = arith.constant 0 : index
    %c128_33 = arith.constant 128 : index
    %63 = vector.load %arg7[%c0_32, %c128_33] : memref<16x512xf32, #tpu.memory_space<vmem>>, vector<16x256xf32>
    %64 = vector.extract_strided_slice %9 {offsets = [4, 0, 0], sizes = [1, 16, 16], strides = [1, 1, 1]} : vector<9x16x16xf32> to vector<1x16x16xf32>
    %65 = vector.shape_cast %64 : vector<1x16x16xf32> to vector<16x16xf32>
    %cst_34 = arith.constant dense<0.000000e+00> : vector<16x256xf32>
    %66 = tpu.matmul %65, %63, %cst_34 {dimension_numbers = #tpu.dot_dimension_numbers<[1], [0], [0], [1], [0, 0, 1, 1], [], []>} : vector<16x16xf32>, vector<16x256xf32>, vector<16x256xf32> -> vector<16x256xf32>
    %67 = arith.addf %62, %66 : vector<16x256xf32>
    %c0_35 = arith.constant 0 : index
    %c129 = arith.constant 129 : index
    %68 = vector.load %arg7[%c0_35, %c129] : memref<16x512xf32, #tpu.memory_space<vmem>>, vector<16x256xf32>
    %cst_36 = arith.constant 0.000000e+00 : f32
    %69 = vector.broadcast %cst_36 : f32 to vector<16x256xf32>
    %70 = arith.select %35, %68, %69 : vector<16x256xi1>, vector<16x256xf32>
    %71 = vector.extract_strided_slice %9 {offsets = [5, 0, 0], sizes = [1, 16, 16], strides = [1, 1, 1]} : vector<9x16x16xf32> to vector<1x16x16xf32>
    %72 = vector.shape_cast %71 : vector<1x16x16xf32> to vector<16x16xf32>
    %cst_37 = arith.constant dense<0.000000e+00> : vector<16x256xf32>
    %73 = tpu.matmul %72, %70, %cst_37 {dimension_numbers = #tpu.dot_dimension_numbers<[1], [0], [0], [1], [0, 0, 1, 1], [], []>} : vector<16x16xf32>, vector<16x256xf32>, vector<16x256xf32> -> vector<16x256xf32>
    %74 = arith.addf %67, %73 : vector<16x256xf32>
    %c0_38 = arith.constant 0 : index
    %c143 = arith.constant 143 : index
    %75 = vector.load %arg7[%c0_38, %c143] : memref<16x512xf32, #tpu.memory_space<vmem>>, vector<16x256xf32>
    %cst_39 = arith.constant 0.000000e+00 : f32
    %76 = vector.broadcast %cst_39 : f32 to vector<16x256xf32>
    %77 = arith.select %33, %75, %76 : vector<16x256xi1>, vector<16x256xf32>
    %78 = vector.extract_strided_slice %9 {offsets = [6, 0, 0], sizes = [1, 16, 16], strides = [1, 1, 1]} : vector<9x16x16xf32> to vector<1x16x16xf32>
    %79 = vector.shape_cast %78 : vector<1x16x16xf32> to vector<16x16xf32>
    %cst_40 = arith.constant dense<0.000000e+00> : vector<16x256xf32>
    %80 = tpu.matmul %79, %77, %cst_40 {dimension_numbers = #tpu.dot_dimension_numbers<[1], [0], [0], [1], [0, 0, 1, 1], [], []>} : vector<16x16xf32>, vector<16x256xf32>, vector<16x256xf32> -> vector<16x256xf32>
    %81 = arith.addf %74, %80 : vector<16x256xf32>
    %c0_41 = arith.constant 0 : index
    %c144 = arith.constant 144 : index
    %82 = vector.load %arg7[%c0_41, %c144] : memref<16x512xf32, #tpu.memory_space<vmem>>, vector<16x256xf32>
    %83 = vector.extract_strided_slice %9 {offsets = [7, 0, 0], sizes = [1, 16, 16], strides = [1, 1, 1]} : vector<9x16x16xf32> to vector<1x16x16xf32>
    %84 = vector.shape_cast %83 : vector<1x16x16xf32> to vector<16x16xf32>
    %cst_42 = arith.constant dense<0.000000e+00> : vector<16x256xf32>
    %85 = tpu.matmul %84, %82, %cst_42 {dimension_numbers = #tpu.dot_dimension_numbers<[1], [0], [0], [1], [0, 0, 1, 1], [], []>} : vector<16x16xf32>, vector<16x256xf32>, vector<16x256xf32> -> vector<16x256xf32>
    %86 = arith.addf %81, %85 : vector<16x256xf32>
    %c0_43 = arith.constant 0 : index
    %c145 = arith.constant 145 : index
    %87 = vector.load %arg7[%c0_43, %c145] : memref<16x512xf32, #tpu.memory_space<vmem>>, vector<16x256xf32>
    %cst_44 = arith.constant 0.000000e+00 : f32
    %88 = vector.broadcast %cst_44 : f32 to vector<16x256xf32>
    %89 = arith.select %35, %87, %88 : vector<16x256xi1>, vector<16x256xf32>
    %90 = vector.extract_strided_slice %9 {offsets = [8, 0, 0], sizes = [1, 16, 16], strides = [1, 1, 1]} : vector<9x16x16xf32> to vector<1x16x16xf32>
    %91 = vector.shape_cast %90 : vector<1x16x16xf32> to vector<16x16xf32>
    %cst_45 = arith.constant dense<0.000000e+00> : vector<16x256xf32>
    %92 = tpu.matmul %91, %89, %cst_45 {dimension_numbers = #tpu.dot_dimension_numbers<[1], [0], [0], [1], [0, 0, 1, 1], [], []>} : vector<16x16xf32>, vector<16x256xf32>, vector<16x256xf32> -> vector<16x256xf32>
    %93 = arith.addf %86, %92 : vector<16x256xf32>
    %c0_46 = arith.constant 0 : index
    %c0_47 = arith.constant 0 : index
    %c0_48 = arith.constant 0 : index
    %94 = vector.load %arg4[%c0_46, %c0_47, %c0_48] : memref<1x16x256xf32, #tpu.memory_space<vmem>>, vector<1x16x256xf32>
    %95 = vector.shape_cast %94 : vector<1x16x256xf32> to vector<16x256xf32>
    %96 = arith.addf %93, %95 : vector<16x256xf32>
    %c0_49 = arith.constant 0 : index
    %c0_50 = arith.constant 0 : index
    %c0_51 = arith.constant 0 : index
    %97 = vector.load %arg6[%c0_49, %c0_50, %c0_51] : memref<1x16x256xf32, #tpu.memory_space<vmem>>, vector<1x16x256xf32>
    %98 = vector.shape_cast %97 : vector<1x16x256xf32> to vector<16x256xf32>
    %99 = vector.shape_cast %96 : vector<16x256xf32> to vector<1x16x256xf32>
    tpu.vector_store %arg6[%c0_49, %c0_50, %c0_51], %99 {strides = array<i32>} : memref<1x16x256xf32, #tpu.memory_space<vmem>>, vector<1x16x256xf32>,
    return
  }
  func.func @transform_0(%arg0: i32) -> (i32, i32, i32) {
    %c0_i32 = arith.constant 0 : i32
    %c0_i32_0 = arith.constant 0 : i32
    %c0_i32_1 = arith.constant 0 : i32
    return %arg0, %c0_i32, %c0_i32_0 : i32, i32, i32
  }
  func.func @transform_1(%arg0: i32) -> (i32, i32, i32) {
    %c0_i32 = arith.constant 0 : i32
    %c0_i32_0 = arith.constant 0 : i32
    %c0_i32_1 = arith.constant 0 : i32
    return %arg0, %c0_i32, %c0_i32_0 : i32, i32, i32
  }
  func.func @transform_2(%arg0: i32) -> (i32, i32, i32) {
    %c0_i32 = arith.constant 0 : i32
    %c0_i32_0 = arith.constant 0 : i32
    %c0_i32_1 = arith.constant 0 : i32
    return %arg0, %c0_i32, %c0_i32_0 : i32, i32, i32
  }
  func.func @transform_3(%arg0: i32) -> (i32, i32, i32) {
    %c0_i32 = arith.constant 0 : i32
    %c0_i32_0 = arith.constant 0 : i32
    %c0_i32_1 = arith.constant 0 : i32
    return %arg0, %c0_i32, %c0_i32_0 : i32, i32, i32
  }
  func.func @transform_4(%arg0: i32) -> (i32, i32, i32) {
    %c0_i32 = arith.constant 0 : i32
    %c0_i32_0 = arith.constant 0 : i32
    %c0_i32_1 = arith.constant 0 : i32
    %c0_i32_2 = arith.constant 0 : i32
    return %c0_i32, %c0_i32_0, %c0_i32_1 : i32, i32, i32
  }
  func.func @transform_5(%arg0: i32) -> (i32, i32, i32) {
    %c0_i32 = arith.constant 0 : i32
    %c0_i32_0 = arith.constant 0 : i32
    %c0_i32_1 = arith.constant 0 : i32
    return %arg0, %c0_i32, %c0_i32_0 : i32, i32, i32
  }
}

module attributes {stable_mosaic.version = 11 : i64} {
  func.func @_merge_kernel(%arg0: i32, %arg1: memref<1x16x256xf32, #tpu.memory_space<vmem>>, %arg2: memref<1x8x256xf32, #tpu.memory_space<vmem>>, %arg3: memref<1x8x256xf32, #tpu.memory_space<vmem>>, %arg4: memref<16x8xf32, #tpu.memory_space<vmem>>, %arg5: memref<16x8xf32, #tpu.memory_space<vmem>>, %arg6: memref<1x16x256xf32, #tpu.memory_space<vmem>>) attributes {dimension_semantics = [#tpu.dimension_semantics<parallel>], iteration_bounds = array<i64: 2>, scalar_prefetch = 0 : i64, scratch_operands = 0 : i64, tpu.core_type = #tpu.core_type<tc>, window_params = [{transform_indices = @transform_0, window_bounds = array<i64: 1, 16, 256>}, {transform_indices = @transform_1, window_bounds = array<i64: 1, 8, 256>}, {transform_indices = @transform_2, window_bounds = array<i64: 1, 8, 256>}, {pipeline_mode = #tpu.pipeline_mode<synchronous>, transform_indices = @transform_3, window_bounds = array<i64: 16, 8>}, {pipeline_mode = #tpu.pipeline_mode<synchronous>, transform_indices = @transform_4, window_bounds = array<i64: 16, 8>}, {transform_indices = @transform_5, window_bounds = array<i64: 1, 16, 256>}]} {
    %c0 = arith.constant 0 : index
    %c0_0 = arith.constant 0 : index
    %0 = vector.load %arg4[%c0, %c0_0] : memref<16x8xf32, #tpu.memory_space<vmem>>, vector<16x8xf32>
    %c0_1 = arith.constant 0 : index
    %c0_2 = arith.constant 0 : index
    %c0_3 = arith.constant 0 : index
    %1 = vector.load %arg2[%c0_1, %c0_2, %c0_3] : memref<1x8x256xf32, #tpu.memory_space<vmem>>, vector<1x8x256xf32>
    %2 = vector.shape_cast %1 : vector<1x8x256xf32> to vector<8x256xf32>
    %cst = arith.constant dense<0.000000e+00> : vector<16x256xf32>
    %3 = tpu.matmul %0, %2, %cst {dimension_numbers = #tpu.dot_dimension_numbers<[1], [0], [0], [1], [0, 0, 1, 1], [], []>} : vector<16x8xf32>, vector<8x256xf32>, vector<16x256xf32> -> vector<16x256xf32>
    %c0_4 = arith.constant 0 : index
    %c0_5 = arith.constant 0 : index
    %4 = vector.load %arg5[%c0_4, %c0_5] : memref<16x8xf32, #tpu.memory_space<vmem>>, vector<16x8xf32>
    %c0_6 = arith.constant 0 : index
    %c0_7 = arith.constant 0 : index
    %c0_8 = arith.constant 0 : index
    %5 = vector.load %arg3[%c0_6, %c0_7, %c0_8] : memref<1x8x256xf32, #tpu.memory_space<vmem>>, vector<1x8x256xf32>
    %6 = vector.shape_cast %5 : vector<1x8x256xf32> to vector<8x256xf32>
    %cst_9 = arith.constant dense<0.000000e+00> : vector<16x256xf32>
    %7 = tpu.matmul %4, %6, %cst_9 {dimension_numbers = #tpu.dot_dimension_numbers<[1], [0], [0], [1], [0, 0, 1, 1], [], []>} : vector<16x8xf32>, vector<8x256xf32>, vector<16x256xf32> -> vector<16x256xf32>
    %8 = arith.addf %3, %7 : vector<16x256xf32>
    %c0_10 = arith.constant 0 : index
    %c0_11 = arith.constant 0 : index
    %c0_12 = arith.constant 0 : index
    %9 = vector.load %arg1[%c0_10, %c0_11, %c0_12] : memref<1x16x256xf32, #tpu.memory_space<vmem>>, vector<1x16x256xf32>
    %10 = vector.shape_cast %9 : vector<1x16x256xf32> to vector<16x256xf32>
    %11 = arith.addf %8, %10 : vector<16x256xf32>
    %c0_13 = arith.constant 0 : index
    %c0_14 = arith.constant 0 : index
    %c0_15 = arith.constant 0 : index
    %12 = vector.load %arg6[%c0_13, %c0_14, %c0_15] : memref<1x16x256xf32, #tpu.memory_space<vmem>>, vector<1x16x256xf32>
    %13 = vector.shape_cast %12 : vector<1x16x256xf32> to vector<16x256xf32>
    %14 = vector.shape_cast %11 : vector<16x256xf32> to vector<1x16x256xf32>
    tpu.vector_store %arg6[%c0_13, %c0_14, %c0_15], %14 {strides = array<i32>} : memref<1x16x256xf32, #tpu.memory_space<vmem>>, vector<1x16x256xf32>,
    return
  }
  func.func @transform_0(%arg0: i32) -> (i32, i32, i32) {
    %c0_i32 = arith.constant 0 : i32
    %c0_i32_0 = arith.constant 0 : i32
    %c0_i32_1 = arith.constant 0 : i32
    return %arg0, %c0_i32, %c0_i32_0 : i32, i32, i32
  }
  func.func @transform_1(%arg0: i32) -> (i32, i32, i32) {
    %c0_i32 = arith.constant 0 : i32
    %c0_i32_0 = arith.constant 0 : i32
    %c0_i32_1 = arith.constant 0 : i32
    return %arg0, %c0_i32, %c0_i32_0 : i32, i32, i32
  }
  func.func @transform_2(%arg0: i32) -> (i32, i32, i32) {
    %c0_i32 = arith.constant 0 : i32
    %c0_i32_0 = arith.constant 0 : i32
    %c0_i32_1 = arith.constant 0 : i32
    return %arg0, %c0_i32, %c0_i32_0 : i32, i32, i32
  }
  func.func @transform_3(%arg0: i32) -> (i32, i32) {
    %c0_i32 = arith.constant 0 : i32
    %c0_i32_0 = arith.constant 0 : i32
    %c0_i32_1 = arith.constant 0 : i32
    return %c0_i32, %c0_i32_0 : i32, i32
  }
  func.func @transform_4(%arg0: i32) -> (i32, i32) {
    %c0_i32 = arith.constant 0 : i32
    %c0_i32_0 = arith.constant 0 : i32
    %c0_i32_1 = arith.constant 0 : i32
    return %c0_i32, %c0_i32_0 : i32, i32
  }
  func.func @transform_5(%arg0: i32) -> (i32, i32, i32) {
    %c0_i32 = arith.constant 0 : i32
    %c0_i32_0 = arith.constant 0 : i32
    %c0_i32_1 = arith.constant 0 : i32
    return %arg0, %c0_i32, %c0_i32_0 : i32, i32, i32
  }
}

</mosaic_0001>

<bundles_post_ra>
// kernel: orsnet_forward.7
= control target key start
LH: loop header
LB: loop body
LE: loop exit
PB: predicated region body
PF: predicated region fallthrough
CT: control target
= control target key end

     0   :  { %s1492_s12 = smov 0   ;;  %s1760_s0 = inlined_call_operand.vmem [shape: f32[2,16,256], index: 0, kind: input, shape index: {}]   ;;  %s1761_s1 = inlined_call_operand.vmem [shape: f32[9,16,16], index: 1, kind: input, shape index: {}]   ;;  %s1762_s2 = inlined_call_operand.vmem [shape: f32[2,16,256], index: 2, kind: output, shape index: {0}]   ;;  %s1763_s3 = inlined_call_operand.vmem [shape: f32[2,16,1], index: 3, kind: output, shape index: {1}]  }
   0x1 LB: > { %s1336_s13 = sadd.s32 4294967295, %s1461_s12   ;;  %p1340_p0 = scmp.ge.s32.totalorder %s1461_s12, 1  ;;  %s1461_s12 = sphi %s1492_s12, %s14_s12  }
   0x2   : > { %p140_p1 = scmp.lt.s32.totalorder %s1461_s12, 3 }
   0x4   : > { %p141_p2 = pnand %p1340_p0, %p140_p1 }
   0x5   : > { %p169_p3 = scmp.lt.s32.totalorder (!%p141_p2), %s1336_s13, 1  ;;  %s1464_s14 = smov (!%p141_p2), 16  }
   0x6   : > { %144 = sbr.rel (%p141_p2) target bundleno = 551 (0x227), region = 28  ;;  %s1465_s19 = smov (!%p141_p2), 17  }
   0x7   : > { %s1466_s20 = smov (!%p141_p2), 15   ;;  %s1467_s21 = smov (!%p141_p2), 1  }
   0x8   : > { %s1468_s22 = smov (!%p141_p2), 127   ;;  %s1469_s23 = smov (!%p141_p2), 113  }
   0x9   : > { %s1470_s24 = smov (!%p141_p2), 112   ;;  %s1471_s25 = smov (!%p141_p2), 111  }
   0xb   : > { %v1463_v0 = vmov 0.0   ;;  %s1773_s13 = smov (!%p169_p3, %s1336_s13), 1  ;;  %v214_v5 = vlaneseq  ;;  %vm294_vm0 = vcmask 130048   ;;  %v191_v22 = vld [vmem:[%s1761_s1 + $0x18] sm:$0xff]  ;;  %v190_v23 = vld [vmem:[%s1761_s1 + $0x10] sm:$0xff]  ;;  %vm269_vm1 = vcmask 138240  }
   0xc   : > { %379 = vmatprep.mubr.f32.mxu1 %v1463_v0  ;;  %373 = vmatprep.mubr.f32.mxu0 %v1463_v0  ;;  %s1391_s15 = sshll.u32 %s1773_s13, 5  ;;  %v188_v37 = vld [vmem:[%s1761_s1] sm:$0xff]  ;;  %vm481_vm4 = vcmask 121856   ;;  %v189_v42 = vld [vmem:[%s1761_s1 + $0x8] sm:$0xff]  ;;  %vm593_vm7 = vcmask 7168   ;;  %vm804_vm8 = vcmask 1039360  }
   0xd   : > { %1416 = vrot.lane.b32.xlu1 %v1463_v0, %s1464_s14  ;;  %s173_s18 = scalar_lea.vmem %s1760_s0, %s1391_s15  ;;  %v215_v7 = vand.u32 127, %v214_v5  ;;  %v192_v52 = vld [vmem:[%s1761_s1 + $0x20] sm:$0xff]  ;;  %v193_v59 = vld [vmem:[%s1761_s1 + $0x28] sm:$0xff]  ;;  %v194_v5 = vld [vmem:[%s1761_s1 + $0x30] sm:$0xff]  ;;  %vm916_vm9 = vcmask 924672   ;;  %vm1028_vm10 = vcmask 916480   ;;  %s178_s16 = scalar_lea.vmem %s1762_s2, %s1391_s15 }
   0xe   : > { %v1511_v1 = vld [vmem:[%s173_s18 + $0x10] sm:$0xff]  ;;  %v1513_v2 = vld [vmem:[%s173_s18] sm:$0xff]  ;;  %v1517_v3 = vld [vmem:[%s173_s18 + $0x18] sm:$0xff]  ;;  %vm1136_vm11 = vcmask 908288   ;;  %s1393_s15 = sshll.u32 %s1773_s13, 4 }
   0xf   : > { %290 = vrot.lane.b32.xlu0 %v1511_v1, %s1464_s14  ;;  %v1521_v4 = vld [vmem:[%s173_s18 + $0x8] sm:$0xff]  ;;  %v216_v11 = vadd.s32 128, %v215_v7  ;;  %v221_v20 = vand.u32 15, %v215_v7 }
  0x10   : > { %v201_v26 = vld [vmem:[%s1761_s1 + $0x68] sm:$0xff] }
  0x11   : > { %284 = vrot.lane.b32.xlu1 %v1513_v2, %s1464_s14  ;;  %v228_v17 = vand.u32 15, %v216_v11  ;;  %vm1573_vm3 = vcmp.ne.s32.totalorder %v221_v20, 0  ;;  %vm1608_vm6 = vcmp.ne.s32.totalorder %v221_v20, 15 }
  0x13   : > { %292 = vrot.lane.b32.xlu0 %v1517_v3, %s1464_s14  ;;  %vm1568_vm2 = vcmp.ne.s32.totalorder %v228_v17, 0  ;;  %vm1595_vm5 = vcmp.ne.s32.totalorder %v228_v17, 15 }
  0x15   : > { %265 = vrot.lane.b32.xlu1 %v1511_v1, %s1465_s19 }
  0x17   : > { %286 = vrot.lane.b32.xlu0 %v1521_v4, %s1464_s14 }
  0x19   : > { %1421 = vrot.lane.b32.xlu1 %v1463_v0, %s1465_s19 }
  0x1b   : > { %267 = vrot.lane.b32.xlu0 %v1517_v3, %s1465_s19 }
  0x1d   : > { %261 = vrot.lane.b32.xlu1 %v1521_v4, %s1465_s19 }
  0x1f   : > { %259 = vrot.lane.b32.xlu0 %v1513_v2, %s1465_s19  ;;  %s183_s19 = scalar_lea.vmem %s1763_s3, %s1393_s15 }
  0x21   : > { %479 = vrot.lane.b32.xlu1 %v1517_v3, %s1466_s20 }
  0x23   : > { %477 = vrot.lane.b32.xlu0 %v1511_v1, %s1466_s20 }
  0x25   : > { %471 = vrot.lane.b32.xlu1 %v1513_v2, %s1466_s20 }
  0x27   : > { %1426 = vrot.lane.b32.xlu0 %v1463_v0, %s1466_s20 }
  0x29   : > { %589 = vrot.lane.b32.xlu1 %v1511_v1, %s1467_s21 }
  0x2b   : > { %473 = vrot.lane.b32.xlu0 %v1521_v4, %s1466_s20 }
  0x2d   : > { %1431 = vrot.lane.b32.xlu1 %v1463_v0, %s1467_s21 }
  0x2f   : > { %591 = vrot.lane.b32.xlu0 %v1517_v3, %s1467_s21 }
  0x31   : > { %585 = vrot.lane.b32.xlu1 %v1521_v4, %s1467_s21 }
  0x33   : > { %583 = vrot.lane.b32.xlu0 %v1513_v2, %s1467_s21 }
  0x35   : > { %1436 = vrot.lane.b32.xlu1 %v1463_v0, %s1468_s22 }
  0x37   : > { %800 = vrot.lane.b32.xlu0 %v1517_v3, %s1468_s22 }
  0x39   : > { %794 = vrot.lane.b32.xlu1 %v1521_v4, %s1468_s22 }
  0x3b   : > { %798 = vrot.lane.b32.xlu0 %v1511_v1, %s1468_s22 }
  0x3d   : > { %1441 = vrot.lane.b32.xlu1 %v1463_v0, %s1469_s23 }
  0x3f   : > { %912 = vrot.lane.b32.xlu0 %v1517_v3, %s1469_s23 }
  0x41   : > { %910 = vrot.lane.b32.xlu1 %v1511_v1, %s1469_s23 }
  0x43   : > { %792 = vrot.lane.b32.xlu0 %v1513_v2, %s1468_s22 }
  0x45   : > { %904 = vrot.lane.b32.xlu1 %v1513_v2, %s1469_s23 }
  0x47   : > { %906 = vrot.lane.b32.xlu0 %v1521_v4, %s1469_s23 }
  0x49   : > { %1446 = vrot.lane.b32.xlu1 %v1463_v0, %s1470_s24 }
  0x4b   : > { %1024 = vrot.lane.b32.xlu0 %v1517_v3, %s1470_s24 }
  0x4d   : > { %1018 = vrot.lane.b32.xlu1 %v1521_v4, %s1470_s24 }
  0x4f   : > { %1022 = vrot.lane.b32.xlu0 %v1511_v1, %s1470_s24 }
  0x51   : > { %1451 = vrot.lane.b32.xlu1 %v1463_v0, %s1471_s25 }
  0x53   : > { %1132 = vrot.lane.b32.xlu0 %v1517_v3, %s1471_s25 }
  0x55   : > { %1130 = vrot.lane.b32.xlu1 %v1511_v1, %s1471_s25 }
  0x57   : > { %1016 = vrot.lane.b32.xlu0 %v1513_v2, %s1470_s24 }
  0x59   : > { %1124 = vrot.lane.b32.xlu1 %v1513_v2, %s1471_s25 }
  0x5b   : > { %1126 = vrot.lane.b32.xlu0 %v1521_v4, %s1471_s25 }
  0x7f   : > { %v1417_v6 = vpop.permute.xlu1 %1416 }
  0x80   : > { %v1418_v10 = vunpack.i.l.bf16 %v1417_v6  ;;  %v1419_v15 = vunpack.i.h.bf16 %v1417_v6 }
  0x81   : > { %v291_v8 = vpop.permute.xlu0 %290 }
  0x82   : > { %v297_v16 = vsel %vm294_vm0, %v1418_v10, %v291_v8 }
  0x83   : > { %v285_v9 = vpop.permute.xlu1 %284 }
  0x84   : > { %v295_v25 = vsel %vm294_vm0, %v1419_v15, %v285_v9 }
  0x85   : > { %v293_v12 = vpop.permute.xlu0 %292 }
  0x86   : > { %v298_v14 = vsel %vm294_vm0, %v291_v8, %v293_v12  ;;  %v195_v8 = vld [vmem:[%s1761_s1 + $0x38] sm:$0xff] }
  0x87   : > { %v266_v13 = vpop.permute.xlu1 %265  ;;  %337 = vmatprep.subr.mxu0 %v298_v14  ;;  %1394 = vmatprep.subr.mxu1 %v298_v14 }
  0x88   : > { %338 = vmatpush1.msra.mxu0 %v297_v16  ;;  %1396 = vmatpush1.msra.mxu1 %v297_v16 }
  0x89   : > { %v287_v18 = vpop.permute.xlu0 %286 }
  0x8a   : > { %v296_v21 = vsel %vm294_vm0, %v285_v9, %v287_v18  ;;  %v197_v9 = vld [vmem:[%s1761_s1 + $0x48] sm:$0xff] }
  0x8b   : > { %v1422_v19 = vpop.permute.xlu1 %1421  ;;  %339 = vmatprep.subr.mxu0 %v296_v21  ;;  %1395 = vmatprep.subr.mxu1 %v296_v21 }
  0x8c   : > { %v1423_v24 = vunpack.i.l.bf16 %v1422_v19  ;;  %340 = vmatpush1.msra.mxu0 %v295_v25  ;;  %1397 = vmatpush1.msra.mxu1 %v295_v25  ;;  %v1424_v30 = vunpack.i.h.bf16 %v1422_v19 }
  0x8d   : > { %v268_v27 = vpop.permute.xlu0 %267  ;;  %1348 = vmatmul.mubr.msk.f32.vlgmr.msra.gmra.mxu1 %vm294_vm0, %v191_v22  ;;  %1347 = vmatmul.mubr.msk.f32.vlgmr.msra.gmra.mxu0 %vm294_vm0, %v190_v23  ;;  %v198_v22 = vld [vmem:[%s1761_s1 + $0x50] sm:$0xff] }
  0x8e   : > { %v273_v31 = vsel %vm269_vm1, %v266_v13, %v268_v27  ;;  %456 = vmatprep.mubr.f32.mxu1 %v1463_v0  ;;  %564 = vmatprep.mubr.f32.mxu0 %v1463_v0  ;;  %v272_v32 = vsel %vm269_vm1, %v1423_v24, %v266_v13 }
  0x8f   : > { %v262_v28 = vpop.permute.xlu1 %261  ;;  %1349 = vmatprep.subr.msk.mxu1 %vm1568_vm2, %v273_v31 }
  0x90   : > { %1350 = vmatpush1.msk.msra.mxu1 %vm1573_vm3, %v272_v32 }
  0x91   : > { %v260_v33 = vpop.permute.xlu0 %259 }
  0x92   : > { %v270_v35 = vsel %vm269_vm1, %v1424_v30, %v260_v33  ;;  %v271_v36 = vsel %vm269_vm1, %v260_v33, %v262_v28  ;;  %v199_v28 = vld [vmem:[%s1761_s1 + $0x58] sm:$0xff]  ;;  %v200_v33 = vld [vmem:[%s1761_s1 + $0x60] sm:$0xff] }
  0x93   : > { %v480_v34 = vpop.permute.xlu1 %479  ;;  %1351 = vmatprep.subr.msk.mxu1 %vm1568_vm2, %v271_v36 }
  0x94   : > { %1352 = vmatpush1.msk.msra.mxu1 %vm1573_vm3, %v270_v35 }
  0x95   : > { %v478_v39 = vpop.permute.xlu0 %477  ;;  %1353 = vmatmul.mubr.msk.f32.vlgmr.msra.gmra.mxu1 %vm294_vm0, %v188_v37 }
  0x96   : > { %v485_v41 = vsel %vm481_vm4, %v478_v39, %v480_v34  ;;  %462 = vmatprep.mubr.f32.mxu1 %v1463_v0 }
  0x97   : > { %v472_v40 = vpop.permute.xlu1 %471  ;;  %1355 = vmatprep.subr.msk.mxu0 %vm1595_vm5, %v485_v41 }
  0x99   : > { %v1427_v43 = vpop.permute.xlu0 %1426  ;;  %1354 = vmatmul.mubr.msk.f32.gmra.mxu1 %vm294_vm0, %v189_v42 }
  0x9a   : > { %v1428_v45 = vunpack.i.l.bf16 %v1427_v43  ;;  %676 = vmatprep.mubr.f32.mxu1 %v1463_v0  ;;  %v1429_v47 = vunpack.i.h.bf16 %v1427_v43 }
  0x9b   : > { %v590_v44 = vpop.permute.xlu1 %589 }
  0x9c   : > { %v484_v48 = vsel %vm481_vm4, %v1428_v45, %v478_v39  ;;  %v482_v54 = vsel %vm481_vm4, %v1429_v47, %v472_v40 }
  0x9d   : > { %v474_v49 = vpop.permute.xlu0 %473  ;;  %1356 = vmatpush1.msk.msra.mxu0 %vm1608_vm6, %v484_v48 }
  0x9e   : > { %v483_v51 = vsel %vm481_vm4, %v472_v40, %v474_v49  ;;  %v202_v49 = vld [vmem:[%s1761_s1 + $0x70] sm:$0xff] }
  0x9f   : > { %v1432_v50 = vpop.permute.xlu1 %1431  ;;  %1357 = vmatprep.subr.msk.mxu0 %vm1595_vm5, %v483_v51 }
  0xa0   : > { %v1433_v53 = vunpack.i.l.bf16 %v1432_v50  ;;  %1358 = vmatpush1.msk.msra.mxu0 %vm1608_vm6, %v482_v54  ;;  %v1434_v57 = vunpack.i.h.bf16 %v1432_v50  ;;  %v203_v54 = vld [vmem:[%s1761_s1 + $0x78] sm:$0xff] }
  0xa1   : > { %v592_v55 = vpop.permute.xlu0 %591  ;;  %1359 = vmatmul.mubr.msk.f32.vlgmr.msra.gmra.mxu0 %vm294_vm0, %v192_v52  ;;  %727 = vmatprep.subr.mxu0 %v1517_v3 }
  0xa2   : > { %v597_v58 = vsel %vm593_vm7, %v590_v44, %v592_v55  ;;  %570 = vmatprep.mubr.f32.mxu0 %v1463_v0  ;;  %728 = vmatpush1.msra.mxu0 %v1511_v1  ;;  %v596_v60 = vsel %vm593_vm7, %v1433_v53, %v590_v44 }
  0xa3   : > { %v586_v56 = vpop.permute.xlu1 %585  ;;  %1361 = vmatprep.subr.msk.mxu1 %vm1568_vm2, %v597_v58  ;;  %729 = vmatprep.subr.mxu0 %v1521_v4  ;;  %v196_v4 = vld [vmem:[%s1761_s1 + $0x40] sm:$0xff]  ;;  %v205_v58 = vld [vmem:[%s1761_s1 + $0x88] sm:$0xff] }
  0xa4   : > { %1362 = vmatpush1.msk.msra.mxu1 %vm1573_vm3, %v596_v60  ;;  %730 = vmatpush1.msra.mxu0 %v1513_v2 }
  0xa5   : > { %v584_v61 = vpop.permute.xlu0 %583  ;;  %1360 = vmatmul.mubr.msk.f32.gmra.mxu0 %vm294_vm0, %v193_v59 }
  0xa6   : > { %v594_v63 = vsel %vm593_vm7, %v1434_v57, %v584_v61  ;;  %v595_v1 = vsel %vm593_vm7, %v584_v61, %v586_v56  ;;  %763 = vmatprep.mubr.f32.mxu0 %v1463_v0  ;;  %v204_v57 = vld [vmem:[%s1761_s1 + $0x80] sm:$0xff] }
  0xa7   : > { %v1437_v62 = vpop.permute.xlu1 %1436  ;;  %1363 = vmatprep.subr.msk.mxu1 %vm1568_vm2, %v595_v1 }
  0xa8   : > { %v1438_v3 = vunpack.i.l.bf16 %v1437_v62  ;;  %1364 = vmatpush1.msk.msra.mxu1 %vm1573_vm3, %v594_v63  ;;  %v1439_v10 = vunpack.i.h.bf16 %v1437_v62 }
  0xa9   : > { %v801_v2 = vpop.permute.xlu0 %800  ;;  %1365 = vmatmul.mubr.msk.f32.vlgmr.msra.gmra.mxu1 %vm294_vm0, %v194_v5  ;;  %1367 = vmatmul.mubr.msk.f32.vlgmr.msra.gmra.mxu0 %vm294_vm0, %v196_v4 }
  0xaa   : > { %v808_v7 = vsel %vm804_vm8, %v801_v2, %v1438_v3  ;;  %682 = vmatprep.mubr.f32.mxu1 %v1463_v0  ;;  %769 = vmatprep.mubr.f32.mxu0 %v1463_v0 }
  0xab   : > { %v795_v6 = vpop.permute.xlu1 %794  ;;  %1369 = vmatprep.subr.msk.mxu1 %vm1595_vm5, %v808_v7 }
  0xac   : > { %v806_v15 = vsel %vm804_vm8, %v795_v6, %v1439_v10 }
  0xad   : > { %v799_v11 = vpop.permute.xlu0 %798  ;;  %1366 = vmatmul.mubr.msk.f32.gmra.mxu1 %vm294_vm0, %v195_v8  ;;  %1368 = vmatmul.mubr.msk.f32.gmra.mxu0 %vm294_vm0, %v197_v9 }
  0xae   : > { %v807_v13 = vsel %vm804_vm8, %v799_v11, %v801_v2  ;;  %887 = vmatprep.mubr.f32.mxu1 %v1463_v0  ;;  %999 = vmatprep.mubr.f32.mxu0 %v1463_v0 }
  0xaf   : > { %v1442_v12 = vpop.permute.xlu1 %1441  ;;  %1370 = vmatpush1.msk.msra.mxu1 %vm1608_vm6, %v807_v13 }
  0xb0   : > { %v1443_v14 = vunpack.i.l.bf16 %v1442_v12  ;;  %1371 = vmatprep.subr.msk.mxu1 %vm1595_vm5, %v806_v15  ;;  %v1444_v24 = vunpack.i.h.bf16 %v1442_v12 }
  0xb1   : > { %v913_v16 = vpop.permute.xlu0 %912 }
  0xb2   : > { %v920_v18 = vsel %vm916_vm9, %v913_v16, %v1443_v14 }
  0xb3   : > { %v911_v17 = vpop.permute.xlu1 %910  ;;  %1375 = vmatprep.subr.msk.mxu0 %vm1568_vm2, %v920_v18 }
  0xb4   : > { %v919_v19 = vsel %vm916_vm9, %v911_v17, %v913_v16 }
  0xb5   : > { %1376 = vmatpush1.msk.msra.mxu0 %vm1573_vm3, %v919_v19  ;;  %v793_v20 = vpop.permute.xlu0 %792 }
  0xb6   : > { %v805_v23 = vsel %vm804_vm8, %v793_v20, %v795_v6 }
  0xb7   : > { %v905_v21 = vpop.permute.xlu1 %904  ;;  %1372 = vmatpush1.msk.msra.mxu1 %vm1608_vm6, %v805_v23 }
  0xb8   : > { %1373 = vmatmul.mubr.msk.f32.vlgmr.msra.gmra.mxu1 %vm294_vm0, %v198_v22 }
  0xb9   : > { %v907_v25 = vpop.permute.xlu0 %906  ;;  %893 = vmatprep.mubr.f32.mxu1 %v1463_v0 }
  0xba   : > { %v917_v30 = vsel %vm916_vm9, %v905_v21, %v907_v25  ;;  %v918_v31 = vsel %vm916_vm9, %v907_v25, %v1444_v24 }
  0xbb   : > { %v1447_v27 = vpop.permute.xlu1 %1446  ;;  %1377 = vmatprep.subr.msk.mxu0 %vm1568_vm2, %v918_v31 }
  0xbc   : > { %v1448_v32 = vunpack.i.l.bf16 %v1447_v27  ;;  %1374 = vmatmul.mubr.msk.f32.gmra.mxu1 %vm294_vm0, %v199_v28  ;;  %1378 = vmatpush1.msk.msra.mxu0 %vm1573_vm3, %v917_v30  ;;  %v1449_v37 = vunpack.i.h.bf16 %v1447_v27 }
  0xbd   : > { %v1025_v34 = vpop.permute.xlu0 %1024  ;;  %1379 = vmatmul.mubr.msk.f32.vlgmr.msra.gmra.mxu0 %vm294_vm0, %v200_v33  ;;  %1107 = vmatprep.mubr.f32.mxu1 %v1463_v0 }
  0xbe   : > { %v1032_v36 = vsel %vm1028_vm10, %v1025_v34, %v1448_v32  ;;  %1005 = vmatprep.mubr.f32.mxu0 %v1463_v0 }
  0xbf   : > { %v1019_v35 = vpop.permute.xlu1 %1018  ;;  %1071 = vmatprep.subr.mxu1 %v1032_v36 }
  0xc0   : > { %v1030_v42 = vsel %vm1028_vm10, %v1019_v35, %v1449_v37 }
  0xc1   : > { %v1023_v39 = vpop.permute.xlu0 %1022  ;;  %1380 = vmatmul.mubr.msk.f32.gmra.mxu0 %vm294_vm0, %v201_v26 }
  0xc2   : > { %v1031_v29 = vsel %vm1028_vm10, %v1023_v39, %v1025_v34  ;;  %1219 = vmatprep.mubr.f32.mxu0 %v1463_v0 }
  0xc3   : > { %v1452_v40 = vpop.permute.xlu1 %1451  ;;  %1072 = vmatpush1.msra.mxu1 %v1031_v29 }
  0xc4   : > { %v1453_v41 = vunpack.i.l.bf16 %v1452_v40  ;;  %1073 = vmatprep.subr.mxu1 %v1030_v42  ;;  %v1454_v52 = vunpack.i.h.bf16 %v1452_v40 }
  0xc5   : > { %v1133_v43 = vpop.permute.xlu0 %1132 }
  0xc6   : > { %v1140_v45 = vsel %vm1136_vm11, %v1133_v43, %v1453_v41 }
  0xc7   : > { %v1131_v44 = vpop.permute.xlu1 %1130  ;;  %1383 = vmatprep.subr.msk.mxu0 %vm1595_vm5, %v1140_v45 }
  0xc8   : > { %v1139_v47 = vsel %vm1136_vm11, %v1131_v44, %v1133_v43 }
  0xc9   : > { %1384 = vmatpush1.msk.msra.mxu0 %vm1608_vm6, %v1139_v47  ;;  %v1017_v48 = vpop.permute.xlu0 %1016 }
  0xca   : > { %v1029_v50 = vsel %vm1028_vm10, %v1017_v48, %v1019_v35 }
  0xcb   : > { %1074 = vmatpush1.msra.mxu1 %v1029_v50  ;;  %v1125_v51 = vpop.permute.xlu1 %1124 }
  0xcc   : > { %1381 = vmatmul.mubr.msk.f32.vlgmr.msra.gmra.mxu1 %vm294_vm0, %v202_v49 }
  0xcd   : > { %v1127_v53 = vpop.permute.xlu0 %1126  ;;  %1113 = vmatprep.mubr.f32.mxu1 %v1463_v0 }
  0xce   : > { %v1138_v55 = vsel %vm1136_vm11, %v1127_v53, %v1454_v52  ;;  %v1137_v56 = vsel %vm1136_vm11, %v1125_v51, %v1127_v53 }
  0xcf   : > { %1385 = vmatprep.subr.msk.mxu0 %vm1595_vm5, %v1138_v55 }
  0xd0   : > { %1382 = vmatmul.mubr.msk.f32.gmra.mxu1 %vm294_vm0, %v203_v54  ;;  %1386 = vmatpush1.msk.msra.mxu0 %vm1608_vm6, %v1137_v56 }
  0xd1   : > { %1387 = vmatmul.mubr.msk.f32.vlgmr.msra.gmra.mxu0 %vm294_vm0, %v204_v57 }
  0xd2   : > { %1225 = vmatprep.mubr.f32.mxu0 %v1463_v0 }
  0xd5   : > { %1388 = vmatmul.mubr.msk.f32.gmra.mxu0 %vm294_vm0, %v205_v58 }
 0x14d   : > { %v381_v59 = vpop.f32.mrf.mxu1  ;;  %v375_v61 = vpop.f32.mrf.mxu0 }
 0x14f   : > { %v383_v60 = vpop.f32.mrf.mxu1  ;;  %v377_v62 = vpop.f32.mrf.mxu0 }
 0x155   : > { %v458_v38 = vpop.f32.mrf.mxu1 }
 0x156   : > { %v459_v10 = vadd.f32 %v458_v38, %v375_v61 }
 0x157   : > { %v460_v63 = vpop.f32.mrf.mxu1 }
 0x158   : > { %v461_v12 = vadd.f32 %v460_v63, %v377_v62 }
 0x159   : > { %v464_v3 = vpop.f32.mrf.mxu1 }
 0x15a   : > { %v465_v16 = vadd.f32 %v464_v3, %v381_v59 }
 0x15b   : > { %v466_v5 = vpop.f32.mrf.mxu1 }
 0x15c   : > { %v467_v22 = vadd.f32 %v466_v5, %v383_v60 }
 0x161   : > { %v566_v1 = vpop.f32.mrf.mxu0 }
 0x162   : > { %v577_v14 = vadd.f32 %v566_v1, %v459_v10 }
 0x163   : > { %v568_v46 = vpop.f32.mrf.mxu0 }
 0x164   : > { %v578_v17 = vadd.f32 %v568_v46, %v461_v12 }
 0x165   : > { %v572_v4 = vpop.f32.mrf.mxu0 }
 0x166   : > { %v579_v23 = vadd.f32 %v572_v4, %v465_v16 }
 0x167   : > { %v574_v6 = vpop.f32.mrf.mxu0 }
 0x168   : > { %v580_v30 = vadd.f32 %v574_v6, %v467_v22 }
 0x169   : > { %v678_v2 = vpop.f32.mrf.mxu1  ;;  %v765_v7 = vpop.f32.mrf.mxu0 }
 0x16a   : > { %v689_v19 = vadd.f32 %v678_v2, %v577_v14 }
 0x16b   : > { %v680_v0 = vpop.f32.mrf.mxu1  ;;  %v767_v9 = vpop.f32.mrf.mxu0 }
 0x16c   : > { %v690_v24 = vadd.f32 %v680_v0, %v578_v17  ;;  %v776_v25 = vadd.f32 %v765_v7, %v689_v19 }
 0x16d   : > { %v684_v8 = vpop.f32.mrf.mxu1  ;;  %v771_v13 = vpop.f32.mrf.mxu0 }
 0x16e   : > { %v691_v31 = vadd.f32 %v684_v8, %v579_v23  ;;  %v777_v32 = vadd.f32 %v767_v9, %v690_v24 }
 0x16f   : > { %v686_v11 = vpop.f32.mrf.mxu1  ;;  %v773_v18 = vpop.f32.mrf.mxu0 }
 0x170   : > { %v692_v36 = vadd.f32 %v686_v11, %v580_v30  ;;  %v778_v26 = vadd.f32 %v771_v13, %v691_v31 }
 0x172   : > { %v779_v42 = vadd.f32 %v773_v18, %v692_v36 }
 0x178   : > { %v889_v15 = vpop.f32.mrf.mxu1 }
 0x179   : > { %v900_v33 = vadd.f32 %v889_v15, %v776_v25 }
 0x17a   : > { %v891_v20 = vpop.f32.mrf.mxu1 }
 0x17b   : > { %v901_v37 = vadd.f32 %v891_v20, %v777_v32 }
 0x17c   : > { %v895_v27 = vpop.f32.mrf.mxu1 }
 0x17d   : > { %v1001_v21 = vpop.f32.mrf.mxu0  ;;  %v902_v43 = vadd.f32 %v895_v27, %v778_v26 }
 0x17e   : > { %v897_v34 = vpop.f32.mrf.mxu1  ;;  %v1012_v40 = vadd.f32 %v1001_v21, %v900_v33 }
 0x17f   : > { %v1003_v28 = vpop.f32.mrf.mxu0  ;;  %v903_v49 = vadd.f32 %v897_v34, %v779_v42 }
 0x180   : > { %v1013_v44 = vadd.f32 %v1003_v28, %v901_v37 }
 0x181   : > { %v1007_v35 = vpop.f32.mrf.mxu0 }
 0x182   : > { %v1014_v50 = vadd.f32 %v1007_v35, %v902_v43 }
 0x183   : > { %v1009_v41 = vpop.f32.mrf.mxu0 }
 0x184   : > { %v1015_v55 = vadd.f32 %v1009_v41, %v903_v49 }
 0x18c   : > { %v1109_v39 = vpop.f32.mrf.mxu1 }
 0x18d   : > { %v1120_v45 = vadd.f32 %v1109_v39, %v1012_v40 }
 0x18e   : > { %v1111_v29 = vpop.f32.mrf.mxu1 }
 0x18f   : > { %v1121_v51 = vadd.f32 %v1111_v29, %v1013_v44 }
 0x190   : > { %v1115_v47 = vpop.f32.mrf.mxu1 }
 0x191   : > { %v1221_v48 = vpop.f32.mrf.mxu0  ;;  %v1122_v56 = vadd.f32 %v1115_v47, %v1014_v50 }
 0x192   : > { %v1232_v52 = vadd.f32 %v1221_v48, %v1120_v45  ;;  %v1117_v53 = vpop.f32.mrf.mxu1 }
 0x193   : > { %v1223_v54 = vpop.f32.mrf.mxu0  ;;  %v1123_v59 = vadd.f32 %v1117_v53, %v1015_v55 }
 0x194   : > { %1236 = vst [vmem:[%s178_s16] sm:$0xff] %v1232_v52  ;;  %v1233_v57 = vadd.f32 %v1223_v54, %v1121_v51 }
 0x195   : > { %v1227_v58 = vpop.f32.mrf.mxu0 }
 0x196   : > { %1237 = vst [vmem:[%s178_s16 + $0x8] sm:$0xff] %v1233_v57  ;;  %v1234_v60 = vadd.f32 %v1227_v58, %v1122_v56  ;;  %v1240_v61 = vadd.f32 %v1233_v57, %v1232_v52 }
 0x197   : > { %v1229_v38 = vpop.f32.mrf.mxu0 }
 0x198   : > { %1238 = vst [vmem:[%s178_s16 + $0x10] sm:$0xff] %v1234_v60  ;;  %v1235_v62 = vadd.f32 %v1229_v38, %v1123_v59  ;;  %1241 = vadd.xlane.f32.xlu0 %v1240_v61 }
 0x19a   : > { %1239 = vst [vmem:[%s178_s16 + $0x18] sm:$0xff] %v1235_v62  ;;  %v1243_v63 = vadd.f32 %v1235_v62, %v1234_v60 }
 0x19c   : > { %1244 = vadd.xlane.f32.xlu1 %v1243_v63 }
 0x221   : > { %v1242_v1 = vpop.xlane.xlu0 %1241 }
 0x222   : > { %1246 = vst.msk [vmem:[%s183_s19] sm:$0xff] %vm593_vm7, %v1242_v1 }
 0x225   : > { %v1245_v3 = vpop.xlane.xlu1 %1244 }
 0x226   : > { %1247 = vst.msk [vmem:[%s183_s19 + $0x8] sm:$0xff] %vm593_vm7, %v1245_v3 }
 0x227 PF: > { %s14_s12 = sadd.s32 1, %s1461_s12  }
 0x228   : > { %p11_p4 = scmp.ge.s32.totalorder %s14_s12, 4  }
 0x22a   :  { %13 = sbr.rel (!%p11_p4) target bundleno = 1 (0x1), region = 70 }

// kernel: orsnet_forward.6
= control target key start
LH: loop header
LB: loop body
LE: loop exit
PB: predicated region body
PF: predicated region fallthrough
CT: control target
= control target key end

     0   :  { %s1466_s14 = smov 0   ;;  %s1728_s0 = inlined_call_operand.vmem [shape: f32[2,16,256], index: 0, kind: input, shape index: {}]   ;;  %s1729_s1 = inlined_call_operand.vmem [shape: f32[9,16,16], index: 1, kind: input, shape index: {}]   ;;  %s1730_s2 = inlined_call_operand.<no memory space> [shape: f32[1,1], index: 2, kind: input, shape index: {}]   ;;  %s1731_s3 = inlined_call_operand.vmem [shape: f32[2,16,256], index: 3, kind: output, shape index: {}]  }
   0x1   :  { %v8_v0 = vstv %s1730_s2 }
   0x2   :  { %9 = vst [vmem:[#allocation3] sm:$0x1] %v8_v0 }
   0x3 LB: > { %s1306_s15 = sadd.s32 4294967295, %s1431_s14   ;;  %p1310_p0 = scmp.ge.s32.totalorder %s1431_s14, 1  ;;  %s1431_s14 = sphi %s1466_s14, %s15_s14  }
   0x4   : > { %p139_p1 = scmp.lt.s32.totalorder %s1431_s14, 3 }
   0x6   : > { %p140_p2 = pnand %p1310_p0, %p139_p1 }
   0x7   : > { %p163_p3 = scmp.lt.s32.totalorder (!%p140_p2), %s1306_s15, 1  ;;  %s1434_s2 = smov (!%p140_p2), 16  }
   0x8   : > { %143 = sbr.rel (%p140_p2) target bundleno = 416 (0x1a0), region = 32  ;;  %s1435_s20 = smov (!%p140_p2), 17  }
   0x9   : > { %s1436_s21 = smov (!%p140_p2), 15   ;;  %s1437_s22 = smov (!%p140_p2), 1  }
   0xa   : > { %s1438_s23 = smov (!%p140_p2), 127   ;;  %s1439_s24 = smov (!%p140_p2), 113  }
   0xb   : > { %s1440_s25 = smov (!%p140_p2), 112   ;;  %s1441_s26 = smov (!%p140_p2), 111  }
   0xd   : > { %v1433_v1 = vmov 0.0   ;;  %s1741_s15 = smov (!%p163_p3, %s1306_s15), 1  ;;  %v1442_v6 = vmov 0   ;;  %v1357_v7 = vld [vmem:[#allocation3] ss:$0 sm:$0xff]  ;;  %v203_v8 = vlaneseq  ;;  %vm283_vm0 = vcmask 130048  }
   0xe   : > { %368 = vmatprep.mubr.f32.mxu1 %v1433_v1  ;;  %362 = vmatprep.mubr.f32.mxu0 %v1433_v1  ;;  %s1360_s16 = sshll.u32 %s1741_s15, 5  ;;  %v180_v25 = vld [vmem:[%s1729_s1 + $0x18] sm:$0xff]  ;;  %v179_v26 = vld [vmem:[%s1729_s1 + $0x10] sm:$0xff]  ;;  %vm258_vm1 = vcmask 138240   ;;  %v177_v40 = vld [vmem:[%s1729_s1] sm:$0xff]  ;;  %vm470_vm4 = vcmask 121856  }
   0xf   : > { %1385 = vrot.lane.b32.xlu1 %v1433_v1, %s1434_s2  ;;  %s167_s19 = scalar_lea.vmem %s1728_s0, %s1360_s16  ;;  %1424 = vset.pattern.permute.xlu0 %v1442_v6  ;;  %v204_v10 = vand.u32 127, %v203_v8  ;;  %v178_v45 = vld [vmem:[%s1729_s1 + $0x8] sm:$0xff]  ;;  %v181_v55 = vld [vmem:[%s1729_s1 + $0x20] sm:$0xff]  ;;  %vm582_vm7 = vcmask 7168   ;;  %v183_v8 = vld [vmem:[%s1729_s1 + $0x30] sm:$0xff]  ;;  %vm793_vm8 = vcmask 1039360   ;;  %s172_s13 = scalar_lea.vmem %s1731_s3, %s1360_s16 }
  0x10   : > { %v1485_v2 = vld [vmem:[%s167_s19 + $0x10] sm:$0xff]  ;;  %v1487_v3 = vld [vmem:[%s167_s19] sm:$0xff]  ;;  %v1491_v4 = vld [vmem:[%s167_s19 + $0x18] sm:$0xff]  ;;  %vm905_vm9 = vcmask 924672   ;;  %vm1017_vm10 = vcmask 916480   ;;  %vm1125_vm11 = vcmask 908288  }
  0x11   : > { %279 = vrot.lane.b32.xlu0 %v1485_v2, %s1434_s2  ;;  %v1495_v5 = vld [vmem:[%s167_s19 + $0x8] sm:$0xff]  ;;  %v205_v14 = vadd.s32 128, %v204_v10  ;;  %v210_v23 = vand.u32 15, %v204_v10 }
  0x12   : > { %v182_v62 = vld [vmem:[%s1729_s1 + $0x28] sm:$0xff] }
  0x13   : > { %273 = vrot.lane.b32.xlu1 %v1487_v3, %s1434_s2  ;;  %v217_v20 = vand.u32 15, %v205_v14  ;;  %vm1547_vm3 = vcmp.ne.s32.totalorder %v210_v23, 0  ;;  %vm1582_vm6 = vcmp.ne.s32.totalorder %v210_v23, 15  ;;  %v190_v29 = vld [vmem:[%s1729_s1 + $0x68] sm:$0xff] }
  0x15   : > { %281 = vrot.lane.b32.xlu0 %v1491_v4, %s1434_s2  ;;  %vm1542_vm2 = vcmp.ne.s32.totalorder %v217_v20, 0  ;;  %vm1569_vm5 = vcmp.ne.s32.totalorder %v217_v20, 15 }
  0x17   : > { %254 = vrot.lane.b32.xlu1 %v1485_v2, %s1435_s20 }
  0x19   : > { %275 = vrot.lane.b32.xlu0 %v1495_v5, %s1434_s2 }
  0x1b   : > { %1390 = vrot.lane.b32.xlu1 %v1433_v1, %s1435_s20 }
  0x1d   : > { %256 = vrot.lane.b32.xlu0 %v1491_v4, %s1435_s20 }
  0x1f   : > { %250 = vrot.lane.b32.xlu1 %v1495_v5, %s1435_s20 }
  0x21   : > { %248 = vrot.lane.b32.xlu0 %v1487_v3, %s1435_s20 }
  0x23   : > { %468 = vrot.lane.b32.xlu1 %v1491_v4, %s1436_s21 }
  0x25   : > { %466 = vrot.lane.b32.xlu0 %v1485_v2, %s1436_s21 }
  0x27   : > { %460 = vrot.lane.b32.xlu1 %v1487_v3, %s1436_s21 }
  0x29   : > { %1395 = vrot.lane.b32.xlu0 %v1433_v1, %s1436_s21 }
  0x2b   : > { %578 = vrot.lane.b32.xlu1 %v1485_v2, %s1437_s22 }
  0x2d   : > { %462 = vrot.lane.b32.xlu0 %v1495_v5, %s1436_s21 }
  0x2f   : > { %1400 = vrot.lane.b32.xlu1 %v1433_v1, %s1437_s22 }
  0x31   : > { %580 = vrot.lane.b32.xlu0 %v1491_v4, %s1437_s22 }
  0x33   : > { %574 = vrot.lane.b32.xlu1 %v1495_v5, %s1437_s22 }
  0x35   : > { %572 = vrot.lane.b32.xlu0 %v1487_v3, %s1437_s22 }
  0x37   : > { %1405 = vrot.lane.b32.xlu1 %v1433_v1, %s1438_s23 }
  0x39   : > { %789 = vrot.lane.b32.xlu0 %v1491_v4, %s1438_s23 }
  0x3b   : > { %783 = vrot.lane.b32.xlu1 %v1495_v5, %s1438_s23 }
  0x3d   : > { %787 = vrot.lane.b32.xlu0 %v1485_v2, %s1438_s23 }
  0x3f   : > { %1410 = vrot.lane.b32.xlu1 %v1433_v1, %s1439_s24 }
  0x41   : > { %901 = vrot.lane.b32.xlu0 %v1491_v4, %s1439_s24 }
  0x43   : > { %899 = vrot.lane.b32.xlu1 %v1485_v2, %s1439_s24 }
  0x45   : > { %781 = vrot.lane.b32.xlu0 %v1487_v3, %s1438_s23 }
  0x47   : > { %893 = vrot.lane.b32.xlu1 %v1487_v3, %s1439_s24 }
  0x49   : > { %895 = vrot.lane.b32.xlu0 %v1495_v5, %s1439_s24 }
  0x4b   : > { %1415 = vrot.lane.b32.xlu1 %v1433_v1, %s1440_s25 }
  0x4d   : > { %1013 = vrot.lane.b32.xlu0 %v1491_v4, %s1440_s25 }
  0x4f   : > { %1007 = vrot.lane.b32.xlu1 %v1495_v5, %s1440_s25 }
  0x51   : > { %1011 = vrot.lane.b32.xlu0 %v1485_v2, %s1440_s25 }
  0x53   : > { %1420 = vrot.lane.b32.xlu1 %v1433_v1, %s1441_s26 }
  0x55   : > { %1121 = vrot.lane.b32.xlu0 %v1491_v4, %s1441_s26 }
  0x57   : > { %1119 = vrot.lane.b32.xlu1 %v1485_v2, %s1441_s26 }
  0x59   : > { %1005 = vrot.lane.b32.xlu0 %v1487_v3, %s1440_s25 }
  0x5b   : > { %1113 = vrot.lane.b32.xlu1 %v1487_v3, %s1441_s26 }
  0x5d   : > { %1115 = vrot.lane.b32.xlu0 %v1495_v5, %s1441_s26 }
  0x61   : > { %1236 = vperm.xlu0 %1424, %v1357_v7  }
  0x81   : > { %v1386_v9 = vpop.permute.xlu1 %1385 }
  0x82   : > { %v1387_v13 = vunpack.i.l.bf16 %v1386_v9  ;;  %v1388_v18 = vunpack.i.h.bf16 %v1386_v9 }
  0x83   : > { %v280_v11 = vpop.permute.xlu0 %279 }
  0x84   : > { %v286_v19 = vsel %vm283_vm0, %v1387_v13, %v280_v11 }
  0x85   : > { %v274_v12 = vpop.permute.xlu1 %273 }
  0x86   : > { %v284_v28 = vsel %vm283_vm0, %v1388_v18, %v274_v12 }
  0x87   : > { %v282_v15 = vpop.permute.xlu0 %281 }
  0x88   : > { %v287_v17 = vsel %vm283_vm0, %v280_v11, %v282_v15  ;;  %v184_v11 = vld [vmem:[%s1729_s1 + $0x38] sm:$0xff] }
  0x89   : > { %v255_v16 = vpop.permute.xlu1 %254  ;;  %326 = vmatprep.subr.mxu0 %v287_v17  ;;  %1362 = vmatprep.subr.mxu1 %v287_v17 }
  0x8a   : > { %327 = vmatpush1.msra.mxu0 %v286_v19  ;;  %1364 = vmatpush1.msra.mxu1 %v286_v19 }
  0x8b   : > { %v276_v21 = vpop.permute.xlu0 %275 }
  0x8c   : > { %v285_v24 = vsel %vm283_vm0, %v274_v12, %v276_v21  ;;  %v186_v12 = vld [vmem:[%s1729_s1 + $0x48] sm:$0xff] }
  0x8d   : > { %v1391_v22 = vpop.permute.xlu1 %1390  ;;  %328 = vmatprep.subr.mxu0 %v285_v24  ;;  %1363 = vmatprep.subr.mxu1 %v285_v24 }
  0x8e   : > { %v1392_v27 = vunpack.i.l.bf16 %v1391_v22  ;;  %329 = vmatpush1.msra.mxu0 %v284_v28  ;;  %1365 = vmatpush1.msra.mxu1 %v284_v28  ;;  %v1393_v33 = vunpack.i.h.bf16 %v1391_v22 }
  0x8f   : > { %v257_v30 = vpop.permute.xlu0 %256  ;;  %1316 = vmatmul.mubr.msk.f32.vlgmr.msra.gmra.mxu1 %vm283_vm0, %v180_v25  ;;  %1315 = vmatmul.mubr.msk.f32.vlgmr.msra.gmra.mxu0 %vm283_vm0, %v179_v26  ;;  %v187_v25 = vld [vmem:[%s1729_s1 + $0x50] sm:$0xff] }
  0x90   : > { %v262_v34 = vsel %vm258_vm1, %v255_v16, %v257_v30  ;;  %445 = vmatprep.mubr.f32.mxu1 %v1433_v1  ;;  %553 = vmatprep.mubr.f32.mxu0 %v1433_v1  ;;  %v261_v35 = vsel %vm258_vm1, %v1392_v27, %v255_v16 }
  0x91   : > { %v251_v31 = vpop.permute.xlu1 %250  ;;  %1317 = vmatprep.subr.msk.mxu1 %vm1542_vm2, %v262_v34 }
  0x92   : > { %1318 = vmatpush1.msk.msra.mxu1 %vm1547_vm3, %v261_v35 }
  0x93   : > { %v249_v36 = vpop.permute.xlu0 %248 }
  0x94   : > { %v259_v38 = vsel %vm258_vm1, %v1393_v33, %v249_v36  ;;  %v260_v39 = vsel %vm258_vm1, %v249_v36, %v251_v31  ;;  %v188_v31 = vld [vmem:[%s1729_s1 + $0x58] sm:$0xff]  ;;  %v189_v36 = vld [vmem:[%s1729_s1 + $0x60] sm:$0xff] }
  0x95   : > { %v469_v37 = vpop.permute.xlu1 %468  ;;  %1319 = vmatprep.subr.msk.mxu1 %vm1542_vm2, %v260_v39 }
  0x96   : > { %1320 = vmatpush1.msk.msra.mxu1 %vm1547_vm3, %v259_v38 }
  0x97   : > { %v467_v42 = vpop.permute.xlu0 %466  ;;  %1321 = vmatmul.mubr.msk.f32.vlgmr.msra.gmra.mxu1 %vm283_vm0, %v177_v40 }
  0x98   : > { %v474_v44 = vsel %vm470_vm4, %v467_v42, %v469_v37  ;;  %451 = vmatprep.mubr.f32.mxu1 %v1433_v1 }
  0x99   : > { %v461_v43 = vpop.permute.xlu1 %460  ;;  %1323 = vmatprep.subr.msk.mxu0 %vm1569_vm5, %v474_v44 }
  0x9b   : > { %v1396_v46 = vpop.permute.xlu0 %1395  ;;  %1322 = vmatmul.mubr.msk.f32.gmra.mxu1 %vm283_vm0, %v178_v45 }
  0x9c   : > { %v1397_v48 = vunpack.i.l.bf16 %v1396_v46  ;;  %665 = vmatprep.mubr.f32.mxu1 %v1433_v1  ;;  %v1398_v50 = vunpack.i.h.bf16 %v1396_v46 }
  0x9d   : > { %v579_v47 = vpop.permute.xlu1 %578 }
  0x9e   : > { %v473_v51 = vsel %vm470_vm4, %v1397_v48, %v467_v42  ;;  %v471_v57 = vsel %vm470_vm4, %v1398_v50, %v461_v43 }
  0x9f   : > { %v463_v52 = vpop.permute.xlu0 %462  ;;  %1324 = vmatpush1.msk.msra.mxu0 %vm1582_vm6, %v473_v51 }
  0xa0   : > { %v472_v54 = vsel %vm470_vm4, %v461_v43, %v463_v52  ;;  %v191_v52 = vld [vmem:[%s1729_s1 + $0x70] sm:$0xff] }
  0xa1   : > { %v1401_v53 = vpop.permute.xlu1 %1400  ;;  %1325 = vmatprep.subr.msk.mxu0 %vm1569_vm5, %v472_v54 }
  0xa2   : > { %v1402_v56 = vunpack.i.l.bf16 %v1401_v53  ;;  %1326 = vmatpush1.msk.msra.mxu0 %vm1582_vm6, %v471_v57  ;;  %v1403_v60 = vunpack.i.h.bf16 %v1401_v53  ;;  %v192_v57 = vld [vmem:[%s1729_s1 + $0x78] sm:$0xff] }
  0xa3   : > { %v581_v58 = vpop.permute.xlu0 %580  ;;  %1327 = vmatmul.mubr.msk.f32.vlgmr.msra.gmra.mxu0 %vm283_vm0, %v181_v55  ;;  %716 = vmatprep.subr.mxu0 %v1491_v4 }
  0xa4   : > { %v586_v61 = vsel %vm582_vm7, %v579_v47, %v581_v58  ;;  %559 = vmatprep.mubr.f32.mxu0 %v1433_v1  ;;  %717 = vmatpush1.msra.mxu0 %v1485_v2  ;;  %v585_v63 = vsel %vm582_vm7, %v1402_v56, %v579_v47 }
  0xa5   : > { %v575_v59 = vpop.permute.xlu1 %574  ;;  %1329 = vmatprep.subr.msk.mxu1 %vm1542_vm2, %v586_v61  ;;  %718 = vmatprep.subr.mxu0 %v1495_v5  ;;  %v185_v5 = vld [vmem:[%s1729_s1 + $0x40] sm:$0xff]  ;;  %v194_v61 = vld [vmem:[%s1729_s1 + $0x88] sm:$0xff] }
  0xa6   : > { %1330 = vmatpush1.msk.msra.mxu1 %vm1547_vm3, %v585_v63  ;;  %719 = vmatpush1.msra.mxu0 %v1487_v3 }
  0xa7   : > { %v573_v0 = vpop.permute.xlu0 %572  ;;  %1328 = vmatmul.mubr.msk.f32.gmra.mxu0 %vm283_vm0, %v182_v62 }
  0xa8   : > { %v583_v6 = vsel %vm582_vm7, %v1403_v60, %v573_v0  ;;  %v584_v2 = vsel %vm582_vm7, %v573_v0, %v575_v59  ;;  %752 = vmatprep.mubr.f32.mxu0 %v1433_v1  ;;  %v193_v60 = vld [vmem:[%s1729_s1 + $0x80] sm:$0xff] }
  0xa9   : > { %v1406_v4 = vpop.permute.xlu1 %1405  ;;  %1331 = vmatprep.subr.msk.mxu1 %vm1542_vm2, %v584_v2 }
  0xaa   : > { %v1407_v7 = vunpack.i.l.bf16 %v1406_v4  ;;  %1332 = vmatpush1.msk.msra.mxu1 %vm1547_vm3, %v583_v6  ;;  %v1408_v13 = vunpack.i.h.bf16 %v1406_v4 }
  0xab   : > { %v790_v3 = vpop.permute.xlu0 %789  ;;  %1333 = vmatmul.mubr.msk.f32.vlgmr.msra.gmra.mxu1 %vm283_vm0, %v183_v8  ;;  %1335 = vmatmul.mubr.msk.f32.vlgmr.msra.gmra.mxu0 %vm283_vm0, %v185_v5 }
  0xac   : > { %v797_v10 = vsel %vm793_vm8, %v790_v3, %v1407_v7  ;;  %671 = vmatprep.mubr.f32.mxu1 %v1433_v1  ;;  %758 = vmatprep.mubr.f32.mxu0 %v1433_v1 }
  0xad   : > { %v784_v9 = vpop.permute.xlu1 %783  ;;  %1337 = vmatprep.subr.msk.mxu1 %vm1569_vm5, %v797_v10 }
  0xae   : > { %v795_v18 = vsel %vm793_vm8, %v784_v9, %v1408_v13 }
  0xaf   : > { %v788_v14 = vpop.permute.xlu0 %787  ;;  %1334 = vmatmul.mubr.msk.f32.gmra.mxu1 %vm283_vm0, %v184_v11  ;;  %1336 = vmatmul.mubr.msk.f32.gmra.mxu0 %vm283_vm0, %v186_v12 }
  0xb0   : > { %v796_v16 = vsel %vm793_vm8, %v788_v14, %v790_v3  ;;  %876 = vmatprep.mubr.f32.mxu1 %v1433_v1  ;;  %988 = vmatprep.mubr.f32.mxu0 %v1433_v1 }
  0xb1   : > { %v1411_v15 = vpop.permute.xlu1 %1410  ;;  %1338 = vmatpush1.msk.msra.mxu1 %vm1582_vm6, %v796_v16 }
  0xb2   : > { %v1412_v17 = vunpack.i.l.bf16 %v1411_v15  ;;  %1339 = vmatprep.subr.msk.mxu1 %vm1569_vm5, %v795_v18  ;;  %v1413_v27 = vunpack.i.h.bf16 %v1411_v15 }
  0xb3   : > { %v902_v19 = vpop.permute.xlu0 %901 }
  0xb4   : > { %v909_v21 = vsel %vm905_vm9, %v902_v19, %v1412_v17 }
  0xb5   : > { %v900_v20 = vpop.permute.xlu1 %899  ;;  %1343 = vmatprep.subr.msk.mxu0 %vm1542_vm2, %v909_v21 }
  0xb6   : > { %v908_v22 = vsel %vm905_vm9, %v900_v20, %v902_v19 }
  0xb7   : > { %1344 = vmatpush1.msk.msra.mxu0 %vm1547_vm3, %v908_v22  ;;  %v782_v23 = vpop.permute.xlu0 %781 }
  0xb8   : > { %v794_v26 = vsel %vm793_vm8, %v782_v23, %v784_v9 }
  0xb9   : > { %v894_v24 = vpop.permute.xlu1 %893  ;;  %1340 = vmatpush1.msk.msra.mxu1 %vm1582_vm6, %v794_v26 }
  0xba   : > { %1341 = vmatmul.mubr.msk.f32.vlgmr.msra.gmra.mxu1 %vm283_vm0, %v187_v25 }
  0xbb   : > { %v896_v28 = vpop.permute.xlu0 %895  ;;  %882 = vmatprep.mubr.f32.mxu1 %v1433_v1 }
  0xbc   : > { %v906_v33 = vsel %vm905_vm9, %v894_v24, %v896_v28  ;;  %v907_v34 = vsel %vm905_vm9, %v896_v28, %v1413_v27 }
  0xbd   : > { %v1416_v30 = vpop.permute.xlu1 %1415  ;;  %1345 = vmatprep.subr.msk.mxu0 %vm1542_vm2, %v907_v34 }
  0xbe   : > { %v1417_v35 = vunpack.i.l.bf16 %v1416_v30  ;;  %1342 = vmatmul.mubr.msk.f32.gmra.mxu1 %vm283_vm0, %v188_v31  ;;  %1346 = vmatpush1.msk.msra.mxu0 %vm1547_vm3, %v906_v33  ;;  %v1418_v40 = vunpack.i.h.bf16 %v1416_v30 }
  0xbf   : > { %v1014_v37 = vpop.permute.xlu0 %1013  ;;  %1347 = vmatmul.mubr.msk.f32.vlgmr.msra.gmra.mxu0 %vm283_vm0, %v189_v36  ;;  %1096 = vmatprep.mubr.f32.mxu1 %v1433_v1 }
  0xc0   : > { %v1021_v39 = vsel %vm1017_vm10, %v1014_v37, %v1417_v35  ;;  %994 = vmatprep.mubr.f32.mxu0 %v1433_v1 }
  0xc1   : > { %v1008_v38 = vpop.permute.xlu1 %1007  ;;  %1060 = vmatprep.subr.mxu1 %v1021_v39 }
  0xc2   : > { %v1019_v45 = vsel %vm1017_vm10, %v1008_v38, %v1418_v40 }
  0xc3   : > { %v1012_v42 = vpop.permute.xlu0 %1011  ;;  %1348 = vmatmul.mubr.msk.f32.gmra.mxu0 %vm283_vm0, %v190_v29 }
  0xc4   : > { %v1020_v32 = vsel %vm1017_vm10, %v1012_v42, %v1014_v37  ;;  %1208 = vmatprep.mubr.f32.mxu0 %v1433_v1 }
  0xc5   : > { %v1421_v43 = vpop.permute.xlu1 %1420  ;;  %1061 = vmatpush1.msra.mxu1 %v1020_v32 }
  0xc6   : > { %v1422_v44 = vunpack.i.l.bf16 %v1421_v43  ;;  %1062 = vmatprep.subr.mxu1 %v1019_v45  ;;  %v1423_v55 = vunpack.i.h.bf16 %v1421_v43 }
  0xc7   : > { %v1122_v46 = vpop.permute.xlu0 %1121 }
  0xc8   : > { %v1129_v48 = vsel %vm1125_vm11, %v1122_v46, %v1422_v44 }
  0xc9   : > { %v1120_v47 = vpop.permute.xlu1 %1119  ;;  %1351 = vmatprep.subr.msk.mxu0 %vm1569_vm5, %v1129_v48 }
  0xca   : > { %v1128_v50 = vsel %vm1125_vm11, %v1120_v47, %v1122_v46 }
  0xcb   : > { %1352 = vmatpush1.msk.msra.mxu0 %vm1582_vm6, %v1128_v50  ;;  %v1006_v51 = vpop.permute.xlu0 %1005 }
  0xcc   : > { %v1018_v53 = vsel %vm1017_vm10, %v1006_v51, %v1008_v38 }
  0xcd   : > { %1063 = vmatpush1.msra.mxu1 %v1018_v53  ;;  %v1114_v54 = vpop.permute.xlu1 %1113 }
  0xce   : > { %1349 = vmatmul.mubr.msk.f32.vlgmr.msra.gmra.mxu1 %vm283_vm0, %v191_v52 }
  0xcf   : > { %v1116_v56 = vpop.permute.xlu0 %1115  ;;  %1102 = vmatprep.mubr.f32.mxu1 %v1433_v1 }
  0xd0   : > { %v1127_v58 = vsel %vm1125_vm11, %v1116_v56, %v1423_v55  ;;  %v1126_v59 = vsel %vm1125_vm11, %v1114_v54, %v1116_v56 }
  0xd1   : > { %1353 = vmatprep.subr.msk.mxu0 %vm1569_vm5, %v1127_v58 }
  0xd2   : > { %1350 = vmatmul.mubr.msk.f32.gmra.mxu1 %vm283_vm0, %v192_v57  ;;  %1354 = vmatpush1.msk.msra.mxu0 %vm1582_vm6, %v1126_v59 }
  0xd3   : > { %1355 = vmatmul.mubr.msk.f32.vlgmr.msra.gmra.mxu0 %vm283_vm0, %v193_v60 }
  0xd4   : > { %1214 = vmatprep.mubr.f32.mxu0 %v1433_v1 }
  0xd7   : > { %1356 = vmatmul.mubr.msk.f32.gmra.mxu0 %vm283_vm0, %v194_v61 }
  0xdc   : > { %v1237_v53 = vpop.permute.xlu0 %1236 }
 0x14f   : > { %v370_v62 = vpop.f32.mrf.mxu1  ;;  %v364_v0 = vpop.f32.mrf.mxu0 }
 0x151   : > { %v372_v63 = vpop.f32.mrf.mxu1  ;;  %v366_v4 = vpop.f32.mrf.mxu0 }
 0x157   : > { %v447_v41 = vpop.f32.mrf.mxu1 }
 0x158   : > { %v448_v13 = vadd.f32 %v447_v41, %v364_v0 }
 0x159   : > { %v449_v6 = vpop.f32.mrf.mxu1 }
 0x15a   : > { %v450_v15 = vadd.f32 %v449_v6, %v366_v4 }
 0x15b   : > { %v453_v7 = vpop.f32.mrf.mxu1 }
 0x15c   : > { %v454_v19 = vadd.f32 %v453_v7, %v370_v62 }
 0x15d   : > { %v455_v8 = vpop.f32.mrf.mxu1 }
 0x15e   : > { %v456_v24 = vadd.f32 %v455_v8, %v372_v63 }
 0x163   : > { %v555_v2 = vpop.f32.mrf.mxu0 }
 0x164   : > { %v566_v17 = vadd.f32 %v555_v2, %v448_v13 }
 0x165   : > { %v557_v49 = vpop.f32.mrf.mxu0 }
 0x166   : > { %v567_v20 = vadd.f32 %v557_v49, %v450_v15 }
 0x167   : > { %v561_v5 = vpop.f32.mrf.mxu0 }
 0x168   : > { %v568_v26 = vadd.f32 %v561_v5, %v454_v19 }
 0x169   : > { %v563_v9 = vpop.f32.mrf.mxu0 }
 0x16a   : > { %v569_v31 = vadd.f32 %v563_v9, %v456_v24 }
 0x16b   : > { %v667_v3 = vpop.f32.mrf.mxu1  ;;  %v754_v10 = vpop.f32.mrf.mxu0 }
 0x16c   : > { %v678_v22 = vadd.f32 %v667_v3, %v566_v17 }
 0x16d   : > { %v669_v1 = vpop.f32.mrf.mxu1  ;;  %v756_v12 = vpop.f32.mrf.mxu0 }
 0x16e   : > { %v679_v27 = vadd.f32 %v669_v1, %v567_v20  ;;  %v765_v28 = vadd.f32 %v754_v10, %v678_v22 }
 0x16f   : > { %v673_v11 = vpop.f32.mrf.mxu1  ;;  %v760_v16 = vpop.f32.mrf.mxu0 }
 0x170   : > { %v680_v34 = vadd.f32 %v673_v11, %v568_v26  ;;  %v766_v35 = vadd.f32 %v756_v12, %v679_v27 }
 0x171   : > { %v675_v14 = vpop.f32.mrf.mxu1  ;;  %v762_v21 = vpop.f32.mrf.mxu0 }
 0x172   : > { %v681_v38 = vadd.f32 %v675_v14, %v569_v31  ;;  %v767_v29 = vadd.f32 %v760_v16, %v680_v34 }
 0x174   : > { %v768_v44 = vadd.f32 %v762_v21, %v681_v38 }
 0x17a   : > { %v878_v18 = vpop.f32.mrf.mxu1 }
 0x17b   : > { %v889_v36 = vadd.f32 %v878_v18, %v765_v28 }
 0x17c   : > { %v880_v23 = vpop.f32.mrf.mxu1 }
 0x17d   : > { %v890_v40 = vadd.f32 %v880_v23, %v766_v35 }
 0x17e   : > { %v884_v30 = vpop.f32.mrf.mxu1 }
 0x17f   : > { %v990_v25 = vpop.f32.mrf.mxu0  ;;  %v891_v46 = vadd.f32 %v884_v30, %v767_v29 }
 0x180   : > { %v886_v37 = vpop.f32.mrf.mxu1  ;;  %v1001_v43 = vadd.f32 %v990_v25, %v889_v36 }
 0x181   : > { %v992_v33 = vpop.f32.mrf.mxu0  ;;  %v892_v51 = vadd.f32 %v886_v37, %v768_v44 }
 0x182   : > { %v1002_v47 = vadd.f32 %v992_v33, %v890_v40 }
 0x183   : > { %v996_v39 = vpop.f32.mrf.mxu0 }
 0x184   : > { %v1003_v54 = vadd.f32 %v996_v39, %v891_v46 }
 0x185   : > { %v998_v45 = vpop.f32.mrf.mxu0 }
 0x186   : > { %v1004_v58 = vadd.f32 %v998_v45, %v892_v51 }
 0x18e   : > { %v1098_v42 = vpop.f32.mrf.mxu1 }
 0x18f   : > { %v1109_v48 = vadd.f32 %v1098_v42, %v1001_v43 }
 0x190   : > { %v1100_v32 = vpop.f32.mrf.mxu1 }
 0x191   : > { %v1110_v55 = vadd.f32 %v1100_v32, %v1002_v47 }
 0x192   : > { %v1104_v50 = vpop.f32.mrf.mxu1 }
 0x193   : > { %v1210_v52 = vpop.f32.mrf.mxu0  ;;  %v1111_v60 = vadd.f32 %v1104_v50, %v1003_v54 }
 0x194   : > { %v1221_v56 = vadd.f32 %v1210_v52, %v1109_v48  ;;  %v1106_v57 = vpop.f32.mrf.mxu1 }
 0x195   : > { %v1212_v59 = vpop.f32.mrf.mxu0  ;;  %v1112_v63 = vadd.f32 %v1106_v57, %v1004_v58 }
 0x196   : > { %vm1226_vm12 = vcmp.gt.f32.partialorder %v1221_v56, 0.0  ;;  %v1239_v61 = vmul.f32 %v1237_v53, %v1221_v56  ;;  %v1222_v62 = vadd.f32 %v1212_v59, %v1110_v55 }
 0x197   : > { %v1216_v0 = vpop.f32.mrf.mxu0 }
 0x198   : > { %v1243_v41 = vsel %vm1226_vm12, %v1221_v56, %v1239_v61  ;;  %vm1227_vm13 = vcmp.gt.f32.partialorder %v1222_v62, 0.0  ;;  %v1240_v4 = vmul.f32 %v1237_v53, %v1222_v62  ;;  %v1223_v6 = vadd.f32 %v1216_v0, %v1111_v60 }
 0x199   : > { %1247 = vst [vmem:[%s172_s13] sm:$0xff] %v1243_v41  ;;  %v1218_v2 = vpop.f32.mrf.mxu0 }
 0x19a   : > { %v1244_v7 = vsel %vm1227_vm13, %v1222_v62, %v1240_v4  ;;  %vm1228_vm14 = vcmp.gt.f32.partialorder %v1223_v6, 0.0  ;;  %v1241_v49 = vmul.f32 %v1237_v53, %v1223_v6  ;;  %v1224_v8 = vadd.f32 %v1218_v2, %v1112_v63 }
 0x19b   : > { %1248 = vst [vmem:[%s172_s13 + $0x8] sm:$0xff] %v1244_v7 }
 0x19c   : > { %v1245_v5 = vsel %vm1228_vm14, %v1223_v6, %v1241_v49  ;;  %vm1229_vm15 = vcmp.gt.f32.partialorder %v1224_v8, 0.0  ;;  %v1242_v3 = vmul.f32 %v1237_v53, %v1224_v8 }
 0x19d   : > { %1249 = vst [vmem:[%s172_s13 + $0x10] sm:$0xff] %v1245_v5 }
 0x19e   : > { %v1246_v9 = vsel %vm1229_vm15, %v1224_v8, %v1242_v3 }
 0x19f   : > { %1250 = vst [vmem:[%s172_s13 + $0x18] sm:$0xff] %v1246_v9 }
 0x1a0 PF: > { %s15_s14 = sadd.s32 1, %s1431_s14  }
 0x1a1   : > { %p12_p4 = scmp.ge.s32.totalorder %s15_s14, 4  }
 0x1a3   :  { %14 = sbr.rel (!%p12_p4) target bundleno = 3 (0x3), region = 62 }

// kernel: orsnet_forward.10
= control target key start
LH: loop header
LB: loop body
LE: loop exit
PB: predicated region body
PF: predicated region fallthrough
CT: control target
= control target key end

     0   :  { %s1639_s18 = smov 0   ;;  %s1973_s0 = inlined_call_operand.vmem [shape: f32[2,16,256], index: 0, kind: input, shape index: {}]   ;;  %s1974_s1 = inlined_call_operand.vmem [shape: f32[2,16,256], index: 1, kind: input, shape index: {}]   ;;  %s1975_s2 = inlined_call_operand.vmem [shape: f32[2,16,1], index: 2, kind: input, shape index: {}]   ;;  %s1976_s3 = inlined_call_operand.vmem [shape: f32[2,16,256], index: 3, kind: input, shape index: {}]   ;;  %s1977_s4 = inlined_call_operand.vmem [shape: f32[9,16,16], index: 4, kind: input, shape index: {}]   ;;  %s1978_s5 = inlined_call_operand.vmem [shape: f32[2,16,256], index: 5, kind: output, shape index: {}]  }
   0x1 LB: > { %s1464_s19 = sadd.s32 4294967295, %s1597_s18   ;;  %p1468_p0 = scmp.ge.s32.totalorder %s1597_s18, 1  ;;  %s1597_s18 = sphi %s1639_s18, %s15_s18  }
   0x2   : > { %p217_p1 = scmp.lt.s32.totalorder %s1597_s18, 3 }
   0x4   : > { %p218_p2 = pnand %p1468_p0, %p217_p1 }
   0x5   : > { %p260_p3 = scmp.lt.s32.totalorder (!%p218_p2), %s1464_s19, 1  ;;  %s1601_s20 = smov (!%p218_p2), 17  }
   0x6   : > { %221 = sbr.rel (%p218_p2) target bundleno = 533 (0x215), region = 40  ;;  %s1602_s25 = smov (!%p218_p2), 1  }
   0x7   : > { %s1603_s26 = smov (!%p218_p2), 127   ;;  %s1604_s27 = smov (!%p218_p2), 113  }
   0x8   : > { %s1605_s28 = smov (!%p218_p2), 16   ;;  %s1606_s29 = smov (!%p218_p2), 112  }
   0x9   : > { %s1607_s30 = smov (!%p218_p2), 15   ;;  %s1608_s6 = smov (!%p218_p2), 111  }
   0xb   : > { %v1599_v0 = vmov 0   ;;  %s1988_s19 = smov (!%p260_p3, %s1464_s19), 1  ;;  %v1600_v1 = vmov 0.0   ;;  %v339_v29 = vlaneseq  ;;  %vm419_vm0 = vcmask 130048   ;;  %v316_v46 = vld [vmem:[%s1977_s4 + $0x18] sm:$0xff]  ;;  %v315_v47 = vld [vmem:[%s1977_s4 + $0x10] sm:$0xff] }
   0xc   : > { %1550 = vset.pattern.permute.xlu0 %v1599_v0  ;;  %504 = vmatprep.mubr.f32.mxu1 %v1600_v1  ;;  %s1525_s21 = sshll.u32 %s1988_s19, 4  ;;  %s1668_s7 = sshll.u32 %s1988_s19, 5  ;;  %vm394_vm1 = vcmask 138240   ;;  %v313_v59 = vld [vmem:[%s1977_s4] sm:$0xff]  ;;  %vm606_vm4 = vcmask 121856   ;;  %vm718_vm7 = vcmask 7168  }
   0xd   : > { %498 = vmatprep.mubr.f32.mxu0 %v1600_v1  ;;  %1557 = vrot.lane.b32.xlu1 %v1600_v1, %s1601_s20  ;;  %s274_s24 = scalar_lea.vmem %s1975_s2, %s1525_s21  ;;  %s264_s10 = scalar_lea.vmem %s1973_s0, %s1668_s7  ;;  %v340_v31 = vand.u32 127, %v339_v29  ;;  %vm929_vm8 = vcmask 1039360   ;;  %vm1041_vm9 = vcmask 924672   ;;  %vm1153_vm10 = vcmask 916480   ;;  %v326_v49 = vld [vmem:[%s1977_s4 + $0x68] sm:$0xff] }
   0xe   : > { %v290_v2 = vld [vmem:[%s274_s24 + $0x8] sm:$0xff]  ;;  %v289_v3 = vld [vmem:[%s274_s24] sm:$0xff]  ;;  %s269_s13 = scalar_lea.vmem %s1974_s1, %s1668_s7  ;;  %v287_v4 = vld [vmem:[%s264_s10 + $0x10] sm:$0xff]  ;;  %vm1261_vm11 = vcmask 908288   ;;  %s284_s9 = scalar_lea.vmem %s1978_s5, %s1668_s7 }
   0xf   : > { %298 = vperm.xlu0 %1550, %v290_v2   ;;  %v288_v6 = vld [vmem:[%s264_s10 + $0x18] sm:$0xff]  ;;  %v307_v7 = vld [vmem:[%s269_s13 + $0x10] sm:$0xff]  ;;  %v286_v9 = vld [vmem:[%s264_s10 + $0x8] sm:$0xff]  ;;  %v341_v33 = vadd.s32 128, %v340_v31  ;;  %v346_v43 = vand.u32 15, %v340_v31 }
  0x10   : > { %v308_v12 = vld [vmem:[%s269_s13 + $0x18] sm:$0xff]  ;;  %v285_v14 = vld [vmem:[%s264_s10] sm:$0xff]  ;;  %v306_v15 = vld [vmem:[%s269_s13 + $0x8] sm:$0xff] }
  0x11   : > { %1567 = vrot.lane.b32.xlu1 %v1600_v1, %s1602_s25  ;;  %v305_v20 = vld [vmem:[%s269_s13] sm:$0xff]  ;;  %v353_v40 = vand.u32 15, %v341_v33  ;;  %vm1777_vm3 = vcmp.ne.s32.totalorder %v346_v43, 0  ;;  %vm1804_vm6 = vcmp.ne.s32.totalorder %v346_v43, 15  ;;  %v323_v43 = vld [vmem:[%s1977_s4 + $0x50] sm:$0xff] }
  0x13   : > { %293 = vperm.xlu0 %1550, %v289_v3   ;;  %vm1772_vm2 = vcmp.ne.s32.totalorder %v353_v40, 0  ;;  %vm1799_vm5 = vcmp.ne.s32.totalorder %v353_v40, 15 }
  0x15   : > { %1572 = vrot.lane.b32.xlu1 %v1600_v1, %s1603_s26 }
  0x17   : > { %1552 = vrot.lane.b32.xlu0 %v1600_v1, %s1605_s28 }
  0x19   : > { %1577 = vrot.lane.b32.xlu1 %v1600_v1, %s1604_s27 }
  0x1b   : > { %1562 = vrot.lane.b32.xlu0 %v1600_v1, %s1607_s30 }
  0x1d   : > { %1582 = vrot.lane.b32.xlu1 %v1600_v1, %s1606_s29 }
  0x21   : > { %1587 = vrot.lane.b32.xlu1 %v1600_v1, %s1608_s6 }
  0x7f   : > { %v1558_v22 = vpop.permute.xlu1 %1557 }
  0x80   : > { %v1559_v48 = vunpack.i.l.bf16 %v1558_v22  ;;  %v1560_v55 = vunpack.i.h.bf16 %v1558_v22 }
  0x83   : > { %v1750_v23 = vpop.permute.xlu1 %1567 }
  0x87   : > { %v1752_v24 = vpop.permute.xlu1 %1572 }
  0x8a   : > { %v299_v5 = vpop.permute.xlu0 %298 }
  0x8b   : > { %v303_v8 = vmul.f32 %v299_v5, %v287_v4  ;;  %v304_v10 = vmul.f32 %v299_v5, %v288_v6  ;;  %v1754_v25 = vpop.permute.xlu1 %1577  ;;  %v314_v4 = vld [vmem:[%s1977_s4 + $0x8] sm:$0xff] }
  0x8d   : > { %v1678_v11 = vadd.f32 %v307_v7, %v303_v8  ;;  %v1682_v17 = vadd.f32 %v308_v12, %v304_v10  ;;  %v317_v12 = vld [vmem:[%s1977_s4 + $0x20] sm:$0xff] }
  0x8e   : > { %v294_v13 = vpop.permute.xlu0 %293 }
  0x8f   : > { %v302_v16 = vmul.f32 %v294_v13, %v286_v9  ;;  %415 = vrot.lane.b32.xlu1 %v1678_v11, %s1605_s28  ;;  %v301_v18 = vmul.f32 %v294_v13, %v285_v14  ;;  %v1756_v26 = vpop.permute.xlu1 %1582  ;;  %v1569_v13 = vunpack.i.l.bf16 %v1750_v23 }
  0x91   : > { %v1684_v19 = vadd.f32 %v306_v15, %v302_v16  ;;  %v1690_v21 = vadd.f32 %v305_v20, %v301_v18  ;;  %v318_v20 = vld [vmem:[%s1977_s4 + $0x28] sm:$0xff] }
  0x92   : > { %v1553_v27 = vpop.permute.xlu0 %1552 }
  0x93   : > { %417 = vrot.lane.b32.xlu1 %v1682_v17, %s1605_s28  ;;  %411 = vrot.lane.b32.xlu0 %v1684_v19, %s1605_s28  ;;  %v1758_v28 = vpop.permute.xlu1 %1587  ;;  %v1554_v34 = vunpack.i.l.bf16 %v1553_v27  ;;  %v1555_v39 = vunpack.i.h.bf16 %v1553_v27  ;;  %v1574_v27 = vunpack.i.l.bf16 %v1752_v24 }
  0x96   : > { %v1760_v30 = vpop.permute.xlu0 %1562 }
  0x97   : > { %392 = vrot.lane.b32.xlu0 %v1682_v17, %s1601_s20  ;;  %409 = vrot.lane.b32.xlu1 %v1690_v21, %s1605_s28  ;;  %v1564_v62 = vunpack.i.l.bf16 %v1760_v30  ;;  %v1565_v6 = vunpack.i.h.bf16 %v1760_v30 }
  0x9b   : > { %384 = vrot.lane.b32.xlu0 %v1690_v21, %s1601_s20  ;;  %390 = vrot.lane.b32.xlu1 %v1678_v11, %s1601_s20 }
  0x9f   : > { %602 = vrot.lane.b32.xlu0 %v1678_v11, %s1607_s30  ;;  %386 = vrot.lane.b32.xlu1 %v1684_v19, %s1601_s20 }
  0xa3   : > { %598 = vrot.lane.b32.xlu0 %v1684_v19, %s1607_s30  ;;  %604 = vrot.lane.b32.xlu1 %v1682_v17, %s1607_s30 }
  0xa7   : > { %716 = vrot.lane.b32.xlu0 %v1682_v17, %s1602_s25  ;;  %596 = vrot.lane.b32.xlu1 %v1690_v21, %s1607_s30  ;;  %s279_s30 = scalar_lea.vmem %s1976_s3, %s1668_s7 }
  0xab   : > { %708 = vrot.lane.b32.xlu0 %v1690_v21, %s1602_s25  ;;  %714 = vrot.lane.b32.xlu1 %v1678_v11, %s1602_s25 }
  0xaf   : > { %925 = vrot.lane.b32.xlu0 %v1682_v17, %s1603_s26  ;;  %710 = vrot.lane.b32.xlu1 %v1684_v19, %s1602_s25 }
  0xb3   : > { %923 = vrot.lane.b32.xlu0 %v1678_v11, %s1603_s26  ;;  %919 = vrot.lane.b32.xlu1 %v1684_v19, %s1603_s26 }
  0xb7   : > { %1037 = vrot.lane.b32.xlu0 %v1682_v17, %s1604_s27  ;;  %1035 = vrot.lane.b32.xlu1 %v1678_v11, %s1604_s27 }
  0xbb   : > { %917 = vrot.lane.b32.xlu0 %v1690_v21, %s1603_s26  ;;  %1029 = vrot.lane.b32.xlu1 %v1690_v21, %s1604_s27 }
  0xbf   : > { %1031 = vrot.lane.b32.xlu0 %v1684_v19, %s1604_s27  ;;  %1143 = vrot.lane.b32.xlu1 %v1684_v19, %s1606_s29 }
  0xc3   : > { %1149 = vrot.lane.b32.xlu0 %v1682_v17, %s1606_s29  ;;  %1255 = vrot.lane.b32.xlu1 %v1678_v11, %s1608_s6 }
  0xc7   : > { %1147 = vrot.lane.b32.xlu0 %v1678_v11, %s1606_s29  ;;  %1249 = vrot.lane.b32.xlu1 %v1690_v21, %s1608_s6 }
  0xcb   : > { %1257 = vrot.lane.b32.xlu0 %v1682_v17, %s1608_s6 }
  0xcf   : > { %1141 = vrot.lane.b32.xlu0 %v1690_v21, %s1606_s29 }
  0xd3   : > { %1251 = vrot.lane.b32.xlu0 %v1684_v19, %s1608_s6 }
 0x101   : > { %v416_v32 = vpop.permute.xlu1 %415 }
 0x102   : > { %v422_v38 = vsel %vm419_vm0, %v1554_v34, %v416_v32 }
 0x105   : > { %v418_v35 = vpop.permute.xlu1 %417  ;;  %v412_v36 = vpop.permute.xlu0 %411 }
 0x106   : > { %v423_v37 = vsel %vm419_vm0, %v416_v32, %v418_v35 }
 0x107   : > { %462 = vmatprep.subr.mxu0 %v423_v37  ;;  %1528 = vmatprep.subr.mxu1 %v423_v37  ;;  %v1579_v37 = vunpack.i.l.bf16 %v1754_v25 }
 0x108   : > { %463 = vmatpush1.msra.mxu0 %v422_v38  ;;  %1530 = vmatpush1.msra.mxu1 %v422_v38 }
 0x109   : > { %v393_v41 = vpop.permute.xlu0 %392  ;;  %v410_v42 = vpop.permute.xlu1 %409 }
 0x10a   : > { %v421_v44 = vsel %vm419_vm0, %v410_v42, %v412_v36  ;;  %v420_v45 = vsel %vm419_vm0, %v1555_v39, %v410_v42  ;;  %v322_v36 = vld [vmem:[%s1977_s4 + $0x48] sm:$0xff] }
 0x10b   : > { %464 = vmatprep.subr.mxu0 %v421_v44  ;;  %1529 = vmatprep.subr.mxu1 %v421_v44 }
 0x10c   : > { %465 = vmatpush1.msra.mxu0 %v420_v45  ;;  %1531 = vmatpush1.msra.mxu1 %v420_v45  ;;  %v1580_v45 = vunpack.i.h.bf16 %v1754_v25  ;;  %v1584_v25 = vunpack.i.l.bf16 %v1756_v26 }
 0x10d   : > { %v385_v50 = vpop.permute.xlu0 %384  ;;  %v391_v51 = vpop.permute.xlu1 %390  ;;  %1480 = vmatmul.mubr.msk.f32.vlgmr.msra.gmra.mxu1 %vm419_vm0, %v316_v46  ;;  %1479 = vmatmul.mubr.msk.f32.vlgmr.msra.gmra.mxu0 %vm419_vm0, %v315_v47 }
 0x10e   : > { %v397_v53 = vsel %vm394_vm1, %v1559_v48, %v391_v51  ;;  %v398_v54 = vsel %vm394_vm1, %v391_v51, %v393_v41  ;;  %689 = vmatprep.mubr.f32.mxu0 %v1600_v1  ;;  %581 = vmatprep.mubr.f32.mxu1 %v1600_v1  ;;  %v395_v60 = vsel %vm394_vm1, %v1560_v55, %v385_v50  ;;  %v324_v48 = vld [vmem:[%s1977_s4 + $0x58] sm:$0xff] }
 0x10f   : > { %1481 = vmatprep.subr.msk.mxu1 %vm1772_vm2, %v398_v54 }
 0x110   : > { %1482 = vmatpush1.msk.msra.mxu1 %vm1777_vm3, %v397_v53  ;;  %v325_v53 = vld [vmem:[%s1977_s4 + $0x60] sm:$0xff] }
 0x111   : > { %v603_v56 = vpop.permute.xlu0 %602  ;;  %v387_v57 = vpop.permute.xlu1 %386 }
 0x112   : > { %v396_v58 = vsel %vm394_vm1, %v385_v50, %v387_v57  ;;  %v609_v5 = vsel %vm606_vm4, %v1564_v62, %v603_v56  ;;  %v1585_v57 = vunpack.i.h.bf16 %v1756_v26 }
 0x113   : > { %1483 = vmatprep.subr.msk.mxu1 %vm1772_vm2, %v396_v58 }
 0x114   : > { %1484 = vmatpush1.msk.msra.mxu1 %vm1777_vm3, %v395_v60  ;;  %v1589_v60 = vunpack.i.l.bf16 %v1758_v28 }
 0x115   : > { %v599_v63 = vpop.permute.xlu0 %598  ;;  %v605_v0 = vpop.permute.xlu1 %604  ;;  %1485 = vmatmul.mubr.msk.f32.vlgmr.msra.gmra.mxu1 %vm419_vm0, %v313_v59 }
 0x116   : > { %v610_v3 = vsel %vm606_vm4, %v603_v56, %v605_v0  ;;  %587 = vmatprep.mubr.f32.mxu1 %v1600_v1 }
 0x117   : > { %1487 = vmatprep.subr.msk.mxu0 %vm1799_vm5, %v610_v3 }
 0x118   : > { %1488 = vmatpush1.msk.msra.mxu0 %vm1804_vm6, %v609_v5 }
 0x119   : > { %v717_v7 = vpop.permute.xlu0 %716  ;;  %v597_v8 = vpop.permute.xlu1 %596  ;;  %1486 = vmatmul.mubr.msk.f32.gmra.mxu1 %vm419_vm0, %v314_v4  ;;  %v327_v4 = vld [vmem:[%s1977_s4 + $0x70] sm:$0xff] }
 0x11a   : > { %v607_v9 = vsel %vm606_vm4, %v1565_v6, %v597_v8  ;;  %v608_v10 = vsel %vm606_vm4, %v597_v8, %v599_v63  ;;  %801 = vmatprep.mubr.f32.mxu1 %v1600_v1  ;;  %v1590_v6 = vunpack.i.h.bf16 %v1758_v28  ;;  %v330_v28 = vld [vmem:[%s1977_s4 + $0x88] sm:$0xff] }
 0x11b   : > { %1489 = vmatprep.subr.msk.mxu0 %vm1799_vm5, %v608_v10 }
 0x11c   : > { %1490 = vmatpush1.msk.msra.mxu0 %vm1804_vm6, %v607_v9  ;;  %v328_v9 = vld [vmem:[%s1977_s4 + $0x78] sm:$0xff] }
 0x11d   : > { %v709_v14 = vpop.permute.xlu0 %708  ;;  %852 = vmatprep.subr.mxu0 %v1682_v17  ;;  %v715_v15 = vpop.permute.xlu1 %714  ;;  %1491 = vmatmul.mubr.msk.f32.vlgmr.msra.gmra.mxu0 %vm419_vm0, %v317_v12  ;;  %v1570_v17 = vunpack.i.h.bf16 %v1750_v23  ;;  %v1575_v23 = vunpack.i.h.bf16 %v1752_v24  ;;  %v320_v24 = vld [vmem:[%s1977_s4 + $0x38] sm:$0xff] }
 0x11e   : > { %v721_v16 = vsel %vm718_vm7, %v1569_v13, %v715_v15  ;;  %v722_v18 = vsel %vm718_vm7, %v715_v15, %v717_v7  ;;  %853 = vmatpush1.msra.mxu0 %v1678_v11  ;;  %695 = vmatprep.mubr.f32.mxu0 %v1600_v1  ;;  %v329_v13 = vld [vmem:[%s1977_s4 + $0x80] sm:$0xff] }
 0x11f   : > { %1493 = vmatprep.subr.msk.mxu1 %vm1772_vm2, %v722_v18  ;;  %854 = vmatprep.subr.mxu0 %v1684_v19  ;;  %v319_v19 = vld [vmem:[%s1977_s4 + $0x30] sm:$0xff]  ;;  %v719_v30 = vsel %vm718_vm7, %v1570_v17, %v709_v14 }
 0x120   : > { %1494 = vmatpush1.msk.msra.mxu1 %vm1777_vm3, %v721_v16  ;;  %855 = vmatpush1.msra.mxu0 %v1690_v21  ;;  %v321_v21 = vld [vmem:[%s1977_s4 + $0x40] sm:$0xff] }
 0x121   : > { %v926_v11 = vpop.permute.xlu0 %925  ;;  %v711_v22 = vpop.permute.xlu1 %710  ;;  %1492 = vmatmul.mubr.msk.f32.gmra.mxu0 %vm419_vm0, %v318_v20 }
 0x122   : > { %v720_v29 = vsel %vm718_vm7, %v709_v14, %v711_v22  ;;  %888 = vmatprep.mubr.f32.mxu0 %v1600_v1  ;;  %v933_v31 = vsel %vm929_vm8, %v926_v11, %v1574_v27 }
 0x123   : > { %1495 = vmatprep.subr.msk.mxu1 %vm1772_vm2, %v720_v29 }
 0x124   : > { %1496 = vmatpush1.msk.msra.mxu1 %vm1777_vm3, %v719_v30 }
 0x125   : > { %v924_v32 = vpop.permute.xlu0 %923  ;;  %1501 = vmatprep.subr.msk.mxu1 %vm1799_vm5, %v933_v31  ;;  %v920_v33 = vpop.permute.xlu1 %919  ;;  %1497 = vmatmul.mubr.msk.f32.vlgmr.msra.gmra.mxu1 %vm419_vm0, %v319_v19 }
 0x126   : > { %v932_v34 = vsel %vm929_vm8, %v924_v32, %v926_v11  ;;  %v931_v35 = vsel %vm929_vm8, %v920_v33, %v1575_v23  ;;  %807 = vmatprep.mubr.f32.mxu1 %v1600_v1  ;;  %1499 = vmatmul.mubr.msk.f32.vlgmr.msra.gmra.mxu0 %vm419_vm0, %v321_v21 }
 0x127   : > { %1502 = vmatpush1.msk.msra.mxu1 %vm1804_vm6, %v932_v34  ;;  %894 = vmatprep.mubr.f32.mxu0 %v1600_v1 }
 0x128   : > { %1503 = vmatprep.subr.msk.mxu1 %vm1799_vm5, %v931_v35 }
 0x129   : > { %v1038_v38 = vpop.permute.xlu0 %1037  ;;  %v1036_v39 = vpop.permute.xlu1 %1035  ;;  %1498 = vmatmul.mubr.msk.f32.gmra.mxu1 %vm419_vm0, %v320_v24 }
 0x12a   : > { %v1045_v40 = vsel %vm1041_vm9, %v1038_v38, %v1579_v37  ;;  %v1044_v41 = vsel %vm1041_vm9, %v1036_v39, %v1038_v38  ;;  %1012 = vmatprep.mubr.f32.mxu1 %v1600_v1  ;;  %1500 = vmatmul.mubr.msk.f32.gmra.mxu0 %vm419_vm0, %v322_v36 }
 0x12b   : > { %1507 = vmatprep.subr.msk.mxu0 %vm1772_vm2, %v1045_v40  ;;  %1124 = vmatprep.mubr.f32.mxu0 %v1600_v1 }
 0x12c   : > { %1508 = vmatpush1.msk.msra.mxu0 %vm1777_vm3, %v1044_v41 }
 0x12d   : > { %v918_v42 = vpop.permute.xlu0 %917  ;;  %v1030_v46 = vpop.permute.xlu1 %1029 }
 0x12e   : > { %v930_v44 = vsel %vm929_vm8, %v918_v42, %v920_v33 }
 0x12f   : > { %1504 = vmatpush1.msk.msra.mxu1 %vm1804_vm6, %v930_v44 }
 0x130   : > { %1505 = vmatmul.mubr.msk.f32.vlgmr.msra.gmra.mxu1 %vm419_vm0, %v323_v43 }
 0x131   : > { %v1032_v47 = vpop.permute.xlu0 %1031  ;;  %1018 = vmatprep.mubr.f32.mxu1 %v1600_v1  ;;  %v1144_v56 = vpop.permute.xlu1 %1143 }
 0x132   : > { %v1042_v50 = vsel %vm1041_vm9, %v1030_v46, %v1032_v47  ;;  %v1043_v51 = vsel %vm1041_vm9, %v1032_v47, %v1580_v45  ;;  %v1155_v59 = vsel %vm1153_vm10, %v1144_v56, %v1585_v57 }
 0x133   : > { %1509 = vmatprep.subr.msk.mxu0 %vm1772_vm2, %v1043_v51 }
 0x134   : > { %1506 = vmatmul.mubr.msk.f32.gmra.mxu1 %vm419_vm0, %v324_v48  ;;  %1510 = vmatpush1.msk.msra.mxu0 %vm1777_vm3, %v1042_v50 }
 0x135   : > { %v1150_v54 = vpop.permute.xlu0 %1149  ;;  %1511 = vmatmul.mubr.msk.f32.vlgmr.msra.gmra.mxu0 %vm419_vm0, %v325_v53  ;;  %1232 = vmatprep.mubr.f32.mxu1 %v1600_v1  ;;  %v1256_v62 = vpop.permute.xlu1 %1255 }
 0x136   : > { %v1157_v55 = vsel %vm1153_vm10, %v1150_v54, %v1584_v25  ;;  %1130 = vmatprep.mubr.f32.mxu0 %v1600_v1 }
 0x137   : > { %1196 = vmatprep.subr.mxu1 %v1157_v55 }
 0x139   : > { %v1148_v52 = vpop.permute.xlu0 %1147  ;;  %1512 = vmatmul.mubr.msk.f32.gmra.mxu0 %vm419_vm0, %v326_v49  ;;  %v1250_v7 = vpop.permute.xlu1 %1249 }
 0x13a   : > { %v1156_v58 = vsel %vm1153_vm10, %v1148_v52, %v1150_v54  ;;  %1344 = vmatprep.mubr.f32.mxu0 %v1600_v1 }
 0x13b   : > { %1197 = vmatpush1.msra.mxu1 %v1156_v58 }
 0x13c   : > { %1198 = vmatprep.subr.mxu1 %v1155_v59 }
 0x13d   : > { %v1258_v63 = vpop.permute.xlu0 %1257 }
 0x13e   : > { %v1264_v0 = vsel %vm1261_vm11, %v1256_v62, %v1258_v63  ;;  %v1265_v26 = vsel %vm1261_vm11, %v1258_v63, %v1589_v60 }
 0x13f   : > { %1515 = vmatprep.subr.msk.mxu0 %vm1799_vm5, %v1265_v26 }
 0x140   : > { %1516 = vmatpush1.msk.msra.mxu0 %vm1804_vm6, %v1264_v0 }
 0x141   : > { %v1142_v3 = vpop.permute.xlu0 %1141 }
 0x142   : > { %v1154_v5 = vsel %vm1153_vm10, %v1142_v3, %v1144_v56 }
 0x143   : > { %1199 = vmatpush1.msra.mxu1 %v1154_v5 }
 0x144   : > { %1513 = vmatmul.mubr.msk.f32.vlgmr.msra.gmra.mxu1 %vm419_vm0, %v327_v4  ;;  %v1361_v4 = vld [vmem:[%s279_s30] sm:$0xff] }
 0x145   : > { %v1252_v8 = vpop.permute.xlu0 %1251  ;;  %1238 = vmatprep.mubr.f32.mxu1 %v1600_v1 }
 0x146   : > { %v1262_v10 = vsel %vm1261_vm11, %v1250_v7, %v1252_v8  ;;  %v1263_v12 = vsel %vm1261_vm11, %v1252_v8, %v1590_v6 }
 0x147   : > { %1517 = vmatprep.subr.msk.mxu0 %vm1799_vm5, %v1263_v12  ;;  %v1362_v12 = vld [vmem:[%s279_s30 + $0x8] sm:$0xff] }
 0x148   : > { %1514 = vmatmul.mubr.msk.f32.gmra.mxu1 %vm419_vm0, %v328_v9  ;;  %1518 = vmatpush1.msk.msra.mxu0 %vm1804_vm6, %v1262_v10 }
 0x149   : > { %1519 = vmatmul.mubr.msk.f32.vlgmr.msra.gmra.mxu0 %vm419_vm0, %v329_v13 }
 0x14a   : > { %1350 = vmatprep.mubr.f32.mxu0 %v1600_v1 }
 0x14d   : > { %1520 = vmatmul.mubr.msk.f32.gmra.mxu0 %vm419_vm0, %v330_v28 }
 0x1cd   : > { %v506_v14 = vpop.f32.mrf.mxu1  ;;  %v500_v16 = vpop.f32.mrf.mxu0 }
 0x1cf   : > { %v508_v15 = vpop.f32.mrf.mxu1  ;;  %v502_v18 = vpop.f32.mrf.mxu0 }
 0x1d5   : > { %v583_v61 = vpop.f32.mrf.mxu1 }
 0x1d6   : > { %v584_v31 = vadd.f32 %v583_v61, %v500_v16  ;;  %v1363_v61 = vld [vmem:[%s279_s30 + $0x10] sm:$0xff] }
 0x1d7   : > { %v585_v20 = vpop.f32.mrf.mxu1 }
 0x1d8   : > { %v586_v33 = vadd.f32 %v585_v20, %v502_v18 }
 0x1d9   : > { %v589_v11 = vpop.f32.mrf.mxu1 }
 0x1da   : > { %v590_v36 = vadd.f32 %v589_v11, %v506_v14 }
 0x1db   : > { %v591_v22 = vpop.f32.mrf.mxu1 }
 0x1dc   : > { %v592_v42 = vadd.f32 %v591_v22, %v508_v15 }
 0x1dd   : > { %v691_v17 = vpop.f32.mrf.mxu0 }
 0x1de   : > { %v702_v35 = vadd.f32 %v691_v17, %v584_v31 }
 0x1df   : > { %v693_v2 = vpop.f32.mrf.mxu0 }
 0x1e0   : > { %v703_v37 = vadd.f32 %v693_v2, %v586_v33  ;;  %v1364_v2 = vld [vmem:[%s279_s30 + $0x18] sm:$0xff] }
 0x1e1   : > { %v697_v27 = vpop.f32.mrf.mxu0 }
 0x1e2   : > { %v704_v43 = vadd.f32 %v697_v27, %v590_v36 }
 0x1e3   : > { %v699_v19 = vpop.f32.mrf.mxu0 }
 0x1e4   : > { %v705_v48 = vadd.f32 %v699_v19, %v592_v42 }
 0x1e5   : > { %v803_v29 = vpop.f32.mrf.mxu1 }
 0x1e6   : > { %v890_v30 = vpop.f32.mrf.mxu0  ;;  %v814_v39 = vadd.f32 %v803_v29, %v702_v35 }
 0x1e7   : > { %v805_v1 = vpop.f32.mrf.mxu1 }
 0x1e8   : > { %v892_v23 = vpop.f32.mrf.mxu0  ;;  %v815_v44 = vadd.f32 %v805_v1, %v703_v37  ;;  %v901_v45 = vadd.f32 %v890_v30, %v814_v39 }
 0x1e9   : > { %v809_v21 = vpop.f32.mrf.mxu1 }
 0x1ea   : > { %v896_v34 = vpop.f32.mrf.mxu0  ;;  %v816_v50 = vadd.f32 %v809_v21, %v704_v43  ;;  %v902_v51 = vadd.f32 %v892_v23, %v815_v44 }
 0x1eb   : > { %v811_v32 = vpop.f32.mrf.mxu1 }
 0x1ec   : > { %v898_v38 = vpop.f32.mrf.mxu0  ;;  %v817_v55 = vadd.f32 %v811_v32, %v705_v48  ;;  %v903_v49 = vadd.f32 %v896_v34, %v816_v50 }
 0x1ee   : > { %v904_v60 = vadd.f32 %v898_v38, %v817_v55 }
 0x1f0   : > { %v1014_v24 = vpop.f32.mrf.mxu1 }
 0x1f1   : > { %v1025_v53 = vadd.f32 %v1014_v24, %v901_v45 }
 0x1f2   : > { %v1016_v40 = vpop.f32.mrf.mxu1 }
 0x1f3   : > { %v1026_v56 = vadd.f32 %v1016_v40, %v902_v51 }
 0x1f4   : > { %v1020_v46 = vpop.f32.mrf.mxu1 }
 0x1f5   : > { %v1126_v41 = vpop.f32.mrf.mxu0  ;;  %v1027_v62 = vadd.f32 %v1020_v46, %v903_v49 }
 0x1f6   : > { %v1022_v25 = vpop.f32.mrf.mxu1  ;;  %v1137_v52 = vadd.f32 %v1126_v41, %v1025_v53 }
 0x1f7   : > { %v1128_v47 = vpop.f32.mrf.mxu0  ;;  %v1028_v5 = vadd.f32 %v1022_v25, %v904_v60 }
 0x1f8   : > { %v1138_v63 = vadd.f32 %v1128_v47, %v1026_v56 }
 0x1f9   : > { %v1132_v54 = vpop.f32.mrf.mxu0 }
 0x1fa   : > { %v1139_v6 = vadd.f32 %v1132_v54, %v1027_v62 }
 0x1fb   : > { %v1134_v59 = vpop.f32.mrf.mxu0 }
 0x1fc   : > { %v1140_v13 = vadd.f32 %v1134_v59, %v1028_v5 }
 0x204   : > { %v1234_v57 = vpop.f32.mrf.mxu1 }
 0x205   : > { %v1245_v0 = vadd.f32 %v1234_v57, %v1137_v52 }
 0x206   : > { %v1236_v58 = vpop.f32.mrf.mxu1 }
 0x207   : > { %v1246_v7 = vadd.f32 %v1236_v58, %v1138_v63 }
 0x208   : > { %v1240_v26 = vpop.f32.mrf.mxu1 }
 0x209   : > { %v1346_v3 = vpop.f32.mrf.mxu0  ;;  %v1247_v28 = vadd.f32 %v1240_v26, %v1139_v6 }
 0x20a   : > { %v1357_v8 = vadd.f32 %v1346_v3, %v1245_v0  ;;  %v1242_v9 = vpop.f32.mrf.mxu1 }
 0x20b   : > { %v1348_v10 = vpop.f32.mrf.mxu0  ;;  %v1248_v18 = vadd.f32 %v1242_v9, %v1140_v13 }
 0x20c   : > { %v1365_v14 = vadd.f32 %v1361_v4, %v1357_v8  ;;  %v1358_v15 = vadd.f32 %v1348_v10, %v1246_v7 }
 0x20d   : > { %v1352_v16 = vpop.f32.mrf.mxu0 }
 0x20e   : > { %1369 = vst [vmem:[%s284_s9] sm:$0xff] %v1365_v14  ;;  %v1366_v20 = vadd.f32 %v1362_v12, %v1358_v15  ;;  %v1359_v17 = vadd.f32 %v1352_v16, %v1247_v28 }
 0x20f   : > { %v1354_v11 = vpop.f32.mrf.mxu0 }
 0x210   : > { %1370 = vst [vmem:[%s284_s9 + $0x8] sm:$0xff] %v1366_v20  ;;  %v1367_v22 = vadd.f32 %v1363_v61, %v1359_v17  ;;  %v1360_v27 = vadd.f32 %v1354_v11, %v1248_v18 }
 0x212   : > { %1371 = vst [vmem:[%s284_s9 + $0x10] sm:$0xff] %v1367_v22  ;;  %v1368_v29 = vadd.f32 %v1364_v2, %v1360_v27 }
 0x214   : > { %1372 = vst [vmem:[%s284_s9 + $0x18] sm:$0xff] %v1368_v29 }
 0x215 PF: > { %s15_s18 = sadd.s32 1, %s1597_s18  }
 0x216   : > { %p12_p4 = scmp.ge.s32.totalorder %s15_s18, 4  }
 0x218   :  { %14 = sbr.rel (!%p12_p4) target bundleno = 1 (0x1), region = 79 }

// kernel: orsnet_forward.8
= control target key start
LH: loop header
LB: loop body
LE: loop exit
PB: predicated region body
PF: predicated region fallthrough
CT: control target
= control target key end

     0   :  { %s1709_s23 = smov 0   ;;  %s2047_s0 = inlined_call_operand.vmem [shape: f32[2,16,256], index: 0, kind: input, shape index: {}]   ;;  %s2048_s1 = inlined_call_operand.vmem [shape: f32[2,16,256], index: 1, kind: input, shape index: {}]   ;;  %s2049_s2 = inlined_call_operand.vmem [shape: f32[2,16,1], index: 2, kind: input, shape index: {}]   ;;  %s2050_s3 = inlined_call_operand.vmem [shape: f32[9,16,16], index: 3, kind: input, shape index: {}]   ;;  %s2051_s4 = inlined_call_operand.<no memory space> [shape: f32[1,1], index: 4, kind: input, shape index: {}]   ;;  %s2052_s5 = inlined_call_operand.vmem [shape: f32[2,16,256], index: 5, kind: output, shape index: {0}]   ;;  %s2053_s6 = inlined_call_operand.vmem [shape: f32[2,16,256], index: 6, kind: output, shape index: {1}]  }
   0x1   :  { %v12_v0 = vstv %s2051_s4 }
   0x2   :  { %13 = vst [vmem:[#allocation3] sm:$0x1] %v12_v0 }
   0x3 LB: > { %s1525_s24 = sadd.s32 4294967295, %s1659_s23   ;;  %p1529_p0 = scmp.ge.s32.totalorder %s1659_s23, 1  ;;  %s1659_s23 = sphi %s1709_s23, %s19_s23  }
   0x4   : > { %p237_p1 = scmp.lt.s32.totalorder %s1659_s23, 3 }
   0x6   : > { %p238_p2 = pnand %p1529_p0, %p237_p1 }
   0x7   : > { %p282_p3 = scmp.lt.s32.totalorder (!%p238_p2), %s1525_s24, 1  ;;  %s1663_s4 = smov (!%p238_p2), 17  }
   0x8   : > { %241 = sbr.rel (%p238_p2) target bundleno = 536 (0x218), region = 40  ;;  %s1664_s29 = smov (!%p238_p2), 1  }
   0x9   : > { %s1665_s30 = smov (!%p238_p2), 127   ;;  %s1666_s7 = smov (!%p238_p2), 113  }
   0xa   : > { %s1667_s8 = smov (!%p238_p2), 16   ;;  %s1668_s9 = smov (!%p238_p2), 112  }
   0xb   : > { %s1669_s10 = smov (!%p238_p2), 15   ;;  %s1670_s11 = smov (!%p238_p2), 111  }
   0xd   : > { %v1661_v1 = vmov 0   ;;  %s2063_s24 = smov (!%p282_p3, %s1525_s24), 1  ;;  %v1662_v2 = vmov 0.0   ;;  %v1582_v23 = vld [vmem:[#allocation3] ss:$0 sm:$0xff]  ;;  %v365_v31 = vlaneseq  ;;  %vm445_vm0 = vcmask 130048  }
   0xe   : > { %1612 = vset.pattern.permute.xlu0 %v1661_v1  ;;  %530 = vmatprep.mubr.f32.mxu1 %v1662_v2  ;;  %s1587_s25 = sshll.u32 %s2063_s24, 4  ;;  %s1738_s12 = sshll.u32 %s2063_s24, 5  ;;  %v342_v48 = vld [vmem:[%s2050_s3 + $0x18] sm:$0xff]  ;;  %v341_v49 = vld [vmem:[%s2050_s3 + $0x10] sm:$0xff]  ;;  %vm420_vm1 = vcmask 138240   ;;  %v339_v61 = vld [vmem:[%s2050_s3] sm:$0xff] }
   0xf   : > { %524 = vmatprep.mubr.f32.mxu0 %v1662_v2  ;;  %1619 = vrot.lane.b32.xlu1 %v1662_v2, %s1663_s4  ;;  %s296_s28 = scalar_lea.vmem %s2049_s2, %s1587_s25  ;;  %s286_s15 = scalar_lea.vmem %s2047_s0, %s1738_s12  ;;  %v366_v33 = vand.u32 127, %v365_v31  ;;  %vm632_vm4 = vcmask 121856   ;;  %vm744_vm7 = vcmask 7168   ;;  %vm955_vm8 = vcmask 1039360   ;;  %v352_v51 = vld [vmem:[%s2050_s3 + $0x68] sm:$0xff] }
  0x10   : > { %v312_v3 = vld [vmem:[%s296_s28 + $0x8] sm:$0xff]  ;;  %v311_v4 = vld [vmem:[%s296_s28] sm:$0xff]  ;;  %s291_s18 = scalar_lea.vmem %s2048_s1, %s1738_s12  ;;  %v309_v5 = vld [vmem:[%s286_s15 + $0x10] sm:$0xff]  ;;  %s301_s21 = scalar_lea.vmem %s2052_s5, %s1738_s12  ;;  %vm1067_vm9 = vcmask 924672   ;;  %vm1179_vm10 = vcmask 916480   ;;  %vm1287_vm11 = vcmask 908288  }
  0x11   : > { %320 = vperm.xlu0 %1612, %v312_v3   ;;  %v310_v6 = vld [vmem:[%s286_s15 + $0x18] sm:$0xff]  ;;  %v329_v8 = vld [vmem:[%s291_s18 + $0x10] sm:$0xff]  ;;  %v307_v12 = vld [vmem:[%s286_s15] sm:$0xff]  ;;  %v367_v35 = vadd.s32 128, %v366_v33  ;;  %v372_v45 = vand.u32 15, %v366_v33  ;;  %s306_s14 = scalar_lea.vmem %s2053_s6, %s1738_s12 }
  0x12   : > { %v330_v9 = vld [vmem:[%s291_s18 + $0x18] sm:$0xff]  ;;  %v308_v13 = vld [vmem:[%s286_s15 + $0x8] sm:$0xff]  ;;  %v327_v17 = vld [vmem:[%s291_s18] sm:$0xff] }
  0x13   : > { %1629 = vrot.lane.b32.xlu1 %v1662_v2, %s1664_s29  ;;  %v328_v18 = vld [vmem:[%s291_s18 + $0x8] sm:$0xff]  ;;  %v379_v42 = vand.u32 15, %v367_v35  ;;  %vm1855_vm3 = vcmp.ne.s32.totalorder %v372_v45, 0  ;;  %vm1882_vm6 = vcmp.ne.s32.totalorder %v372_v45, 15  ;;  %v349_v45 = vld [vmem:[%s2050_s3 + $0x50] sm:$0xff] }
  0x15   : > { %315 = vperm.xlu0 %1612, %v311_v4   ;;  %vm1850_vm2 = vcmp.ne.s32.totalorder %v379_v42, 0  ;;  %vm1877_vm5 = vcmp.ne.s32.totalorder %v379_v42, 15 }
  0x17   : > { %1634 = vrot.lane.b32.xlu1 %v1662_v2, %s1665_s30 }
  0x19   : > { %1614 = vrot.lane.b32.xlu0 %v1662_v2, %s1667_s8 }
  0x1b   : > { %1639 = vrot.lane.b32.xlu1 %v1662_v2, %s1666_s7 }
  0x1d   : > { %1624 = vrot.lane.b32.xlu0 %v1662_v2, %s1669_s10 }
  0x1f   : > { %1644 = vrot.lane.b32.xlu1 %v1662_v2, %s1668_s9 }
  0x23   : > { %1649 = vrot.lane.b32.xlu1 %v1662_v2, %s1670_s11 }
  0x81   : > { %v1620_v24 = vpop.permute.xlu1 %1619 }
  0x82   : > { %v1621_v50 = vunpack.i.l.bf16 %v1620_v24  ;;  %v1622_v57 = vunpack.i.h.bf16 %v1620_v24 }
  0x85   : > { %v1828_v25 = vpop.permute.xlu1 %1629 }
  0x89   : > { %v1830_v26 = vpop.permute.xlu1 %1634 }
  0x8c   : > { %v321_v7 = vpop.permute.xlu0 %320 }
  0x8d   : > { %v325_v10 = vmul.f32 %v321_v7, %v309_v5  ;;  %v326_v11 = vmul.f32 %v321_v7, %v310_v6  ;;  %v1832_v27 = vpop.permute.xlu1 %1639  ;;  %v340_v6 = vld [vmem:[%s2050_s3 + $0x8] sm:$0xff] }
  0x8f   : > { %v1752_v14 = vadd.f32 %v329_v8, %v325_v10  ;;  %v1754_v15 = vadd.f32 %v330_v9, %v326_v11 }
  0x90   : > { %v316_v16 = vpop.permute.xlu0 %315 }
  0x91   : > { %337 = vst [vmem:[%s301_s21 + $0x10] sm:$0xff] %v1752_v14  ;;  %338 = vst [vmem:[%s301_s21 + $0x18] sm:$0xff] %v1754_v15  ;;  %v323_v19 = vmul.f32 %v316_v16, %v307_v12  ;;  %v324_v20 = vmul.f32 %v316_v16, %v308_v13  ;;  %441 = vrot.lane.b32.xlu1 %v1752_v14, %s1667_s8  ;;  %v1834_v28 = vpop.permute.xlu1 %1644  ;;  %v343_v13 = vld [vmem:[%s2050_s3 + $0x20] sm:$0xff]  ;;  %v1631_v16 = vunpack.i.l.bf16 %v1828_v25 }
  0x93   : > { %v1760_v21 = vadd.f32 %v327_v17, %v323_v19  ;;  %v1762_v22 = vadd.f32 %v328_v18, %v324_v20 }
  0x94   : > { %v1615_v29 = vpop.permute.xlu0 %1614 }
  0x95   : > { %335 = vst [vmem:[%s301_s21] sm:$0xff] %v1760_v21  ;;  %336 = vst [vmem:[%s301_s21 + $0x8] sm:$0xff] %v1762_v22  ;;  %443 = vrot.lane.b32.xlu1 %v1754_v15, %s1667_s8  ;;  %437 = vrot.lane.b32.xlu0 %v1762_v22, %s1667_s8  ;;  %v1836_v30 = vpop.permute.xlu1 %1649  ;;  %v1616_v36 = vunpack.i.l.bf16 %v1615_v29  ;;  %v1617_v41 = vunpack.i.h.bf16 %v1615_v29  ;;  %v1636_v29 = vunpack.i.l.bf16 %v1830_v26 }
  0x98   : > { %v1838_v32 = vpop.permute.xlu0 %1624 }
  0x99   : > { %418 = vrot.lane.b32.xlu0 %v1754_v15, %s1663_s4  ;;  %435 = vrot.lane.b32.xlu1 %v1760_v21, %s1667_s8  ;;  %v1626_v0 = vunpack.i.l.bf16 %v1838_v32  ;;  %v1627_v8 = vunpack.i.h.bf16 %v1838_v32 }
  0x9d   : > { %410 = vrot.lane.b32.xlu0 %v1760_v21, %s1663_s4  ;;  %416 = vrot.lane.b32.xlu1 %v1752_v14, %s1663_s4 }
  0xa1   : > { %628 = vrot.lane.b32.xlu0 %v1752_v14, %s1669_s10  ;;  %412 = vrot.lane.b32.xlu1 %v1762_v22, %s1663_s4 }
  0xa5   : > { %624 = vrot.lane.b32.xlu0 %v1762_v22, %s1669_s10  ;;  %630 = vrot.lane.b32.xlu1 %v1754_v15, %s1669_s10 }
  0xa9   : > { %742 = vrot.lane.b32.xlu0 %v1754_v15, %s1664_s29  ;;  %622 = vrot.lane.b32.xlu1 %v1760_v21, %s1669_s10 }
  0xad   : > { %734 = vrot.lane.b32.xlu0 %v1760_v21, %s1664_s29  ;;  %740 = vrot.lane.b32.xlu1 %v1752_v14, %s1664_s29 }
  0xb1   : > { %951 = vrot.lane.b32.xlu0 %v1754_v15, %s1665_s30  ;;  %736 = vrot.lane.b32.xlu1 %v1762_v22, %s1664_s29 }
  0xb5   : > { %949 = vrot.lane.b32.xlu0 %v1752_v14, %s1665_s30  ;;  %945 = vrot.lane.b32.xlu1 %v1762_v22, %s1665_s30 }
  0xb9   : > { %1063 = vrot.lane.b32.xlu0 %v1754_v15, %s1666_s7  ;;  %1061 = vrot.lane.b32.xlu1 %v1752_v14, %s1666_s7 }
  0xbd   : > { %943 = vrot.lane.b32.xlu0 %v1760_v21, %s1665_s30  ;;  %1055 = vrot.lane.b32.xlu1 %v1760_v21, %s1666_s7 }
  0xc1   : > { %1057 = vrot.lane.b32.xlu0 %v1762_v22, %s1666_s7  ;;  %1169 = vrot.lane.b32.xlu1 %v1762_v22, %s1668_s9 }
  0xc5   : > { %1175 = vrot.lane.b32.xlu0 %v1754_v15, %s1668_s9  ;;  %1281 = vrot.lane.b32.xlu1 %v1752_v14, %s1670_s11 }
  0xc9   : > { %1173 = vrot.lane.b32.xlu0 %v1752_v14, %s1668_s9  ;;  %1275 = vrot.lane.b32.xlu1 %v1760_v21, %s1670_s11 }
  0xcd   : > { %1283 = vrot.lane.b32.xlu0 %v1754_v15, %s1670_s11 }
  0xd1   : > { %1167 = vrot.lane.b32.xlu0 %v1760_v21, %s1668_s9 }
  0xd5   : > { %1277 = vrot.lane.b32.xlu0 %v1762_v22, %s1670_s11 }
  0xd9   : > { %1398 = vperm.xlu0 %1612, %v1582_v23   ;;  %v344_v23 = vld [vmem:[%s2050_s3 + $0x28] sm:$0xff] }
 0x103   : > { %v442_v34 = vpop.permute.xlu1 %441 }
 0x104   : > { %v448_v40 = vsel %vm445_vm0, %v1616_v36, %v442_v34 }
 0x107   : > { %v444_v37 = vpop.permute.xlu1 %443  ;;  %v438_v38 = vpop.permute.xlu0 %437 }
 0x108   : > { %v449_v39 = vsel %vm445_vm0, %v442_v34, %v444_v37 }
 0x109   : > { %488 = vmatprep.subr.mxu0 %v449_v39  ;;  %1590 = vmatprep.subr.mxu1 %v449_v39  ;;  %v1641_v39 = vunpack.i.l.bf16 %v1832_v27 }
 0x10a   : > { %489 = vmatpush1.msra.mxu0 %v448_v40  ;;  %1592 = vmatpush1.msra.mxu1 %v448_v40 }
 0x10b   : > { %v419_v43 = vpop.permute.xlu0 %418  ;;  %v436_v44 = vpop.permute.xlu1 %435 }
 0x10c   : > { %v447_v46 = vsel %vm445_vm0, %v436_v44, %v438_v38  ;;  %v446_v47 = vsel %vm445_vm0, %v1617_v41, %v436_v44  ;;  %v348_v38 = vld [vmem:[%s2050_s3 + $0x48] sm:$0xff] }
 0x10d   : > { %490 = vmatprep.subr.mxu0 %v447_v46  ;;  %1591 = vmatprep.subr.mxu1 %v447_v46 }
 0x10e   : > { %491 = vmatpush1.msra.mxu0 %v446_v47  ;;  %1593 = vmatpush1.msra.mxu1 %v446_v47  ;;  %v1642_v47 = vunpack.i.h.bf16 %v1832_v27  ;;  %v1646_v27 = vunpack.i.l.bf16 %v1834_v28 }
 0x10f   : > { %v411_v52 = vpop.permute.xlu0 %410  ;;  %v417_v53 = vpop.permute.xlu1 %416  ;;  %1541 = vmatmul.mubr.msk.f32.vlgmr.msra.gmra.mxu1 %vm445_vm0, %v342_v48  ;;  %1540 = vmatmul.mubr.msk.f32.vlgmr.msra.gmra.mxu0 %vm445_vm0, %v341_v49 }
 0x110   : > { %v423_v55 = vsel %vm420_vm1, %v1621_v50, %v417_v53  ;;  %v424_v56 = vsel %vm420_vm1, %v417_v53, %v419_v43  ;;  %715 = vmatprep.mubr.f32.mxu0 %v1662_v2  ;;  %607 = vmatprep.mubr.f32.mxu1 %v1662_v2  ;;  %v421_v62 = vsel %vm420_vm1, %v1622_v57, %v411_v52  ;;  %v350_v50 = vld [vmem:[%s2050_s3 + $0x58] sm:$0xff] }
 0x111   : > { %1542 = vmatprep.subr.msk.mxu1 %vm1850_vm2, %v424_v56 }
 0x112   : > { %1543 = vmatpush1.msk.msra.mxu1 %vm1855_vm3, %v423_v55  ;;  %v351_v55 = vld [vmem:[%s2050_s3 + $0x60] sm:$0xff] }
 0x113   : > { %v629_v58 = vpop.permute.xlu0 %628  ;;  %v413_v59 = vpop.permute.xlu1 %412 }
 0x114   : > { %v422_v60 = vsel %vm420_vm1, %v411_v52, %v413_v59  ;;  %v635_v7 = vsel %vm632_vm4, %v1626_v0, %v629_v58  ;;  %v1647_v59 = vunpack.i.h.bf16 %v1834_v28 }
 0x115   : > { %1544 = vmatprep.subr.msk.mxu1 %vm1850_vm2, %v422_v60 }
 0x116   : > { %1545 = vmatpush1.msk.msra.mxu1 %vm1855_vm3, %v421_v62  ;;  %v1651_v62 = vunpack.i.l.bf16 %v1836_v30 }
 0x117   : > { %v625_v1 = vpop.permute.xlu0 %624  ;;  %v631_v3 = vpop.permute.xlu1 %630  ;;  %1546 = vmatmul.mubr.msk.f32.vlgmr.msra.gmra.mxu1 %vm445_vm0, %v339_v61 }
 0x118   : > { %v636_v5 = vsel %vm632_vm4, %v629_v58, %v631_v3  ;;  %613 = vmatprep.mubr.f32.mxu1 %v1662_v2 }
 0x119   : > { %1548 = vmatprep.subr.msk.mxu0 %vm1877_vm5, %v636_v5 }
 0x11a   : > { %1549 = vmatpush1.msk.msra.mxu0 %vm1882_vm6, %v635_v7 }
 0x11b   : > { %v743_v9 = vpop.permute.xlu0 %742  ;;  %v623_v10 = vpop.permute.xlu1 %622  ;;  %1547 = vmatmul.mubr.msk.f32.gmra.mxu1 %vm445_vm0, %v340_v6  ;;  %v353_v6 = vld [vmem:[%s2050_s3 + $0x70] sm:$0xff] }
 0x11c   : > { %v633_v11 = vsel %vm632_vm4, %v1627_v8, %v623_v10  ;;  %v634_v12 = vsel %vm632_vm4, %v623_v10, %v625_v1  ;;  %827 = vmatprep.mubr.f32.mxu1 %v1662_v2  ;;  %v1652_v8 = vunpack.i.h.bf16 %v1836_v30  ;;  %v356_v30 = vld [vmem:[%s2050_s3 + $0x88] sm:$0xff] }
 0x11d   : > { %1550 = vmatprep.subr.msk.mxu0 %vm1877_vm5, %v634_v12 }
 0x11e   : > { %1551 = vmatpush1.msk.msra.mxu0 %vm1882_vm6, %v633_v11  ;;  %v354_v11 = vld [vmem:[%s2050_s3 + $0x78] sm:$0xff] }
 0x11f   : > { %v735_v17 = vpop.permute.xlu0 %734  ;;  %878 = vmatprep.subr.mxu0 %v1754_v15  ;;  %v741_v18 = vpop.permute.xlu1 %740  ;;  %1552 = vmatmul.mubr.msk.f32.vlgmr.msra.gmra.mxu0 %vm445_vm0, %v343_v13  ;;  %v1632_v15 = vunpack.i.h.bf16 %v1828_v25  ;;  %v1637_v25 = vunpack.i.h.bf16 %v1830_v26  ;;  %v346_v26 = vld [vmem:[%s2050_s3 + $0x38] sm:$0xff] }
 0x120   : > { %v747_v19 = vsel %vm744_vm7, %v1631_v16, %v741_v18  ;;  %v748_v20 = vsel %vm744_vm7, %v741_v18, %v743_v9  ;;  %879 = vmatpush1.msra.mxu0 %v1752_v14  ;;  %721 = vmatprep.mubr.f32.mxu0 %v1662_v2  ;;  %v355_v16 = vld [vmem:[%s2050_s3 + $0x80] sm:$0xff] }
 0x121   : > { %1554 = vmatprep.subr.msk.mxu1 %vm1850_vm2, %v748_v20  ;;  %880 = vmatprep.subr.mxu0 %v1762_v22  ;;  %v345_v22 = vld [vmem:[%s2050_s3 + $0x30] sm:$0xff]  ;;  %v745_v32 = vsel %vm744_vm7, %v1632_v15, %v735_v17 }
 0x122   : > { %1555 = vmatpush1.msk.msra.mxu1 %vm1855_vm3, %v747_v19  ;;  %881 = vmatpush1.msra.mxu0 %v1760_v21  ;;  %v347_v21 = vld [vmem:[%s2050_s3 + $0x40] sm:$0xff] }
 0x123   : > { %v952_v14 = vpop.permute.xlu0 %951  ;;  %v737_v24 = vpop.permute.xlu1 %736  ;;  %1553 = vmatmul.mubr.msk.f32.gmra.mxu0 %vm445_vm0, %v344_v23 }
 0x124   : > { %v746_v31 = vsel %vm744_vm7, %v735_v17, %v737_v24  ;;  %914 = vmatprep.mubr.f32.mxu0 %v1662_v2  ;;  %v959_v33 = vsel %vm955_vm8, %v952_v14, %v1636_v29 }
 0x125   : > { %1556 = vmatprep.subr.msk.mxu1 %vm1850_vm2, %v746_v31 }
 0x126   : > { %1557 = vmatpush1.msk.msra.mxu1 %vm1855_vm3, %v745_v32 }
 0x127   : > { %v950_v34 = vpop.permute.xlu0 %949  ;;  %1562 = vmatprep.subr.msk.mxu1 %vm1877_vm5, %v959_v33  ;;  %v946_v35 = vpop.permute.xlu1 %945  ;;  %1558 = vmatmul.mubr.msk.f32.vlgmr.msra.gmra.mxu1 %vm445_vm0, %v345_v22 }
 0x128   : > { %v958_v36 = vsel %vm955_vm8, %v950_v34, %v952_v14  ;;  %v957_v37 = vsel %vm955_vm8, %v946_v35, %v1637_v25  ;;  %833 = vmatprep.mubr.f32.mxu1 %v1662_v2  ;;  %1560 = vmatmul.mubr.msk.f32.vlgmr.msra.gmra.mxu0 %vm445_vm0, %v347_v21 }
 0x129   : > { %1563 = vmatpush1.msk.msra.mxu1 %vm1882_vm6, %v958_v36  ;;  %920 = vmatprep.mubr.f32.mxu0 %v1662_v2 }
 0x12a   : > { %1564 = vmatprep.subr.msk.mxu1 %vm1877_vm5, %v957_v37 }
 0x12b   : > { %v1064_v40 = vpop.permute.xlu0 %1063  ;;  %v1062_v41 = vpop.permute.xlu1 %1061  ;;  %1559 = vmatmul.mubr.msk.f32.gmra.mxu1 %vm445_vm0, %v346_v26 }
 0x12c   : > { %v1071_v42 = vsel %vm1067_vm9, %v1064_v40, %v1641_v39  ;;  %v1070_v43 = vsel %vm1067_vm9, %v1062_v41, %v1064_v40  ;;  %1038 = vmatprep.mubr.f32.mxu1 %v1662_v2  ;;  %1561 = vmatmul.mubr.msk.f32.gmra.mxu0 %vm445_vm0, %v348_v38 }
 0x12d   : > { %1568 = vmatprep.subr.msk.mxu0 %vm1850_vm2, %v1071_v42  ;;  %1150 = vmatprep.mubr.f32.mxu0 %v1662_v2 }
 0x12e   : > { %1569 = vmatpush1.msk.msra.mxu0 %vm1855_vm3, %v1070_v43 }
 0x12f   : > { %v944_v44 = vpop.permute.xlu0 %943  ;;  %v1056_v48 = vpop.permute.xlu1 %1055 }
 0x130   : > { %v956_v46 = vsel %vm955_vm8, %v944_v44, %v946_v35 }
 0x131   : > { %1565 = vmatpush1.msk.msra.mxu1 %vm1882_vm6, %v956_v46 }
 0x132   : > { %1566 = vmatmul.mubr.msk.f32.vlgmr.msra.gmra.mxu1 %vm445_vm0, %v349_v45 }
 0x133   : > { %v1058_v49 = vpop.permute.xlu0 %1057  ;;  %1044 = vmatprep.mubr.f32.mxu1 %v1662_v2  ;;  %v1170_v58 = vpop.permute.xlu1 %1169 }
 0x134   : > { %v1068_v52 = vsel %vm1067_vm9, %v1056_v48, %v1058_v49  ;;  %v1069_v53 = vsel %vm1067_vm9, %v1058_v49, %v1642_v47  ;;  %v1181_v61 = vsel %vm1179_vm10, %v1170_v58, %v1647_v59 }
 0x135   : > { %1570 = vmatprep.subr.msk.mxu0 %vm1850_vm2, %v1069_v53 }
 0x136   : > { %1567 = vmatmul.mubr.msk.f32.gmra.mxu1 %vm445_vm0, %v350_v50  ;;  %1571 = vmatpush1.msk.msra.mxu0 %vm1855_vm3, %v1068_v52 }
 0x137   : > { %v1176_v56 = vpop.permute.xlu0 %1175  ;;  %1572 = vmatmul.mubr.msk.f32.vlgmr.msra.gmra.mxu0 %vm445_vm0, %v351_v55  ;;  %1258 = vmatprep.mubr.f32.mxu1 %v1662_v2  ;;  %v1282_v0 = vpop.permute.xlu1 %1281 }
 0x138   : > { %v1183_v57 = vsel %vm1179_vm10, %v1176_v56, %v1646_v27  ;;  %1156 = vmatprep.mubr.f32.mxu0 %v1662_v2 }
 0x139   : > { %1222 = vmatprep.subr.mxu1 %v1183_v57 }
 0x13b   : > { %v1174_v54 = vpop.permute.xlu0 %1173  ;;  %1573 = vmatmul.mubr.msk.f32.gmra.mxu0 %vm445_vm0, %v352_v51  ;;  %v1276_v9 = vpop.permute.xlu1 %1275 }
 0x13c   : > { %v1182_v60 = vsel %vm1179_vm10, %v1174_v54, %v1176_v56  ;;  %1370 = vmatprep.mubr.f32.mxu0 %v1662_v2 }
 0x13d   : > { %1223 = vmatpush1.msra.mxu1 %v1182_v60 }
 0x13e   : > { %1224 = vmatprep.subr.mxu1 %v1181_v61 }
 0x13f   : > { %v1284_v1 = vpop.permute.xlu0 %1283 }
 0x140   : > { %v1290_v3 = vsel %vm1287_vm11, %v1282_v0, %v1284_v1  ;;  %v1291_v28 = vsel %vm1287_vm11, %v1284_v1, %v1651_v62 }
 0x141   : > { %1576 = vmatprep.subr.msk.mxu0 %vm1877_vm5, %v1291_v28 }
 0x142   : > { %1577 = vmatpush1.msk.msra.mxu0 %vm1882_vm6, %v1290_v3 }
 0x143   : > { %v1168_v5 = vpop.permute.xlu0 %1167 }
 0x144   : > { %v1180_v7 = vsel %vm1179_vm10, %v1168_v5, %v1170_v58 }
 0x145   : > { %1225 = vmatpush1.msra.mxu1 %v1180_v7 }
 0x146   : > { %1574 = vmatmul.mubr.msk.f32.vlgmr.msra.gmra.mxu1 %vm445_vm0, %v353_v6 }
 0x147   : > { %v1278_v10 = vpop.permute.xlu0 %1277  ;;  %1264 = vmatprep.mubr.f32.mxu1 %v1662_v2 }
 0x148   : > { %v1288_v12 = vsel %vm1287_vm11, %v1276_v9, %v1278_v10  ;;  %v1289_v13 = vsel %vm1287_vm11, %v1278_v10, %v1652_v8 }
 0x149   : > { %1578 = vmatprep.subr.msk.mxu0 %vm1877_vm5, %v1289_v13 }
 0x14a   : > { %1575 = vmatmul.mubr.msk.f32.gmra.mxu1 %vm445_vm0, %v354_v11  ;;  %1579 = vmatpush1.msk.msra.mxu0 %vm1882_vm6, %v1288_v12 }
 0x14b   : > { %1580 = vmatmul.mubr.msk.f32.vlgmr.msra.gmra.mxu0 %vm445_vm0, %v355_v16 }
 0x14c   : > { %1376 = vmatprep.mubr.f32.mxu0 %v1662_v2 }
 0x14f   : > { %1581 = vmatmul.mubr.msk.f32.gmra.mxu0 %vm445_vm0, %v356_v30 }
 0x154   : > { %v1399_v11 = vpop.permute.xlu0 %1398 }
 0x1cf   : > { %v532_v17 = vpop.f32.mrf.mxu1  ;;  %v526_v19 = vpop.f32.mrf.mxu0 }
 0x1d1   : > { %v534_v18 = vpop.f32.mrf.mxu1  ;;  %v528_v20 = vpop.f32.mrf.mxu0 }
 0x1d7   : > { %v609_v63 = vpop.f32.mrf.mxu1 }
 0x1d8   : > { %v610_v33 = vadd.f32 %v609_v63, %v526_v19 }
 0x1d9   : > { %v611_v23 = vpop.f32.mrf.mxu1 }
 0x1da   : > { %v612_v35 = vadd.f32 %v611_v23, %v528_v20 }
 0x1db   : > { %v615_v14 = vpop.f32.mrf.mxu1 }
 0x1dc   : > { %v616_v38 = vadd.f32 %v615_v14, %v532_v17 }
 0x1dd   : > { %v617_v24 = vpop.f32.mrf.mxu1 }
 0x1de   : > { %v618_v43 = vadd.f32 %v617_v24, %v534_v18 }
 0x1df   : > { %v717_v15 = vpop.f32.mrf.mxu0 }
 0x1e0   : > { %v728_v37 = vadd.f32 %v717_v15, %v610_v33 }
 0x1e1   : > { %v719_v4 = vpop.f32.mrf.mxu0 }
 0x1e2   : > { %v729_v39 = vadd.f32 %v719_v4, %v612_v35 }
 0x1e3   : > { %v723_v29 = vpop.f32.mrf.mxu0 }
 0x1e4   : > { %v730_v45 = vadd.f32 %v723_v29, %v616_v38 }
 0x1e5   : > { %v725_v22 = vpop.f32.mrf.mxu0 }
 0x1e6   : > { %v731_v49 = vadd.f32 %v725_v22, %v618_v43 }
 0x1e7   : > { %v829_v31 = vpop.f32.mrf.mxu1 }
 0x1e8   : > { %v916_v32 = vpop.f32.mrf.mxu0  ;;  %v840_v41 = vadd.f32 %v829_v31, %v728_v37 }
 0x1e9   : > { %v831_v2 = vpop.f32.mrf.mxu1 }
 0x1ea   : > { %v918_v25 = vpop.f32.mrf.mxu0  ;;  %v841_v46 = vadd.f32 %v831_v2, %v729_v39  ;;  %v927_v47 = vadd.f32 %v916_v32, %v840_v41 }
 0x1eb   : > { %v835_v21 = vpop.f32.mrf.mxu1 }
 0x1ec   : > { %v922_v36 = vpop.f32.mrf.mxu0  ;;  %v842_v52 = vadd.f32 %v835_v21, %v730_v45  ;;  %v928_v53 = vadd.f32 %v918_v25, %v841_v46 }
 0x1ed   : > { %v837_v34 = vpop.f32.mrf.mxu1 }
 0x1ee   : > { %v924_v40 = vpop.f32.mrf.mxu0  ;;  %v843_v56 = vadd.f32 %v837_v34, %v731_v49  ;;  %v929_v51 = vadd.f32 %v922_v36, %v842_v52 }
 0x1f0   : > { %v930_v61 = vadd.f32 %v924_v40, %v843_v56 }
 0x1f2   : > { %v1040_v26 = vpop.f32.mrf.mxu1 }
 0x1f3   : > { %v1051_v55 = vadd.f32 %v1040_v26, %v927_v47 }
 0x1f4   : > { %v1042_v42 = vpop.f32.mrf.mxu1 }
 0x1f5   : > { %v1052_v58 = vadd.f32 %v1042_v42, %v928_v53 }
 0x1f6   : > { %v1046_v48 = vpop.f32.mrf.mxu1 }
 0x1f7   : > { %v1152_v44 = vpop.f32.mrf.mxu0  ;;  %v1053_v0 = vadd.f32 %v1046_v48, %v929_v51 }
 0x1f8   : > { %v1048_v27 = vpop.f32.mrf.mxu1  ;;  %v1163_v54 = vadd.f32 %v1152_v44, %v1051_v55 }
 0x1f9   : > { %v1154_v50 = vpop.f32.mrf.mxu0  ;;  %v1054_v5 = vadd.f32 %v1048_v27, %v930_v61 }
 0x1fa   : > { %v1164_v1 = vadd.f32 %v1154_v50, %v1052_v58 }
 0x1fb   : > { %v1158_v57 = vpop.f32.mrf.mxu0 }
 0x1fc   : > { %v1165_v7 = vadd.f32 %v1158_v57, %v1053_v0 }
 0x1fd   : > { %v1160_v62 = vpop.f32.mrf.mxu0 }
 0x1fe   : > { %v1166_v12 = vadd.f32 %v1160_v62, %v1054_v5 }
 0x206   : > { %v1260_v59 = vpop.f32.mrf.mxu1 }
 0x207   : > { %v1271_v3 = vadd.f32 %v1260_v59, %v1163_v54 }
 0x208   : > { %v1262_v60 = vpop.f32.mrf.mxu1 }
 0x209   : > { %v1272_v8 = vadd.f32 %v1262_v60, %v1164_v1 }
 0x20a   : > { %v1266_v28 = vpop.f32.mrf.mxu1 }
 0x20b   : > { %v1372_v6 = vpop.f32.mrf.mxu0  ;;  %v1273_v16 = vadd.f32 %v1266_v28, %v1165_v7 }
 0x20c   : > { %v1383_v9 = vadd.f32 %v1372_v6, %v1271_v3  ;;  %v1268_v10 = vpop.f32.mrf.mxu1 }
 0x20d   : > { %v1374_v13 = vpop.f32.mrf.mxu0  ;;  %v1274_v18 = vadd.f32 %v1268_v10, %v1166_v12 }
 0x20e   : > { %vm1388_vm12 = vcmp.gt.f32.partialorder %v1383_v9, 0.0  ;;  %v1401_v30 = vmul.f32 %v1399_v11, %v1383_v9  ;;  %v1384_v17 = vadd.f32 %v1374_v13, %v1272_v8 }
 0x20f   : > { %v1378_v19 = vpop.f32.mrf.mxu0 }
 0x210   : > { %v1405_v63 = vsel %vm1388_vm12, %v1383_v9, %v1401_v30  ;;  %vm1389_vm13 = vcmp.gt.f32.partialorder %v1384_v17, 0.0  ;;  %v1402_v20 = vmul.f32 %v1399_v11, %v1384_v17  ;;  %v1385_v23 = vadd.f32 %v1378_v19, %v1273_v16 }
 0x211   : > { %1409 = vst [vmem:[%s306_s14] sm:$0xff] %v1405_v63  ;;  %v1380_v15 = vpop.f32.mrf.mxu0 }
 0x212   : > { %v1406_v14 = vsel %vm1389_vm13, %v1384_v17, %v1402_v20  ;;  %vm1390_vm14 = vcmp.gt.f32.partialorder %v1385_v23, 0.0  ;;  %v1403_v4 = vmul.f32 %v1399_v11, %v1385_v23  ;;  %v1386_v24 = vadd.f32 %v1380_v15, %v1274_v18 }
 0x213   : > { %1410 = vst [vmem:[%s306_s14 + $0x8] sm:$0xff] %v1406_v14 }
 0x214   : > { %v1407_v29 = vsel %vm1390_vm14, %v1385_v23, %v1403_v4  ;;  %vm1391_vm15 = vcmp.gt.f32.partialorder %v1386_v24, 0.0  ;;  %v1404_v31 = vmul.f32 %v1399_v11, %v1386_v24 }
 0x215   : > { %1411 = vst [vmem:[%s306_s14 + $0x10] sm:$0xff] %v1407_v29 }
 0x216   : > { %v1408_v22 = vsel %vm1391_vm15, %v1386_v24, %v1404_v31 }
 0x217   : > { %1412 = vst [vmem:[%s306_s14 + $0x18] sm:$0xff] %v1408_v22 }
 0x218 PF: > { %s19_s23 = sadd.s32 1, %s1659_s23  }
 0x219   : > { %p16_p4 = scmp.ge.s32.totalorder %s19_s23, 4  }
 0x21b   :  { %18 = sbr.rel (!%p16_p4) target bundleno = 3 (0x3), region = 88 }

// kernel: orsnet_forward.11
= control target key start
LH: loop header
LB: loop body
LE: loop exit
PB: predicated region body
PF: predicated region fallthrough
CT: control target
= control target key end

     0   :  { %s602_s18 = smov 0   ;;  %s641_s0 = inlined_call_operand.vmem [shape: f32[2,16,256], index: 0, kind: input, shape index: {}]   ;;  %s642_s1 = inlined_call_operand.vmem [shape: f32[2,8,256], index: 1, kind: input, shape index: {}]   ;;  %s643_s2 = inlined_call_operand.vmem [shape: f32[2,8,256], index: 2, kind: input, shape index: {}]   ;;  %s644_s3 = inlined_call_operand.vmem [shape: f32[16,8], index: 3, kind: input, shape index: {}]   ;;  %s645_s4 = inlined_call_operand.vmem [shape: f32[16,8], index: 4, kind: input, shape index: {}]   ;;  %s646_s5 = inlined_call_operand.vmem [shape: f32[2,16,256], index: 5, kind: output, shape index: {}]  }
   0x1 LB: > { %s531_s19 = sadd.s32 4294967295, %s569_s18   ;;  %p535_p0 = scmp.ge.s32.totalorder %s569_s18, 1  ;;  %s569_s18 = sphi %s602_s18, %s15_s18  }
   0x2   : > { %p207_p1 = scmp.lt.s32.totalorder %s569_s18, 3 }
   0x4   : > { %p208_p2 = pnand %p535_p0, %p207_p1 }
   0x5   : > { %p245_p3 = scmp.lt.s32.totalorder (!%p208_p2), %s531_s19, 1 }
   0x6   : > { %211 = sbr.rel (%p208_p2) target bundleno = 222 (0xde), region = 40 }
   0xb   : > { %v571_v0 = vmov 0.0   ;;  %s648_s19 = smov (!%p245_p3, %s531_s19), 1  ;;  %v269_v3 = vld [vmem:[%s645_s4] sm:$0xff]  ;;  %vm273_vm0 = vcmask 64512   ;;  %v270_v7 = vld [vmem:[%s645_s4 + $0x8] sm:$0xff] }
   0xc   : > { %344 = vmatprep.mubr.f32.mxu0 %v571_v0  ;;  %427 = vmatprep.mubr.f32.mxu1 %v571_v0  ;;  %s551_s20 = sshll.u32 %s648_s19, 4  ;;  %v265_v6 = vld [vmem:[%s644_s3] sm:$0xff]  ;;  %v266_v8 = vld [vmem:[%s644_s3 + $0x8] sm:$0xff]  ;;  %s550_s10 = sshll.u32 %s648_s19, 5 }
   0xd   : > { %s259_s23 = scalar_lea.vmem %s643_s2, %s551_s20  ;;  %s254_s26 = scalar_lea.vmem %s642_s1, %s551_s20 }
   0xe   : > { %v272_v1 = vld [vmem:[%s259_s23 + $0x8] sm:$0xff]  ;;  %v271_v2 = vld [vmem:[%s259_s23] sm:$0xff]  ;;  %s249_s13 = scalar_lea.vmem %s641_s0, %s550_s10  ;;  %s264_s16 = scalar_lea.vmem %s646_s5, %s550_s10 }
   0xf   : > { %310 = vmatprep.subr.mxu0 %v272_v1  ;;  %v268_v4 = vld [vmem:[%s254_s26 + $0x8] sm:$0xff]  ;;  %v267_v5 = vld [vmem:[%s254_s26] sm:$0xff]  ;;  %v442_v20 = vld [vmem:[%s249_s13 + $0x10] sm:$0xff] }
  0x10   : > { %393 = vmatprep.subr.mxu1 %v268_v4  ;;  %311 = vmatpush1.msra.mxu0 %v271_v2  ;;  %v440_v11 = vld [vmem:[%s249_s13] sm:$0xff]  ;;  %v441_v15 = vld [vmem:[%s249_s13 + $0x8] sm:$0xff]  ;;  %v443_v25 = vld [vmem:[%s249_s13 + $0x18] sm:$0xff] }
  0x11   : > { %394 = vmatpush1.msra.mxu1 %v267_v5  ;;  %544 = vmatmul.mubr.msk.f32.vlgmr.msra.gmra.mxu0 %vm273_vm0, %v269_v3 }
  0x12   : > { %546 = vmatmul.mubr.msk.f32.vlgmr.msra.gmra.mxu1 %vm273_vm0, %v265_v6  ;;  %350 = vmatprep.mubr.f32.mxu0 %v571_v0 }
  0x13   : > { %433 = vmatprep.mubr.f32.mxu1 %v571_v0 }
  0x15   : > { %545 = vmatmul.mubr.msk.f32.gmra.mxu0 %vm273_vm0, %v270_v7 }
  0x16   : > { %547 = vmatmul.mubr.msk.f32.gmra.mxu1 %vm273_vm0, %v266_v8 }
  0xd1   : > { %v346_v9 = vpop.f32.mrf.mxu0 }
  0xd2   : > { %v429_v10 = vpop.f32.mrf.mxu1 }
  0xd3   : > { %v430_v12 = vadd.f32 %v429_v10, %v346_v9  ;;  %v348_v13 = vpop.f32.mrf.mxu0 }
  0xd4   : > { %v431_v14 = vpop.f32.mrf.mxu1 }
  0xd5   : > { %v444_v16 = vadd.f32 %v440_v11, %v430_v12  ;;  %v432_v17 = vadd.f32 %v431_v14, %v348_v13  ;;  %v352_v18 = vpop.f32.mrf.mxu0 }
  0xd6   : > { %v435_v19 = vpop.f32.mrf.mxu1 }
  0xd7   : > { %448 = vst [vmem:[%s264_s16] sm:$0xff] %v444_v16  ;;  %v445_v21 = vadd.f32 %v441_v15, %v432_v17  ;;  %v436_v22 = vadd.f32 %v435_v19, %v352_v18  ;;  %v354_v23 = vpop.f32.mrf.mxu0 }
  0xd8   : > { %v437_v24 = vpop.f32.mrf.mxu1 }
  0xd9   : > { %449 = vst [vmem:[%s264_s16 + $0x8] sm:$0xff] %v445_v21  ;;  %v446_v26 = vadd.f32 %v442_v20, %v436_v22  ;;  %v438_v27 = vadd.f32 %v437_v24, %v354_v23 }
  0xdb   : > { %450 = vst [vmem:[%s264_s16 + $0x10] sm:$0xff] %v446_v26  ;;  %v447_v28 = vadd.f32 %v443_v25, %v438_v27 }
  0xdd   : > { %451 = vst [vmem:[%s264_s16 + $0x18] sm:$0xff] %v447_v28 }
  0xde PF: > { %s15_s18 = sadd.s32 1, %s569_s18  }
  0xdf   : > { %p12_p4 = scmp.ge.s32.totalorder %s15_s18, 4  }
  0xe1   :  { %14 = sbr.rel (!%p12_p4) target bundleno = 1 (0x1), region = 76 }

</bundles_post_ra>
